<compile_context>
chip_gen: v7x
topology: tpu7x:2x2x1
jax: 0.10.0
libtpu: 0.0.40
codegen_flags: <defaults>
</compile_context>

<pallas_src>
import math
from functools import partial

import jax
import jax.numpy as jnp
from jax.experimental import pallas as pl
from jax.experimental.pallas import tpu as pltpu


# ----------------------------- config -----------------------------

class Config:
    emb_size = 32
    n_head = 2
    n_encoder = 2
    n_decoder = 2
    ffn_hid_dim = 64
    model_dropout = 0.0      # inference: dropout is identity
    activation = "relu"


NEG = -1e9  # large-negative instead of -inf keeps softmax NaN-free


# ----------------------------- fused Pallas kernel -----------------------------

def _transformer_kernel(src_ids_ref, tgt_ids_ref, src_mask_ref, tgt_mask_ref,
                        src_add_ref, tgt_add_ref, mem_add_ref, slab_ref, out_ref,
                        *, layout, dims):
    """One batch element per grid step; everything VMEM-resident."""
    S, T, E, H, n_enc, n_dec = dims
    dh = E // H
    f32, bf16 = jnp.float32, jnp.bfloat16

    # ---- parameter access: static, 8-row-aligned slices of the packed slab ----
    def get(name, rows=None):
        off, r, c = layout[name]
        r = r if rows is None else rows
        return slab_ref[off:off + r, :c]

    def mxu(a, b):
        # bf16 operands, f32 accumulation (MXU-native on v5e/v6e/v7x)
        return jnp.dot(a.astype(bf16), b.astype(bf16), preferred_element_type=f32)

    def layer_norm(x, pfx):
        g, b = get(pfx + "g"), get(pfx + "b")            # (1, E)
        mu = jnp.mean(x, axis=-1, keepdims=True)
        var = jnp.mean(jnp.square(x - mu), axis=-1, keepdims=True)
        return (x - mu) * jax.lax.rsqrt(var + 1e-5) * g + b

    # per-head column mask stacked over query row-blocks: (H*Lq, E)
    def head_mask(Lq):
        col = jax.lax.broadcasted_iota(jnp.int32, (Lq, E), 1)
        blocks = [((col >= h * dh) & (col < (h + 1) * dh)).astype(f32)
                  for h in range(H)]
        return jnp.concatenate(blocks, axis=0)

    hmask_s = head_mask(S)
    hmask_t = hmask_s if T == S else head_mask(T)

    def mha(xq, xkv, Lq, bias, hm, pfx):
        """bias: (Lq, Lk) additive; hm: (H*Lq, E) head mask; scale folded in wq."""
        q = mxu(xq, get(pfx + "wq")) + get(pfx + "bq")    # (Lq, E)
        k = mxu(xkv, get(pfx + "wk")) + get(pfx + "bk")   # (Lk, E)
        v = mxu(xkv, get(pfx + "wv")) + get(pfx + "bv")   # (Lk, E)
        # stack queries over heads (sublane-aligned) and mask to head columns
        qs = jnp.concatenate([q] * H, axis=0) * hm        # (H*Lq, E)
        # one MXU push for ALL heads' scores
        s = jax.lax.dot_general(qs.astype(bf16), k.astype(bf16),
                                (((1,), (1,)), ((), ())),
                                preferred_element_type=f32)      # (H*Lq, Lk)
        s = s + jnp.concatenate([bias] * H, axis=0)
        s = s - jnp.max(s, axis=-1, keepdims=True)
        e = jnp.exp(s)
        pr = e * pl.reciprocal(jnp.sum(e, axis=-1, keepdims=True), approx=True)
        # one MXU push for ALL heads' PV; mask + aligned row-block sum recombines
        o = mxu(pr, v) * hm                                # (H*Lq, E)
        om = o[0:Lq]
        for h in range(1, H):
            om = om + o[h * Lq:(h + 1) * Lq]               # (Lq, E)
        return mxu(om, get(pfx + "wo")) + get(pfx + "bo")

    def ffn(x, pfx):
        h = mxu(x, get(pfx + "w1")) + get(pfx + "b1")
        h = jnp.maximum(h, 0.0)                            # relu
        return mxu(h, get(pfx + "w2")) + get(pfx + "b2")

    # ---- embeddings: in-kernel one-hot gather on the MXU (sqrt(E) pre-folded) ----
    def embed(ids_col, name, L):
        _, V, _ = layout[name]
        iota = jax.lax.broadcasted_iota(jnp.int32, (L, V), 1)
        onehot = (iota == ids_col).astype(f32)             # (L, V)
        return mxu(onehot, get(name))                      # (L, E)

    src_ids = src_ids_ref[0]                               # (S, 1) int32
    tgt_ids = tgt_ids_ref[0]                               # (T, 1) int32
    x = embed(src_ids, "src_emb", S) + get("pos", S)       # (S, E)
    y = embed(tgt_ids, "tgt_emb", T) + get("pos", T)       # (T, E)

    # ---- additive attention biases, built in-kernel ----
    enc_bias = src_mask_ref[...] + src_add_ref[0]          # (S, S)
    dec_self_bias = tgt_mask_ref[...] + tgt_add_ref[0]     # (T, T)
    dec_cross_bias = jnp.broadcast_to(mem_add_ref[0], (T, S))

    # ---- encoder stack (post-LN, PyTorch default) ----
    for i in range(n_enc):
        pref = f"e{i}."
        a = mha(x, x, S, enc_bias, hmask_s, pref + "sa.")
        x = layer_norm(x + a, pref + "ln1_")
        x = layer_norm(x + ffn(x, pref), pref + "ln2_")
    mem = layer_norm(x, "enc_norm_")                       # (S, E)

    # ---- decoder stack ----
    for i in range(n_dec):
        pref = f"d{i}."
        a = mha(y, y, T, dec_self_bias, hmask_t, pref + "sa.")
        y = layer_norm(y + a, pref + "ln1_")
        a = mha(y, mem, T, dec_cross_bias, hmask_t, pref + "ca.")
        y = layer_norm(y + a, pref + "ln2_")
        y = layer_norm(y + ffn(y, pref), pref + "ln3_")
    y = layer_norm(y, "dec_norm_")                         # (T, E)

    # ---- generator: Linear(E,4E) -> Linear(4E, VPAD) (lane-dense 128) ----
    h = mxu(y, get("inner_w")) + get("inner_b")            # (T, 4E=128)
    logits = mxu(h, get("gen_w")) + get("gen_b")           # (T, VPAD=128)
    out_ref[0] = logits


# ----------------------------- parameter packing -----------------------------

def _round8(n):
    return (n + 7) // 8 * 8


class _Packer:
    """Pack 2D tensors into one (R,128) f32 slab with 8-aligned row offsets."""

    def __init__(self):
        self.entries, self.layout, self.off = [], {}, 0

    def add(self, name, arr):
        arr = jnp.asarray(arr, jnp.float32)
        assert arr.ndim == 2 and arr.shape[1] <= 128, (name, arr.shape)
        r, c = arr.shape
        self.layout[name] = (self.off, r, c)
        self.entries.append(jnp.pad(arr, ((0, _round8(r) - r), (0, 128 - c))))
        self.off += _round8(r)

    def finish(self):
        return jnp.concatenate(self.entries, axis=0), self.layout


def pack_params(params, cfg, tgt_vocab):
    """One-time (outside jit) packing; folds sqrt(E), 1/sqrt(dh), vocab pad."""
    E, H = cfg.emb_size, cfg.n_head
    dh = E // H
    V = tgt_vocab
    VPAD = ((V + 127) // 128) * 128
    pk = _Packer()
    sqrt_e = math.sqrt(E)
    pk.add("src_emb", params["src_emb"] * sqrt_e)
    pk.add("tgt_emb", params["tgt_emb"] * sqrt_e)
    pk.add("pos", params["pos"])

    def add_mha(pfx, mp):
        w_in, b_in = mp["w_in"], mp["b_in"]
        inv = 1.0 / math.sqrt(dh)                     # fold attention scale into Q
        pk.add(pfx + "wq", w_in[:, :E] * inv)
        pk.add(pfx + "bq", b_in[:, :E] * inv)
        pk.add(pfx + "wk", w_in[:, E:2 * E])
        pk.add(pfx + "bk", b_in[:, E:2 * E])
        pk.add(pfx + "wv", w_in[:, 2 * E:])
        pk.add(pfx + "bv", b_in[:, 2 * E:])
        pk.add(pfx + "wo", mp["w_out"])
        pk.add(pfx + "bo", mp["b_out"])

    for i, lp in enumerate(params["encoder_layers"]):
        pfx = f"e{i}."
        add_mha(pfx + "sa.", lp["self_attn"])
        pk.add(pfx + "w1", lp["ffn_w1"]); pk.add(pfx + "b1", lp["ffn_b1"])
        pk.add(pfx + "w2", lp["ffn_w2"]); pk.add(pfx + "b2", lp["ffn_b2"])
        for n in ("ln1_g", "ln1_b", "ln2_g", "ln2_b"):
            pk.add(pfx + n, lp[n])
    for i, lp in enumerate(params["decoder_layers"]):
        pfx = f"d{i}."
        add_mha(pfx + "sa.", lp["self_attn"])
        add_mha(pfx + "ca.", lp["cross_attn"])
        pk.add(pfx + "w1", lp["ffn_w1"]); pk.add(pfx + "b1", lp["ffn_b1"])
        pk.add(pfx + "w2", lp["ffn_w2"]); pk.add(pfx + "b2", lp["ffn_b2"])
        for n in ("ln1_g", "ln1_b", "ln2_g", "ln2_b", "ln3_g", "ln3_b"):
            pk.add(pfx + n, lp[n])
    pk.add("enc_norm_g", params["enc_norm_g"]); pk.add("enc_norm_b", params["enc_norm_b"])
    pk.add("dec_norm_g", params["dec_norm_g"]); pk.add("dec_norm_b", params["dec_norm_b"])
    pk.add("inner_w", params["inner_w"]); pk.add("inner_b", params["inner_b"])
    pk.add("gen_w", jnp.pad(params["gen_w"], ((0, 0), (0, VPAD - V))))
    pk.add("gen_b", jnp.pad(params["gen_b"], ((0, 0), (0, VPAD - V))))
    slab, layout = pk.finish()
    return slab, layout, VPAD


# ----------------------------- forward wrapper -----------------------------

def build_forward(cfg, layout, tgt_vocab, vpad):
    E, H = cfg.emb_size, cfg.n_head
    n_enc, n_dec = cfg.n_encoder, cfg.n_decoder

    def forward(slab, src, tgt, src_mask, tgt_mask, src_pad, tgt_pad, mem_pad):
        S, B = src.shape
        T, _ = tgt.shape
        R = slab.shape[0]

        # per-batch token ids as (B, L, 1); padding masks as additive (B, 1, L)
        src_ids = src.T.reshape(B, S, 1).astype(jnp.int32)
        tgt_ids = tgt.T.reshape(B, T, 1).astype(jnp.int32)
        src_add = jnp.where(src_pad, NEG, 0.0).astype(jnp.float32).reshape(B, 1, S)
        tgt_add = jnp.where(tgt_pad, NEG, 0.0).astype(jnp.float32).reshape(B, 1, T)
        mem_add = jnp.where(mem_pad, NEG, 0.0).astype(jnp.float32).reshape(B, 1, S)

        kernel = partial(_transformer_kernel, layout=layout,
                         dims=(S, T, E, H, n_enc, n_dec))
        logits_pad = pl.pallas_call(
            kernel,
            out_shape=jax.ShapeDtypeStruct((B, T, vpad), jnp.float32),
            grid=(B,),
            in_specs=[
                pl.BlockSpec((1, S, 1), lambda b: (b, 0, 0)),   # src token ids
                pl.BlockSpec((1, T, 1), lambda b: (b, 0, 0)),   # tgt token ids
                pl.BlockSpec((S, S), lambda b: (0, 0)),         # src attn mask
                pl.BlockSpec((T, T), lambda b: (0, 0)),         # tgt attn mask
                pl.BlockSpec((1, 1, S), lambda b: (b, 0, 0)),   # src pad bias
                pl.BlockSpec((1, 1, T), lambda b: (b, 0, 0)),   # tgt pad bias
                pl.BlockSpec((1, 1, S), lambda b: (b, 0, 0)),   # mem pad bias
                pl.BlockSpec((R, 128), lambda b: (0, 0)),       # packed params
            ],
            out_specs=pl.BlockSpec((1, T, vpad), lambda b: (b, 0, 0)),
            compiler_params=pltpu.CompilerParams(
                dimension_semantics=("parallel",),
                vmem_limit_bytes=32 * 1024 * 1024),
        )(src_ids, tgt_ids, src_mask, tgt_mask, src_add, tgt_add, mem_add, slab)

        # back to PyTorch layout: (S_tgt, B, tgt_vocab)
        return logits_pad[:, :, :tgt_vocab].transpose(1, 0, 2)

    return forward


# ----------------------------- parameter init -----------------------------

def _lin_init(key, d_in, d_out, scale=0.05):
    k1, k2 = jax.random.split(key)
    w = jax.random.normal(k1, (d_in, d_out), jnp.float32) * scale
    b = jax.random.normal(k2, (1, d_out), jnp.float32) * scale
    return w, b


def _mha_init(key, E):
    k1, k2 = jax.random.split(key)
    w_in, b_in = _lin_init(k1, E, 3 * E)
    w_out, b_out = _lin_init(k2, E, E)
    return {"w_in": w_in, "b_in": b_in, "w_out": w_out, "b_out": b_out}


def _enc_layer_init(key, cfg):
    E, F = cfg.emb_size, cfg.ffn_hid_dim
    ks = jax.random.split(key, 3)
    w1, b1 = _lin_init(ks[1], E, F)
    w2, b2 = _lin_init(ks[2], F, E)
    return {"self_attn": _mha_init(ks[0], E),
            "ffn_w1": w1, "ffn_b1": b1, "ffn_w2": w2, "ffn_b2": b2,
            "ln1_g": jnp.ones((1, E)), "ln1_b": jnp.zeros((1, E)),
            "ln2_g": jnp.ones((1, E)), "ln2_b": jnp.zeros((1, E))}


def _dec_layer_init(key, cfg):
    E, F = cfg.emb_size, cfg.ffn_hid_dim
    ks = jax.random.split(key, 4)
    w1, b1 = _lin_init(ks[2], E, F)
    w2, b2 = _lin_init(ks[3], F, E)
    return {"self_attn": _mha_init(ks[0], E),
            "cross_attn": _mha_init(ks[1], E),
            "ffn_w1": w1, "ffn_b1": b1, "ffn_w2": w2, "ffn_b2": b2,
            "ln1_g": jnp.ones((1, E)), "ln1_b": jnp.zeros((1, E)),
            "ln2_g": jnp.ones((1, E)), "ln2_b": jnp.zeros((1, E)),
            "ln3_g": jnp.ones((1, E)), "ln3_b": jnp.zeros((1, E))}


def make_pos_table(maxlen, E):
    den = jnp.exp(-jnp.arange(0, E, 2, dtype=jnp.float32) * math.log(10000.0) / E)
    pos = jnp.arange(maxlen, dtype=jnp.float32)[:, None]
    pe = jnp.zeros((maxlen, E), jnp.float32)
    pe = pe.at[:, 0::2].set(jnp.sin(pos * den))
    pe = pe.at[:, 1::2].set(jnp.cos(pos * den))
    return pe                                             # (maxlen, E)


def init_params(key, src_vocab, tgt_vocab, cfg, maxlen=64):
    E = cfg.emb_size
    ks = jax.random.split(key, 6 + cfg.n_encoder + cfg.n_decoder)
    it = iter(ks)
    params = {
        "src_emb": jax.random.normal(next(it), (src_vocab, E), jnp.float32) * 0.05,
        "tgt_emb": jax.random.normal(next(it), (tgt_vocab, E), jnp.float32) * 0.05,
        "pos": make_pos_table(maxlen, E),
        "encoder_layers": [_enc_layer_init(next(it), cfg)
                           for _ in range(cfg.n_encoder)],
        "decoder_layers": [_dec_layer_init(next(it), cfg)
                           for _ in range(cfg.n_decoder)],
        "enc_norm_g": jnp.ones((1, E)), "enc_norm_b": jnp.zeros((1, E)),
        "dec_norm_g": jnp.ones((1, E)), "dec_norm_b": jnp.zeros((1, E)),
    }
    iw, ib = _lin_init(next(it), E, 4 * E)
    gw, gb = _lin_init(next(it), 4 * E, tgt_vocab)
    params.update({"inner_w": iw, "inner_b": ib, "gen_w": gw, "gen_b": gb})
    return params


# ----------------------------- main -----------------------------

if __name__ == "__main__":
    cfg = Config()
    SRC_VOCAB, TGT_VOCAB = 50, 60
    S_SRC, S_TGT, B = 8, 8, 2

    root = jax.random.PRNGKey(0)
    kp, ks, kt = jax.random.split(root, 3)
    params = init_params(kp, SRC_VOCAB, TGT_VOCAB, cfg)
    # one-time packing (outside jit): folds sqrt(E), 1/sqrt(dh), vocab padding
    slab, layout, VPAD = pack_params(params, cfg, TGT_VOCAB)

    src = jax.random.randint(ks, (S_SRC, B), 0, SRC_VOCAB, dtype=jnp.int32)
    tgt = jax.random.randint(kt, (S_TGT, B), 0, TGT_VOCAB, dtype=jnp.int32)

    # src_mask: zeros; tgt_mask: causal additive (large-negative above diag).
    src_mask = jnp.zeros((S_SRC, S_SRC), jnp.float32)
    causal = jnp.triu(jnp.ones((S_TGT, S_TGT), jnp.bool_), k=1)
    tgt_mask = jnp.where(causal, NEG, 0.0).astype(jnp.float32)

    # key-padding masks: True == padding position.
    src_padding_mask = jnp.zeros((B, S_SRC), jnp.bool_).at[:, -1].set(True)
    tgt_padding_mask = jnp.zeros((B, S_TGT), jnp.bool_).at[:, -1].set(True)
    memory_key_padding_mask = src_padding_mask

    fwd = jax.jit(build_forward(cfg, layout, TGT_VOCAB, VPAD))
    logits = fwd(slab, src, tgt, src_mask, tgt_mask,
                 src_padding_mask, tgt_padding_mask, memory_key_padding_mask)
    jax.block_until_ready(logits)
    assert logits.shape == (S_TGT, B, TGT_VOCAB)
    assert bool(jnp.all(jnp.isfinite(logits)))
    # TODO(synk): dropout layers are identity here (inference semantics).
    print("KERNEL_OK")
</pallas_src>

<mosaic_0001>
module attributes {stable_mosaic.version = 11 : i64} {
  func.func @_transformer_kernel(%arg0: i32, %arg1: memref<1x8x1xi32, #tpu.memory_space<vmem>>, %arg2: memref<1x8x1xi32, #tpu.memory_space<vmem>>, %arg3: memref<8x8xf32, #tpu.memory_space<vmem>>, %arg4: memref<8x8xf32, #tpu.memory_space<vmem>>, %arg5: memref<1x1x8xf32, #tpu.memory_space<vmem>>, %arg6: memref<1x1x8xf32, #tpu.memory_space<vmem>>, %arg7: memref<1x1x8xf32, #tpu.memory_space<vmem>>, %arg8: memref<1960x128xf32, #tpu.memory_space<vmem>>, %arg9: memref<1x8x128xf32, #tpu.memory_space<vmem>>) attributes {dimension_semantics = [#tpu.dimension_semantics<parallel>], iteration_bounds = array<i64: 2>, scalar_prefetch = 0 : i64, scratch_operands = 0 : i64, tpu.core_type = #tpu.core_type<tc>, window_params = [{transform_indices = @transform_0, window_bounds = array<i64: 1, 8, 1>}, {transform_indices = @transform_1, window_bounds = array<i64: 1, 8, 1>}, {pipeline_mode = #tpu.pipeline_mode<synchronous>, transform_indices = @transform_2, window_bounds = array<i64: 8, 8>}, {pipeline_mode = #tpu.pipeline_mode<synchronous>, transform_indices = @transform_3, window_bounds = array<i64: 8, 8>}, {transform_indices = @transform_4, window_bounds = array<i64: 1, 1, 8>}, {transform_indices = @transform_5, window_bounds = array<i64: 1, 1, 8>}, {transform_indices = @transform_6, window_bounds = array<i64: 1, 1, 8>}, {pipeline_mode = #tpu.pipeline_mode<synchronous>, transform_indices = @transform_7, window_bounds = array<i64: 1960, 128>}, {transform_indices = @transform_8, window_bounds = array<i64: 1, 8, 128>}]} {
    %0 = tpu.iota {dimensions = array<i32: 1>} : vector<8x32xi32>
    %c0_i32 = arith.constant 0 : i32
    %1 = vector.broadcast %c0_i32 : i32 to vector<8x32xi32>
    %2 = arith.cmpi sge, %0, %1 : vector<8x32xi32>
    %c16_i32 = arith.constant 16 : i32
    %3 = vector.broadcast %c16_i32 : i32 to vector<8x32xi32>
    %4 = arith.cmpi slt, %0, %3 : vector<8x32xi32>
    %5 = arith.andi %2, %4 : vector<8x32xi1>
    %6 = arith.extui %5 : vector<8x32xi1> to vector<8x32xi32>
    %7 = arith.sitofp %6 : vector<8x32xi32> to vector<8x32xf32>
    %c16_i32_0 = arith.constant 16 : i32
    %8 = vector.broadcast %c16_i32_0 : i32 to vector<8x32xi32>
    %9 = arith.cmpi sge, %0, %8 : vector<8x32xi32>
    %c32_i32 = arith.constant 32 : i32
    %10 = vector.broadcast %c32_i32 : i32 to vector<8x32xi32>
    %11 = arith.cmpi slt, %0, %10 : vector<8x32xi32>
    %12 = arith.andi %9, %11 : vector<8x32xi1>
    %13 = arith.extui %12 : vector<8x32xi1> to vector<8x32xi32>
    %14 = arith.sitofp %13 : vector<8x32xi32> to vector<8x32xf32>
    %15 = tpu.concatenate %7, %14 in 0 : vector<8x32xf32>, vector<8x32xf32> -> vector<16x32xf32>
    %c0 = arith.constant 0 : index
    %c0_1 = arith.constant 0 : index
    %c0_2 = arith.constant 0 : index
    %16 = vector.load %arg1[%c0, %c0_1, %c0_2] : memref<1x8x1xi32, #tpu.memory_space<vmem>>, vector<1x8x1xi32>
    %17 = vector.shape_cast %16 : vector<1x8x1xi32> to vector<8x1xi32>
    %c0_3 = arith.constant 0 : index
    %c0_4 = arith.constant 0 : index
    %c0_5 = arith.constant 0 : index
    %18 = vector.load %arg2[%c0_3, %c0_4, %c0_5] : memref<1x8x1xi32, #tpu.memory_space<vmem>>, vector<1x8x1xi32>
    %19 = vector.shape_cast %18 : vector<1x8x1xi32> to vector<8x1xi32>
    %20 = tpu.iota {dimensions = array<i32: 1>} : vector<8x50xi32>
    %21 = vector.broadcast %17 : vector<8x1xi32> to vector<8x50xi32>
    %22 = arith.cmpi eq, %20, %21 : vector<8x50xi32>
    %23 = arith.extui %22 : vector<8x50xi1> to vector<8x50xi32>
    %24 = arith.sitofp %23 : vector<8x50xi32> to vector<8x50xf32>
    %c0_6 = arith.constant 0 : index
    %c0_7 = arith.constant 0 : index
    %25 = vector.load %arg8[%c0_6, %c0_7] : memref<1960x128xf32, #tpu.memory_space<vmem>>, vector<50x32xf32>
    %26 = arith.truncf %24 : vector<8x50xf32> to vector<8x50xbf16>
    %27 = arith.truncf %25 : vector<50x32xf32> to vector<50x32xbf16>
    %cst = arith.constant dense<0.000000e+00> : vector<8x32xf32>
    %28 = tpu.matmul %26, %27, %cst {dimension_numbers = #tpu.dot_dimension_numbers<[1], [0], [0], [1], [0, 0, 1, 1], [], []>} : vector<8x50xbf16>, vector<50x32xbf16>, vector<8x32xf32> -> vector<8x32xf32>
    %c120 = arith.constant 120 : index
    %c0_8 = arith.constant 0 : index
    %29 = vector.load %arg8[%c120, %c0_8] : memref<1960x128xf32, #tpu.memory_space<vmem>>, vector<8x32xf32>
    %30 = arith.addf %28, %29 : vector<8x32xf32>
    %31 = tpu.iota {dimensions = array<i32: 1>} : vector<8x60xi32>
    %32 = vector.broadcast %19 : vector<8x1xi32> to vector<8x60xi32>
    %33 = arith.cmpi eq, %31, %32 : vector<8x60xi32>
    %34 = arith.extui %33 : vector<8x60xi1> to vector<8x60xi32>
    %35 = arith.sitofp %34 : vector<8x60xi32> to vector<8x60xf32>
    %c56 = arith.constant 56 : index
    %c0_9 = arith.constant 0 : index
    %36 = vector.load %arg8[%c56, %c0_9] : memref<1960x128xf32, #tpu.memory_space<vmem>>, vector<60x32xf32>
    %37 = arith.truncf %35 : vector<8x60xf32> to vector<8x60xbf16>
    %38 = arith.truncf %36 : vector<60x32xf32> to vector<60x32xbf16>
    %cst_10 = arith.constant dense<0.000000e+00> : vector<8x32xf32>
    %39 = tpu.matmul %37, %38, %cst_10 {dimension_numbers = #tpu.dot_dimension_numbers<[1], [0], [0], [1], [0, 0, 1, 1], [], []>} : vector<8x60xbf16>, vector<60x32xbf16>, vector<8x32xf32> -> vector<8x32xf32>
    %c120_11 = arith.constant 120 : index
    %c0_12 = arith.constant 0 : index
    %40 = vector.load %arg8[%c120_11, %c0_12] : memref<1960x128xf32, #tpu.memory_space<vmem>>, vector<8x32xf32>
    %41 = arith.addf %39, %40 : vector<8x32xf32>
    %c0_13 = arith.constant 0 : index
    %c0_14 = arith.constant 0 : index
    %42 = vector.load %arg3[%c0_13, %c0_14] : memref<8x8xf32, #tpu.memory_space<vmem>>, vector<8x8xf32>
    %c0_15 = arith.constant 0 : index
    %c0_16 = arith.constant 0 : index
    %c0_17 = arith.constant 0 : index
    %43 = vector.load %arg5[%c0_15, %c0_16, %c0_17] : memref<1x1x8xf32, #tpu.memory_space<vmem>>, vector<1x1x8xf32>
    %44 = vector.shape_cast %43 : vector<1x1x8xf32> to vector<1x8xf32>
    %45 = vector.broadcast %44 : vector<1x8xf32> to vector<8x8xf32>
    %46 = arith.addf %42, %45 : vector<8x8xf32>
    %c0_18 = arith.constant 0 : index
    %c0_19 = arith.constant 0 : index
    %47 = vector.load %arg4[%c0_18, %c0_19] : memref<8x8xf32, #tpu.memory_space<vmem>>, vector<8x8xf32>
    %c0_20 = arith.constant 0 : index
    %c0_21 = arith.constant 0 : index
    %c0_22 = arith.constant 0 : index
    %48 = vector.load %arg6[%c0_20, %c0_21, %c0_22] : memref<1x1x8xf32, #tpu.memory_space<vmem>>, vector<1x1x8xf32>
    %49 = vector.shape_cast %48 : vector<1x1x8xf32> to vector<1x8xf32>
    %50 = vector.broadcast %49 : vector<1x8xf32> to vector<8x8xf32>
    %51 = arith.addf %47, %50 : vector<8x8xf32>
    %c0_23 = arith.constant 0 : index
    %c0_24 = arith.constant 0 : index
    %c0_25 = arith.constant 0 : index
    %52 = vector.load %arg7[%c0_23, %c0_24, %c0_25] : memref<1x1x8xf32, #tpu.memory_space<vmem>>, vector<1x1x8xf32>
    %53 = vector.shape_cast %52 : vector<1x1x8xf32> to vector<1x8xf32>
    %54 = vector.shape_cast %53 : vector<1x8xf32> to vector<1x8xf32>
    %55 = vector.broadcast %54 : vector<1x8xf32> to vector<8x8xf32>
    %c184 = arith.constant 184 : index
    %c0_26 = arith.constant 0 : index
    %56 = vector.load %arg8[%c184, %c0_26] : memref<1960x128xf32, #tpu.memory_space<vmem>>, vector<32x32xf32>
    %57 = arith.truncf %30 : vector<8x32xf32> to vector<8x32xbf16>
    %58 = arith.truncf %56 : vector<32x32xf32> to vector<32x32xbf16>
    %cst_27 = arith.constant dense<0.000000e+00> : vector<8x32xf32>
    %59 = tpu.matmul %57, %58, %cst_27 {dimension_numbers = #tpu.dot_dimension_numbers<[1], [0], [0], [1], [0, 0, 1, 1], [], []>} : vector<8x32xbf16>, vector<32x32xbf16>, vector<8x32xf32> -> vector<8x32xf32>
    %c216 = arith.constant 216 : index
    %c0_28 = arith.constant 0 : index
    %60 = vector.load %arg8[%c216, %c0_28] : memref<1960x128xf32, #tpu.memory_space<vmem>>, vector<1x32xf32>
    %61 = vector.broadcast %60 : vector<1x32xf32> to vector<8x32xf32>
    %62 = arith.addf %59, %61 : vector<8x32xf32>
    %c224 = arith.constant 224 : index
    %c0_29 = arith.constant 0 : index
    %63 = vector.load %arg8[%c224, %c0_29] : memref<1960x128xf32, #tpu.memory_space<vmem>>, vector<32x32xf32>
    %64 = arith.truncf %30 : vector<8x32xf32> to vector<8x32xbf16>
    %65 = arith.truncf %63 : vector<32x32xf32> to vector<32x32xbf16>
    %cst_30 = arith.constant dense<0.000000e+00> : vector<8x32xf32>
    %66 = tpu.matmul %64, %65, %cst_30 {dimension_numbers = #tpu.dot_dimension_numbers<[1], [0], [0], [1], [0, 0, 1, 1], [], []>} : vector<8x32xbf16>, vector<32x32xbf16>, vector<8x32xf32> -> vector<8x32xf32>
    %c256 = arith.constant 256 : index
    %c0_31 = arith.constant 0 : index
    %67 = vector.load %arg8[%c256, %c0_31] : memref<1960x128xf32, #tpu.memory_space<vmem>>, vector<1x32xf32>
    %68 = vector.broadcast %67 : vector<1x32xf32> to vector<8x32xf32>
    %69 = arith.addf %66, %68 : vector<8x32xf32>
    %c264 = arith.constant 264 : index
    %c0_32 = arith.constant 0 : index
    %70 = vector.load %arg8[%c264, %c0_32] : memref<1960x128xf32, #tpu.memory_space<vmem>>, vector<32x32xf32>
    %71 = arith.truncf %30 : vector<8x32xf32> to vector<8x32xbf16>
    %72 = arith.truncf %70 : vector<32x32xf32> to vector<32x32xbf16>
    %cst_33 = arith.constant dense<0.000000e+00> : vector<8x32xf32>
    %73 = tpu.matmul %71, %72, %cst_33 {dimension_numbers = #tpu.dot_dimension_numbers<[1], [0], [0], [1], [0, 0, 1, 1], [], []>} : vector<8x32xbf16>, vector<32x32xbf16>, vector<8x32xf32> -> vector<8x32xf32>
    %c296 = arith.constant 296 : index
    %c0_34 = arith.constant 0 : index
    %74 = vector.load %arg8[%c296, %c0_34] : memref<1960x128xf32, #tpu.memory_space<vmem>>, vector<1x32xf32>
    %75 = vector.broadcast %74 : vector<1x32xf32> to vector<8x32xf32>
    %76 = arith.addf %73, %75 : vector<8x32xf32>
    %77 = tpu.concatenate %62, %62 in 0 : vector<8x32xf32>, vector<8x32xf32> -> vector<16x32xf32>
    %78 = arith.mulf %77, %15 : vector<16x32xf32>
    %79 = arith.truncf %78 : vector<16x32xf32> to vector<16x32xbf16>
    %80 = arith.truncf %69 : vector<8x32xf32> to vector<8x32xbf16>
    %cst_35 = arith.constant dense<0.000000e+00> : vector<16x8xf32>
    %81 = tpu.matmul %79, %80, %cst_35 {dimension_numbers = #tpu.dot_dimension_numbers<[1], [1], [0], [0], [0, 0, 1, 0], [], []>} : vector<16x32xbf16>, vector<8x32xbf16>, vector<16x8xf32> -> vector<16x8xf32>
    %82 = tpu.concatenate %46, %46 in 0 : vector<8x8xf32>, vector<8x8xf32> -> vector<16x8xf32>
    %83 = arith.addf %81, %82 : vector<16x8xf32>
    %cst_36 = arith.constant dense<0xFF800000> : vector<16xf32>
    %84 = vector.multi_reduction <maximumf>, %83, %cst_36 [1] : vector<16x8xf32> to vector<16xf32>
    %85 = vector.shape_cast %84 : vector<16xf32> to vector<16x1xf32>
    %86 = vector.broadcast %85 : vector<16x1xf32> to vector<16x8xf32>
    %87 = arith.subf %83, %86 : vector<16x8xf32>
    %88 = math.exp %87 : vector<16x8xf32>
    %cst_37 = arith.constant dense<0.000000e+00> : vector<16xf32>
    %89 = vector.multi_reduction <add>, %88, %cst_37 [1] : vector<16x8xf32> to vector<16xf32>
    %90 = vector.shape_cast %89 : vector<16xf32> to vector<16x1xf32>
    %91 = tpu.reciprocal %90 {approx = true} : vector<16x1xf32> -> vector<16x1xf32>
    %92 = vector.broadcast %91 : vector<16x1xf32> to vector<16x8xf32>
    %93 = arith.mulf %88, %92 : vector<16x8xf32>
    %94 = arith.truncf %93 : vector<16x8xf32> to vector<16x8xbf16>
    %95 = arith.truncf %76 : vector<8x32xf32> to vector<8x32xbf16>
    %cst_38 = arith.constant dense<0.000000e+00> : vector<16x32xf32>
    %96 = tpu.matmul %94, %95, %cst_38 {dimension_numbers = #tpu.dot_dimension_numbers<[1], [0], [0], [1], [0, 0, 1, 1], [], []>} : vector<16x8xbf16>, vector<8x32xbf16>, vector<16x32xf32> -> vector<16x32xf32>
    %97 = arith.mulf %96, %15 : vector<16x32xf32>
    %98 = vector.extract_strided_slice %97 {offsets = [0, 0], sizes = [8, 32], strides = [1, 1]} : vector<16x32xf32> to vector<8x32xf32>
    %99 = vector.extract_strided_slice %97 {offsets = [8, 0], sizes = [8, 32], strides = [1, 1]} : vector<16x32xf32> to vector<8x32xf32>
    %100 = arith.addf %98, %99 : vector<8x32xf32>
    %c304 = arith.constant 304 : index
    %c0_39 = arith.constant 0 : index
    %101 = vector.load %arg8[%c304, %c0_39] : memref<1960x128xf32, #tpu.memory_space<vmem>>, vector<32x32xf32>
    %102 = arith.truncf %100 : vector<8x32xf32> to vector<8x32xbf16>
    %103 = arith.truncf %101 : vector<32x32xf32> to vector<32x32xbf16>
    %cst_40 = arith.constant dense<0.000000e+00> : vector<8x32xf32>
    %104 = tpu.matmul %102, %103, %cst_40 {dimension_numbers = #tpu.dot_dimension_numbers<[1], [0], [0], [1], [0, 0, 1, 1], [], []>} : vector<8x32xbf16>, vector<32x32xbf16>, vector<8x32xf32> -> vector<8x32xf32>
    %c336 = arith.constant 336 : index
    %c0_41 = arith.constant 0 : index
    %105 = vector.load %arg8[%c336, %c0_41] : memref<1960x128xf32, #tpu.memory_space<vmem>>, vector<1x32xf32>
    %106 = vector.broadcast %105 : vector<1x32xf32> to vector<8x32xf32>
    %107 = arith.addf %104, %106 : vector<8x32xf32>
    %108 = arith.addf %30, %107 : vector<8x32xf32>
    %c456 = arith.constant 456 : index
    %c0_42 = arith.constant 0 : index
    %109 = vector.load %arg8[%c456, %c0_42] : memref<1960x128xf32, #tpu.memory_space<vmem>>, vector<1x32xf32>
    %c464 = arith.constant 464 : index
    %c0_43 = arith.constant 0 : index
    %110 = vector.load %arg8[%c464, %c0_43] : memref<1960x128xf32, #tpu.memory_space<vmem>>, vector<1x32xf32>
    %cst_44 = arith.constant dense<0.000000e+00> : vector<8xf32>
    %111 = vector.multi_reduction <add>, %108, %cst_44 [1] : vector<8x32xf32> to vector<8xf32>
    %112 = vector.shape_cast %111 : vector<8xf32> to vector<8x1xf32>
    %cst_45 = arith.constant 3.200000e+01 : f32
    %113 = vector.broadcast %cst_45 : f32 to vector<8x1xf32>
    %114 = arith.divf %112, %113 : vector<8x1xf32>
    %115 = vector.broadcast %114 : vector<8x1xf32> to vector<8x32xf32>
    %116 = arith.subf %108, %115 : vector<8x32xf32>
    %117 = arith.mulf %116, %116 : vector<8x32xf32>
    %cst_46 = arith.constant dense<0.000000e+00> : vector<8xf32>
    %118 = vector.multi_reduction <add>, %117, %cst_46 [1] : vector<8x32xf32> to vector<8xf32>
    %119 = vector.shape_cast %118 : vector<8xf32> to vector<8x1xf32>
    %cst_47 = arith.constant 3.200000e+01 : f32
    %120 = vector.broadcast %cst_47 : f32 to vector<8x1xf32>
    %121 = arith.divf %119, %120 : vector<8x1xf32>
    %122 = vector.broadcast %114 : vector<8x1xf32> to vector<8x32xf32>
    %123 = arith.subf %108, %122 : vector<8x32xf32>
    %cst_48 = arith.constant 9.99999974E-6 : f32
    %124 = vector.broadcast %cst_48 : f32 to vector<8x1xf32>
    %125 = arith.addf %121, %124 : vector<8x1xf32>
    %126 = math.rsqrt %125 : vector<8x1xf32>
    %127 = vector.broadcast %126 : vector<8x1xf32> to vector<8x32xf32>
    %128 = arith.mulf %123, %127 : vector<8x32xf32>
    %129 = vector.broadcast %109 : vector<1x32xf32> to vector<8x32xf32>
    %130 = arith.mulf %128, %129 : vector<8x32xf32>
    %131 = vector.broadcast %110 : vector<1x32xf32> to vector<8x32xf32>
    %132 = arith.addf %130, %131 : vector<8x32xf32>
    %c344 = arith.constant 344 : index
    %c0_49 = arith.constant 0 : index
    %133 = vector.load %arg8[%c344, %c0_49] : memref<1960x128xf32, #tpu.memory_space<vmem>>, vector<32x64xf32>
    %134 = arith.truncf %132 : vector<8x32xf32> to vector<8x32xbf16>
    %135 = arith.truncf %133 : vector<32x64xf32> to vector<32x64xbf16>
    %cst_50 = arith.constant dense<0.000000e+00> : vector<8x64xf32>
    %136 = tpu.matmul %134, %135, %cst_50 {dimension_numbers = #tpu.dot_dimension_numbers<[1], [0], [0], [1], [0, 0, 1, 1], [], []>} : vector<8x32xbf16>, vector<32x64xbf16>, vector<8x64xf32> -> vector<8x64xf32>
    %c376 = arith.constant 376 : index
    %c0_51 = arith.constant 0 : index
    %137 = vector.load %arg8[%c376, %c0_51] : memref<1960x128xf32, #tpu.memory_space<vmem>>, vector<1x64xf32>
    %138 = vector.broadcast %137 : vector<1x64xf32> to vector<8x64xf32>
    %139 = arith.addf %136, %138 : vector<8x64xf32>
    %cst_52 = arith.constant 0.000000e+00 : f32
    %140 = vector.broadcast %cst_52 : f32 to vector<8x64xf32>
    %141 = arith.maximumf %139, %140 : vector<8x64xf32>
    %c384 = arith.constant 384 : index
    %c0_53 = arith.constant 0 : index
    %142 = vector.load %arg8[%c384, %c0_53] : memref<1960x128xf32, #tpu.memory_space<vmem>>, vector<64x32xf32>
    %143 = arith.truncf %141 : vector<8x64xf32> to vector<8x64xbf16>
    %144 = arith.truncf %142 : vector<64x32xf32> to vector<64x32xbf16>
    %cst_54 = arith.constant dense<0.000000e+00> : vector<8x32xf32>
    %145 = tpu.matmul %143, %144, %cst_54 {dimension_numbers = #tpu.dot_dimension_numbers<[1], [0], [0], [1], [0, 0, 1, 1], [], []>} : vector<8x64xbf16>, vector<64x32xbf16>, vector<8x32xf32> -> vector<8x32xf32>
    %c448 = arith.constant 448 : index
    %c0_55 = arith.constant 0 : index
    %146 = vector.load %arg8[%c448, %c0_55] : memref<1960x128xf32, #tpu.memory_space<vmem>>, vector<1x32xf32>
    %147 = vector.broadcast %146 : vector<1x32xf32> to vector<8x32xf32>
    %148 = arith.addf %145, %147 : vector<8x32xf32>
    %149 = arith.addf %132, %148 : vector<8x32xf32>
    %c472 = arith.constant 472 : index
    %c0_56 = arith.constant 0 : index
    %150 = vector.load %arg8[%c472, %c0_56] : memref<1960x128xf32, #tpu.memory_space<vmem>>, vector<1x32xf32>
    %c480 = arith.constant 480 : index
    %c0_57 = arith.constant 0 : index
    %151 = vector.load %arg8[%c480, %c0_57] : memref<1960x128xf32, #tpu.memory_space<vmem>>, vector<1x32xf32>
    %cst_58 = arith.constant dense<0.000000e+00> : vector<8xf32>
    %152 = vector.multi_reduction <add>, %149, %cst_58 [1] : vector<8x32xf32> to vector<8xf32>
    %153 = vector.shape_cast %152 : vector<8xf32> to vector<8x1xf32>
    %cst_59 = arith.constant 3.200000e+01 : f32
    %154 = vector.broadcast %cst_59 : f32 to vector<8x1xf32>
    %155 = arith.divf %153, %154 : vector<8x1xf32>
    %156 = vector.broadcast %155 : vector<8x1xf32> to vector<8x32xf32>
    %157 = arith.subf %149, %156 : vector<8x32xf32>
    %158 = arith.mulf %157, %157 : vector<8x32xf32>
    %cst_60 = arith.constant dense<0.000000e+00> : vector<8xf32>
    %159 = vector.multi_reduction <add>, %158, %cst_60 [1] : vector<8x32xf32> to vector<8xf32>
    %160 = vector.shape_cast %159 : vector<8xf32> to vector<8x1xf32>
    %cst_61 = arith.constant 3.200000e+01 : f32
    %161 = vector.broadcast %cst_61 : f32 to vector<8x1xf32>
    %162 = arith.divf %160, %161 : vector<8x1xf32>
    %163 = vector.broadcast %155 : vector<8x1xf32> to vector<8x32xf32>
    %164 = arith.subf %149, %163 : vector<8x32xf32>
    %cst_62 = arith.constant 9.99999974E-6 : f32
    %165 = vector.broadcast %cst_62 : f32 to vector<8x1xf32>
    %166 = arith.addf %162, %165 : vector<8x1xf32>
    %167 = math.rsqrt %166 : vector<8x1xf32>
    %168 = vector.broadcast %167 : vector<8x1xf32> to vector<8x32xf32>
    %169 = arith.mulf %164, %168 : vector<8x32xf32>
    %170 = vector.broadcast %150 : vector<1x32xf32> to vector<8x32xf32>
    %171 = arith.mulf %169, %170 : vector<8x32xf32>
    %172 = vector.broadcast %151 : vector<1x32xf32> to vector<8x32xf32>
    %173 = arith.addf %171, %172 : vector<8x32xf32>
    %c488 = arith.constant 488 : index
    %c0_63 = arith.constant 0 : index
    %174 = vector.load %arg8[%c488, %c0_63] : memref<1960x128xf32, #tpu.memory_space<vmem>>, vector<32x32xf32>
    %175 = arith.truncf %173 : vector<8x32xf32> to vector<8x32xbf16>
    %176 = arith.truncf %174 : vector<32x32xf32> to vector<32x32xbf16>
    %cst_64 = arith.constant dense<0.000000e+00> : vector<8x32xf32>
    %177 = tpu.matmul %175, %176, %cst_64 {dimension_numbers = #tpu.dot_dimension_numbers<[1], [0], [0], [1], [0, 0, 1, 1], [], []>} : vector<8x32xbf16>, vector<32x32xbf16>, vector<8x32xf32> -> vector<8x32xf32>
    %c520 = arith.constant 520 : index
    %c0_65 = arith.constant 0 : index
    %178 = vector.load %arg8[%c520, %c0_65] : memref<1960x128xf32, #tpu.memory_space<vmem>>, vector<1x32xf32>
    %179 = vector.broadcast %178 : vector<1x32xf32> to vector<8x32xf32>
    %180 = arith.addf %177, %179 : vector<8x32xf32>
    %c528 = arith.constant 528 : index
    %c0_66 = arith.constant 0 : index
    %181 = vector.load %arg8[%c528, %c0_66] : memref<1960x128xf32, #tpu.memory_space<vmem>>, vector<32x32xf32>
    %182 = arith.truncf %173 : vector<8x32xf32> to vector<8x32xbf16>
    %183 = arith.truncf %181 : vector<32x32xf32> to vector<32x32xbf16>
    %cst_67 = arith.constant dense<0.000000e+00> : vector<8x32xf32>
    %184 = tpu.matmul %182, %183, %cst_67 {dimension_numbers = #tpu.dot_dimension_numbers<[1], [0], [0], [1], [0, 0, 1, 1], [], []>} : vector<8x32xbf16>, vector<32x32xbf16>, vector<8x32xf32> -> vector<8x32xf32>
    %c560 = arith.constant 560 : index
    %c0_68 = arith.constant 0 : index
    %185 = vector.load %arg8[%c560, %c0_68] : memref<1960x128xf32, #tpu.memory_space<vmem>>, vector<1x32xf32>
    %186 = vector.broadcast %185 : vector<1x32xf32> to vector<8x32xf32>
    %187 = arith.addf %184, %186 : vector<8x32xf32>
    %c568 = arith.constant 568 : index
    %c0_69 = arith.constant 0 : index
    %188 = vector.load %arg8[%c568, %c0_69] : memref<1960x128xf32, #tpu.memory_space<vmem>>, vector<32x32xf32>
    %189 = arith.truncf %173 : vector<8x32xf32> to vector<8x32xbf16>
    %190 = arith.truncf %188 : vector<32x32xf32> to vector<32x32xbf16>
    %cst_70 = arith.constant dense<0.000000e+00> : vector<8x32xf32>
    %191 = tpu.matmul %189, %190, %cst_70 {dimension_numbers = #tpu.dot_dimension_numbers<[1], [0], [0], [1], [0, 0, 1, 1], [], []>} : vector<8x32xbf16>, vector<32x32xbf16>, vector<8x32xf32> -> vector<8x32xf32>
    %c600 = arith.constant 600 : index
    %c0_71 = arith.constant 0 : index
    %192 = vector.load %arg8[%c600, %c0_71] : memref<1960x128xf32, #tpu.memory_space<vmem>>, vector<1x32xf32>
    %193 = vector.broadcast %192 : vector<1x32xf32> to vector<8x32xf32>
    %194 = arith.addf %191, %193 : vector<8x32xf32>
    %195 = tpu.concatenate %180, %180 in 0 : vector<8x32xf32>, vector<8x32xf32> -> vector<16x32xf32>
    %196 = arith.mulf %195, %15 : vector<16x32xf32>
    %197 = arith.truncf %196 : vector<16x32xf32> to vector<16x32xbf16>
    %198 = arith.truncf %187 : vector<8x32xf32> to vector<8x32xbf16>
    %cst_72 = arith.constant dense<0.000000e+00> : vector<16x8xf32>
    %199 = tpu.matmul %197, %198, %cst_72 {dimension_numbers = #tpu.dot_dimension_numbers<[1], [1], [0], [0], [0, 0, 1, 0], [], []>} : vector<16x32xbf16>, vector<8x32xbf16>, vector<16x8xf32> -> vector<16x8xf32>
    %200 = tpu.concatenate %46, %46 in 0 : vector<8x8xf32>, vector<8x8xf32> -> vector<16x8xf32>
    %201 = arith.addf %199, %200 : vector<16x8xf32>
    %cst_73 = arith.constant dense<0xFF800000> : vector<16xf32>
    %202 = vector.multi_reduction <maximumf>, %201, %cst_73 [1] : vector<16x8xf32> to vector<16xf32>
    %203 = vector.shape_cast %202 : vector<16xf32> to vector<16x1xf32>
    %204 = vector.broadcast %203 : vector<16x1xf32> to vector<16x8xf32>
    %205 = arith.subf %201, %204 : vector<16x8xf32>
    %206 = math.exp %205 : vector<16x8xf32>
    %cst_74 = arith.constant dense<0.000000e+00> : vector<16xf32>
    %207 = vector.multi_reduction <add>, %206, %cst_74 [1] : vector<16x8xf32> to vector<16xf32>
    %208 = vector.shape_cast %207 : vector<16xf32> to vector<16x1xf32>
    %209 = tpu.reciprocal %208 {approx = true} : vector<16x1xf32> -> vector<16x1xf32>
    %210 = vector.broadcast %209 : vector<16x1xf32> to vector<16x8xf32>
    %211 = arith.mulf %206, %210 : vector<16x8xf32>
    %212 = arith.truncf %211 : vector<16x8xf32> to vector<16x8xbf16>
    %213 = arith.truncf %194 : vector<8x32xf32> to vector<8x32xbf16>
    %cst_75 = arith.constant dense<0.000000e+00> : vector<16x32xf32>
    %214 = tpu.matmul %212, %213, %cst_75 {dimension_numbers = #tpu.dot_dimension_numbers<[1], [0], [0], [1], [0, 0, 1, 1], [], []>} : vector<16x8xbf16>, vector<8x32xbf16>, vector<16x32xf32> -> vector<16x32xf32>
    %215 = arith.mulf %214, %15 : vector<16x32xf32>
    %216 = vector.extract_strided_slice %215 {offsets = [0, 0], sizes = [8, 32], strides = [1, 1]} : vector<16x32xf32> to vector<8x32xf32>
    %217 = vector.extract_strided_slice %215 {offsets = [8, 0], sizes = [8, 32], strides = [1, 1]} : vector<16x32xf32> to vector<8x32xf32>
    %218 = arith.addf %216, %217 : vector<8x32xf32>
    %c608 = arith.constant 608 : index
    %c0_76 = arith.constant 0 : index
    %219 = vector.load %arg8[%c608, %c0_76] : memref<1960x128xf32, #tpu.memory_space<vmem>>, vector<32x32xf32>
    %220 = arith.truncf %218 : vector<8x32xf32> to vector<8x32xbf16>
    %221 = arith.truncf %219 : vector<32x32xf32> to vector<32x32xbf16>
    %cst_77 = arith.constant dense<0.000000e+00> : vector<8x32xf32>
    %222 = tpu.matmul %220, %221, %cst_77 {dimension_numbers = #tpu.dot_dimension_numbers<[1], [0], [0], [1], [0, 0, 1, 1], [], []>} : vector<8x32xbf16>, vector<32x32xbf16>, vector<8x32xf32> -> vector<8x32xf32>
    %c640 = arith.constant 640 : index
    %c0_78 = arith.constant 0 : index
    %223 = vector.load %arg8[%c640, %c0_78] : memref<1960x128xf32, #tpu.memory_space<vmem>>, vector<1x32xf32>
    %224 = vector.broadcast %223 : vector<1x32xf32> to vector<8x32xf32>
    %225 = arith.addf %222, %224 : vector<8x32xf32>
    %226 = arith.addf %173, %225 : vector<8x32xf32>
    %c760 = arith.constant 760 : index
    %c0_79 = arith.constant 0 : index
    %227 = vector.load %arg8[%c760, %c0_79] : memref<1960x128xf32, #tpu.memory_space<vmem>>, vector<1x32xf32>
    %c768 = arith.constant 768 : index
    %c0_80 = arith.constant 0 : index
    %228 = vector.load %arg8[%c768, %c0_80] : memref<1960x128xf32, #tpu.memory_space<vmem>>, vector<1x32xf32>
    %cst_81 = arith.constant dense<0.000000e+00> : vector<8xf32>
    %229 = vector.multi_reduction <add>, %226, %cst_81 [1] : vector<8x32xf32> to vector<8xf32>
    %230 = vector.shape_cast %229 : vector<8xf32> to vector<8x1xf32>
    %cst_82 = arith.constant 3.200000e+01 : f32
    %231 = vector.broadcast %cst_82 : f32 to vector<8x1xf32>
    %232 = arith.divf %230, %231 : vector<8x1xf32>
    %233 = vector.broadcast %232 : vector<8x1xf32> to vector<8x32xf32>
    %234 = arith.subf %226, %233 : vector<8x32xf32>
    %235 = arith.mulf %234, %234 : vector<8x32xf32>
    %cst_83 = arith.constant dense<0.000000e+00> : vector<8xf32>
    %236 = vector.multi_reduction <add>, %235, %cst_83 [1] : vector<8x32xf32> to vector<8xf32>
    %237 = vector.shape_cast %236 : vector<8xf32> to vector<8x1xf32>
    %cst_84 = arith.constant 3.200000e+01 : f32
    %238 = vector.broadcast %cst_84 : f32 to vector<8x1xf32>
    %239 = arith.divf %237, %238 : vector<8x1xf32>
    %240 = vector.broadcast %232 : vector<8x1xf32> to vector<8x32xf32>
    %241 = arith.subf %226, %240 : vector<8x32xf32>
    %cst_85 = arith.constant 9.99999974E-6 : f32
    %242 = vector.broadcast %cst_85 : f32 to vector<8x1xf32>
    %243 = arith.addf %239, %242 : vector<8x1xf32>
    %244 = math.rsqrt %243 : vector<8x1xf32>
    %245 = vector.broadcast %244 : vector<8x1xf32> to vector<8x32xf32>
    %246 = arith.mulf %241, %245 : vector<8x32xf32>
    %247 = vector.broadcast %227 : vector<1x32xf32> to vector<8x32xf32>
    %248 = arith.mulf %246, %247 : vector<8x32xf32>
    %249 = vector.broadcast %228 : vector<1x32xf32> to vector<8x32xf32>
    %250 = arith.addf %248, %249 : vector<8x32xf32>
    %c648 = arith.constant 648 : index
    %c0_86 = arith.constant 0 : index
    %251 = vector.load %arg8[%c648, %c0_86] : memref<1960x128xf32, #tpu.memory_space<vmem>>, vector<32x64xf32>
    %252 = arith.truncf %250 : vector<8x32xf32> to vector<8x32xbf16>
    %253 = arith.truncf %251 : vector<32x64xf32> to vector<32x64xbf16>
    %cst_87 = arith.constant dense<0.000000e+00> : vector<8x64xf32>
    %254 = tpu.matmul %252, %253, %cst_87 {dimension_numbers = #tpu.dot_dimension_numbers<[1], [0], [0], [1], [0, 0, 1, 1], [], []>} : vector<8x32xbf16>, vector<32x64xbf16>, vector<8x64xf32> -> vector<8x64xf32>
    %c680 = arith.constant 680 : index
    %c0_88 = arith.constant 0 : index
    %255 = vector.load %arg8[%c680, %c0_88] : memref<1960x128xf32, #tpu.memory_space<vmem>>, vector<1x64xf32>
    %256 = vector.broadcast %255 : vector<1x64xf32> to vector<8x64xf32>
    %257 = arith.addf %254, %256 : vector<8x64xf32>
    %cst_89 = arith.constant 0.000000e+00 : f32
    %258 = vector.broadcast %cst_89 : f32 to vector<8x64xf32>
    %259 = arith.maximumf %257, %258 : vector<8x64xf32>
    %c688 = arith.constant 688 : index
    %c0_90 = arith.constant 0 : index
    %260 = vector.load %arg8[%c688, %c0_90] : memref<1960x128xf32, #tpu.memory_space<vmem>>, vector<64x32xf32>
    %261 = arith.truncf %259 : vector<8x64xf32> to vector<8x64xbf16>
    %262 = arith.truncf %260 : vector<64x32xf32> to vector<64x32xbf16>
    %cst_91 = arith.constant dense<0.000000e+00> : vector<8x32xf32>
    %263 = tpu.matmul %261, %262, %cst_91 {dimension_numbers = #tpu.dot_dimension_numbers<[1], [0], [0], [1], [0, 0, 1, 1], [], []>} : vector<8x64xbf16>, vector<64x32xbf16>, vector<8x32xf32> -> vector<8x32xf32>
    %c752 = arith.constant 752 : index
    %c0_92 = arith.constant 0 : index
    %264 = vector.load %arg8[%c752, %c0_92] : memref<1960x128xf32, #tpu.memory_space<vmem>>, vector<1x32xf32>
    %265 = vector.broadcast %264 : vector<1x32xf32> to vector<8x32xf32>
    %266 = arith.addf %263, %265 : vector<8x32xf32>
    %267 = arith.addf %250, %266 : vector<8x32xf32>
    %c776 = arith.constant 776 : index
    %c0_93 = arith.constant 0 : index
    %268 = vector.load %arg8[%c776, %c0_93] : memref<1960x128xf32, #tpu.memory_space<vmem>>, vector<1x32xf32>
    %c784 = arith.constant 784 : index
    %c0_94 = arith.constant 0 : index
    %269 = vector.load %arg8[%c784, %c0_94] : memref<1960x128xf32, #tpu.memory_space<vmem>>, vector<1x32xf32>
    %cst_95 = arith.constant dense<0.000000e+00> : vector<8xf32>
    %270 = vector.multi_reduction <add>, %267, %cst_95 [1] : vector<8x32xf32> to vector<8xf32>
    %271 = vector.shape_cast %270 : vector<8xf32> to vector<8x1xf32>
    %cst_96 = arith.constant 3.200000e+01 : f32
    %272 = vector.broadcast %cst_96 : f32 to vector<8x1xf32>
    %273 = arith.divf %271, %272 : vector<8x1xf32>
    %274 = vector.broadcast %273 : vector<8x1xf32> to vector<8x32xf32>
    %275 = arith.subf %267, %274 : vector<8x32xf32>
    %276 = arith.mulf %275, %275 : vector<8x32xf32>
    %cst_97 = arith.constant dense<0.000000e+00> : vector<8xf32>
    %277 = vector.multi_reduction <add>, %276, %cst_97 [1] : vector<8x32xf32> to vector<8xf32>
    %278 = vector.shape_cast %277 : vector<8xf32> to vector<8x1xf32>
    %cst_98 = arith.constant 3.200000e+01 : f32
    %279 = vector.broadcast %cst_98 : f32 to vector<8x1xf32>
    %280 = arith.divf %278, %279 : vector<8x1xf32>
    %281 = vector.broadcast %273 : vector<8x1xf32> to vector<8x32xf32>
    %282 = arith.subf %267, %281 : vector<8x32xf32>
    %cst_99 = arith.constant 9.99999974E-6 : f32
    %283 = vector.broadcast %cst_99 : f32 to vector<8x1xf32>
    %284 = arith.addf %280, %283 : vector<8x1xf32>
    %285 = math.rsqrt %284 : vector<8x1xf32>
    %286 = vector.broadcast %285 : vector<8x1xf32> to vector<8x32xf32>
    %287 = arith.mulf %282, %286 : vector<8x32xf32>
    %288 = vector.broadcast %268 : vector<1x32xf32> to vector<8x32xf32>
    %289 = arith.mulf %287, %288 : vector<8x32xf32>
    %290 = vector.broadcast %269 : vector<1x32xf32> to vector<8x32xf32>
    %291 = arith.addf %289, %290 : vector<8x32xf32>
    %c1752 = arith.constant 1752 : index
    %c0_100 = arith.constant 0 : index
    %292 = vector.load %arg8[%c1752, %c0_100] : memref<1960x128xf32, #tpu.memory_space<vmem>>, vector<1x32xf32>
    %c1760 = arith.constant 1760 : index
    %c0_101 = arith.constant 0 : index
    %293 = vector.load %arg8[%c1760, %c0_101] : memref<1960x128xf32, #tpu.memory_space<vmem>>, vector<1x32xf32>
    %cst_102 = arith.constant dense<0.000000e+00> : vector<8xf32>
    %294 = vector.multi_reduction <add>, %291, %cst_102 [1] : vector<8x32xf32> to vector<8xf32>
    %295 = vector.shape_cast %294 : vector<8xf32> to vector<8x1xf32>
    %cst_103 = arith.constant 3.200000e+01 : f32
    %296 = vector.broadcast %cst_103 : f32 to vector<8x1xf32>
    %297 = arith.divf %295, %296 : vector<8x1xf32>
    %298 = vector.broadcast %297 : vector<8x1xf32> to vector<8x32xf32>
    %299 = arith.subf %291, %298 : vector<8x32xf32>
    %300 = arith.mulf %299, %299 : vector<8x32xf32>
    %cst_104 = arith.constant dense<0.000000e+00> : vector<8xf32>
    %301 = vector.multi_reduction <add>, %300, %cst_104 [1] : vector<8x32xf32> to vector<8xf32>
    %302 = vector.shape_cast %301 : vector<8xf32> to vector<8x1xf32>
    %cst_105 = arith.constant 3.200000e+01 : f32
    %303 = vector.broadcast %cst_105 : f32 to vector<8x1xf32>
    %304 = arith.divf %302, %303 : vector<8x1xf32>
    %305 = vector.broadcast %297 : vector<8x1xf32> to vector<8x32xf32>
    %306 = arith.subf %291, %305 : vector<8x32xf32>
    %cst_106 = arith.constant 9.99999974E-6 : f32
    %307 = vector.broadcast %cst_106 : f32 to vector<8x1xf32>
    %308 = arith.addf %304, %307 : vector<8x1xf32>
    %309 = math.rsqrt %308 : vector<8x1xf32>
    %310 = vector.broadcast %309 : vector<8x1xf32> to vector<8x32xf32>
    %311 = arith.mulf %306, %310 : vector<8x32xf32>
    %312 = vector.broadcast %292 : vector<1x32xf32> to vector<8x32xf32>
    %313 = arith.mulf %311, %312 : vector<8x32xf32>
    %314 = vector.broadcast %293 : vector<1x32xf32> to vector<8x32xf32>
    %315 = arith.addf %313, %314 : vector<8x32xf32>
    %c792 = arith.constant 792 : index
    %c0_107 = arith.constant 0 : index
    %316 = vector.load %arg8[%c792, %c0_107] : memref<1960x128xf32, #tpu.memory_space<vmem>>, vector<32x32xf32>
    %317 = arith.truncf %41 : vector<8x32xf32> to vector<8x32xbf16>
    %318 = arith.truncf %316 : vector<32x32xf32> to vector<32x32xbf16>
    %cst_108 = arith.constant dense<0.000000e+00> : vector<8x32xf32>
    %319 = tpu.matmul %317, %318, %cst_108 {dimension_numbers = #tpu.dot_dimension_numbers<[1], [0], [0], [1], [0, 0, 1, 1], [], []>} : vector<8x32xbf16>, vector<32x32xbf16>, vector<8x32xf32> -> vector<8x32xf32>
    %c824 = arith.constant 824 : index
    %c0_109 = arith.constant 0 : index
    %320 = vector.load %arg8[%c824, %c0_109] : memref<1960x128xf32, #tpu.memory_space<vmem>>, vector<1x32xf32>
    %321 = vector.broadcast %320 : vector<1x32xf32> to vector<8x32xf32>
    %322 = arith.addf %319, %321 : vector<8x32xf32>
    %c832 = arith.constant 832 : index
    %c0_110 = arith.constant 0 : index
    %323 = vector.load %arg8[%c832, %c0_110] : memref<1960x128xf32, #tpu.memory_space<vmem>>, vector<32x32xf32>
    %324 = arith.truncf %41 : vector<8x32xf32> to vector<8x32xbf16>
    %325 = arith.truncf %323 : vector<32x32xf32> to vector<32x32xbf16>
    %cst_111 = arith.constant dense<0.000000e+00> : vector<8x32xf32>
    %326 = tpu.matmul %324, %325, %cst_111 {dimension_numbers = #tpu.dot_dimension_numbers<[1], [0], [0], [1], [0, 0, 1, 1], [], []>} : vector<8x32xbf16>, vector<32x32xbf16>, vector<8x32xf32> -> vector<8x32xf32>
    %c864 = arith.constant 864 : index
    %c0_112 = arith.constant 0 : index
    %327 = vector.load %arg8[%c864, %c0_112] : memref<1960x128xf32, #tpu.memory_space<vmem>>, vector<1x32xf32>
    %328 = vector.broadcast %327 : vector<1x32xf32> to vector<8x32xf32>
    %329 = arith.addf %326, %328 : vector<8x32xf32>
    %c872 = arith.constant 872 : index
    %c0_113 = arith.constant 0 : index
    %330 = vector.load %arg8[%c872, %c0_113] : memref<1960x128xf32, #tpu.memory_space<vmem>>, vector<32x32xf32>
    %331 = arith.truncf %41 : vector<8x32xf32> to vector<8x32xbf16>
    %332 = arith.truncf %330 : vector<32x32xf32> to vector<32x32xbf16>
    %cst_114 = arith.constant dense<0.000000e+00> : vector<8x32xf32>
    %333 = tpu.matmul %331, %332, %cst_114 {dimension_numbers = #tpu.dot_dimension_numbers<[1], [0], [0], [1], [0, 0, 1, 1], [], []>} : vector<8x32xbf16>, vector<32x32xbf16>, vector<8x32xf32> -> vector<8x32xf32>
    %c904 = arith.constant 904 : index
    %c0_115 = arith.constant 0 : index
    %334 = vector.load %arg8[%c904, %c0_115] : memref<1960x128xf32, #tpu.memory_space<vmem>>, vector<1x32xf32>
    %335 = vector.broadcast %334 : vector<1x32xf32> to vector<8x32xf32>
    %336 = arith.addf %333, %335 : vector<8x32xf32>
    %337 = tpu.concatenate %322, %322 in 0 : vector<8x32xf32>, vector<8x32xf32> -> vector<16x32xf32>
    %338 = arith.mulf %337, %15 : vector<16x32xf32>
    %339 = arith.truncf %338 : vector<16x32xf32> to vector<16x32xbf16>
    %340 = arith.truncf %329 : vector<8x32xf32> to vector<8x32xbf16>
    %cst_116 = arith.constant dense<0.000000e+00> : vector<16x8xf32>
    %341 = tpu.matmul %339, %340, %cst_116 {dimension_numbers = #tpu.dot_dimension_numbers<[1], [1], [0], [0], [0, 0, 1, 0], [], []>} : vector<16x32xbf16>, vector<8x32xbf16>, vector<16x8xf32> -> vector<16x8xf32>
    %342 = tpu.concatenate %51, %51 in 0 : vector<8x8xf32>, vector<8x8xf32> -> vector<16x8xf32>
    %343 = arith.addf %341, %342 : vector<16x8xf32>
    %cst_117 = arith.constant dense<0xFF800000> : vector<16xf32>
    %344 = vector.multi_reduction <maximumf>, %343, %cst_117 [1] : vector<16x8xf32> to vector<16xf32>
    %345 = vector.shape_cast %344 : vector<16xf32> to vector<16x1xf32>
    %346 = vector.broadcast %345 : vector<16x1xf32> to vector<16x8xf32>
    %347 = arith.subf %343, %346 : vector<16x8xf32>
    %348 = math.exp %347 : vector<16x8xf32>
    %cst_118 = arith.constant dense<0.000000e+00> : vector<16xf32>
    %349 = vector.multi_reduction <add>, %348, %cst_118 [1] : vector<16x8xf32> to vector<16xf32>
    %350 = vector.shape_cast %349 : vector<16xf32> to vector<16x1xf32>
    %351 = tpu.reciprocal %350 {approx = true} : vector<16x1xf32> -> vector<16x1xf32>
    %352 = vector.broadcast %351 : vector<16x1xf32> to vector<16x8xf32>
    %353 = arith.mulf %348, %352 : vector<16x8xf32>
    %354 = arith.truncf %353 : vector<16x8xf32> to vector<16x8xbf16>
    %355 = arith.truncf %336 : vector<8x32xf32> to vector<8x32xbf16>
    %cst_119 = arith.constant dense<0.000000e+00> : vector<16x32xf32>
    %356 = tpu.matmul %354, %355, %cst_119 {dimension_numbers = #tpu.dot_dimension_numbers<[1], [0], [0], [1], [0, 0, 1, 1], [], []>} : vector<16x8xbf16>, vector<8x32xbf16>, vector<16x32xf32> -> vector<16x32xf32>
    %357 = arith.mulf %356, %15 : vector<16x32xf32>
    %358 = vector.extract_strided_slice %357 {offsets = [0, 0], sizes = [8, 32], strides = [1, 1]} : vector<16x32xf32> to vector<8x32xf32>
    %359 = vector.extract_strided_slice %357 {offsets = [8, 0], sizes = [8, 32], strides = [1, 1]} : vector<16x32xf32> to vector<8x32xf32>
    %360 = arith.addf %358, %359 : vector<8x32xf32>
    %c912 = arith.constant 912 : index
    %c0_120 = arith.constant 0 : index
    %361 = vector.load %arg8[%c912, %c0_120] : memref<1960x128xf32, #tpu.memory_space<vmem>>, vector<32x32xf32>
    %362 = arith.truncf %360 : vector<8x32xf32> to vector<8x32xbf16>
    %363 = arith.truncf %361 : vector<32x32xf32> to vector<32x32xbf16>
    %cst_121 = arith.constant dense<0.000000e+00> : vector<8x32xf32>
    %364 = tpu.matmul %362, %363, %cst_121 {dimension_numbers = #tpu.dot_dimension_numbers<[1], [0], [0], [1], [0, 0, 1, 1], [], []>} : vector<8x32xbf16>, vector<32x32xbf16>, vector<8x32xf32> -> vector<8x32xf32>
    %c944 = arith.constant 944 : index
    %c0_122 = arith.constant 0 : index
    %365 = vector.load %arg8[%c944, %c0_122] : memref<1960x128xf32, #tpu.memory_space<vmem>>, vector<1x32xf32>
    %366 = vector.broadcast %365 : vector<1x32xf32> to vector<8x32xf32>
    %367 = arith.addf %364, %366 : vector<8x32xf32>
    %368 = arith.addf %41, %367 : vector<8x32xf32>
    %c1224 = arith.constant 1224 : index
    %c0_123 = arith.constant 0 : index
    %369 = vector.load %arg8[%c1224, %c0_123] : memref<1960x128xf32, #tpu.memory_space<vmem>>, vector<1x32xf32>
    %c1232 = arith.constant 1232 : index
    %c0_124 = arith.constant 0 : index
    %370 = vector.load %arg8[%c1232, %c0_124] : memref<1960x128xf32, #tpu.memory_space<vmem>>, vector<1x32xf32>
    %cst_125 = arith.constant dense<0.000000e+00> : vector<8xf32>
    %371 = vector.multi_reduction <add>, %368, %cst_125 [1] : vector<8x32xf32> to vector<8xf32>
    %372 = vector.shape_cast %371 : vector<8xf32> to vector<8x1xf32>
    %cst_126 = arith.constant 3.200000e+01 : f32
    %373 = vector.broadcast %cst_126 : f32 to vector<8x1xf32>
    %374 = arith.divf %372, %373 : vector<8x1xf32>
    %375 = vector.broadcast %374 : vector<8x1xf32> to vector<8x32xf32>
    %376 = arith.subf %368, %375 : vector<8x32xf32>
    %377 = arith.mulf %376, %376 : vector<8x32xf32>
    %cst_127 = arith.constant dense<0.000000e+00> : vector<8xf32>
    %378 = vector.multi_reduction <add>, %377, %cst_127 [1] : vector<8x32xf32> to vector<8xf32>
    %379 = vector.shape_cast %378 : vector<8xf32> to vector<8x1xf32>
    %cst_128 = arith.constant 3.200000e+01 : f32
    %380 = vector.broadcast %cst_128 : f32 to vector<8x1xf32>
    %381 = arith.divf %379, %380 : vector<8x1xf32>
    %382 = vector.broadcast %374 : vector<8x1xf32> to vector<8x32xf32>
    %383 = arith.subf %368, %382 : vector<8x32xf32>
    %cst_129 = arith.constant 9.99999974E-6 : f32
    %384 = vector.broadcast %cst_129 : f32 to vector<8x1xf32>
    %385 = arith.addf %381, %384 : vector<8x1xf32>
    %386 = math.rsqrt %385 : vector<8x1xf32>
    %387 = vector.broadcast %386 : vector<8x1xf32> to vector<8x32xf32>
    %388 = arith.mulf %383, %387 : vector<8x32xf32>
    %389 = vector.broadcast %369 : vector<1x32xf32> to vector<8x32xf32>
    %390 = arith.mulf %388, %389 : vector<8x32xf32>
    %391 = vector.broadcast %370 : vector<1x32xf32> to vector<8x32xf32>
    %392 = arith.addf %390, %391 : vector<8x32xf32>
    %c952 = arith.constant 952 : index
    %c0_130 = arith.constant 0 : index
    %393 = vector.load %arg8[%c952, %c0_130] : memref<1960x128xf32, #tpu.memory_space<vmem>>, vector<32x32xf32>
    %394 = arith.truncf %392 : vector<8x32xf32> to vector<8x32xbf16>
    %395 = arith.truncf %393 : vector<32x32xf32> to vector<32x32xbf16>
    %cst_131 = arith.constant dense<0.000000e+00> : vector<8x32xf32>
    %396 = tpu.matmul %394, %395, %cst_131 {dimension_numbers = #tpu.dot_dimension_numbers<[1], [0], [0], [1], [0, 0, 1, 1], [], []>} : vector<8x32xbf16>, vector<32x32xbf16>, vector<8x32xf32> -> vector<8x32xf32>
    %c984 = arith.constant 984 : index
    %c0_132 = arith.constant 0 : index
    %397 = vector.load %arg8[%c984, %c0_132] : memref<1960x128xf32, #tpu.memory_space<vmem>>, vector<1x32xf32>
    %398 = vector.broadcast %397 : vector<1x32xf32> to vector<8x32xf32>
    %399 = arith.addf %396, %398 : vector<8x32xf32>
    %c992 = arith.constant 992 : index
    %c0_133 = arith.constant 0 : index
    %400 = vector.load %arg8[%c992, %c0_133] : memref<1960x128xf32, #tpu.memory_space<vmem>>, vector<32x32xf32>
    %401 = arith.truncf %315 : vector<8x32xf32> to vector<8x32xbf16>
    %402 = arith.truncf %400 : vector<32x32xf32> to vector<32x32xbf16>
    %cst_134 = arith.constant dense<0.000000e+00> : vector<8x32xf32>
    %403 = tpu.matmul %401, %402, %cst_134 {dimension_numbers = #tpu.dot_dimension_numbers<[1], [0], [0], [1], [0, 0, 1, 1], [], []>} : vector<8x32xbf16>, vector<32x32xbf16>, vector<8x32xf32> -> vector<8x32xf32>
    %c1024 = arith.constant 1024 : index
    %c0_135 = arith.constant 0 : index
    %404 = vector.load %arg8[%c1024, %c0_135] : memref<1960x128xf32, #tpu.memory_space<vmem>>, vector<1x32xf32>
    %405 = vector.broadcast %404 : vector<1x32xf32> to vector<8x32xf32>
    %406 = arith.addf %403, %405 : vector<8x32xf32>
    %c1032 = arith.constant 1032 : index
    %c0_136 = arith.constant 0 : index
    %407 = vector.load %arg8[%c1032, %c0_136] : memref<1960x128xf32, #tpu.memory_space<vmem>>, vector<32x32xf32>
    %408 = arith.truncf %315 : vector<8x32xf32> to vector<8x32xbf16>
    %409 = arith.truncf %407 : vector<32x32xf32> to vector<32x32xbf16>
    %cst_137 = arith.constant dense<0.000000e+00> : vector<8x32xf32>
    %410 = tpu.matmul %408, %409, %cst_137 {dimension_numbers = #tpu.dot_dimension_numbers<[1], [0], [0], [1], [0, 0, 1, 1], [], []>} : vector<8x32xbf16>, vector<32x32xbf16>, vector<8x32xf32> -> vector<8x32xf32>
    %c1064 = arith.constant 1064 : index
    %c0_138 = arith.constant 0 : index
    %411 = vector.load %arg8[%c1064, %c0_138] : memref<1960x128xf32, #tpu.memory_space<vmem>>, vector<1x32xf32>
    %412 = vector.broadcast %411 : vector<1x32xf32> to vector<8x32xf32>
    %413 = arith.addf %410, %412 : vector<8x32xf32>
    %414 = tpu.concatenate %399, %399 in 0 : vector<8x32xf32>, vector<8x32xf32> -> vector<16x32xf32>
    %415 = arith.mulf %414, %15 : vector<16x32xf32>
    %416 = arith.truncf %415 : vector<16x32xf32> to vector<16x32xbf16>
    %417 = arith.truncf %406 : vector<8x32xf32> to vector<8x32xbf16>
    %cst_139 = arith.constant dense<0.000000e+00> : vector<16x8xf32>
    %418 = tpu.matmul %416, %417, %cst_139 {dimension_numbers = #tpu.dot_dimension_numbers<[1], [1], [0], [0], [0, 0, 1, 0], [], []>} : vector<16x32xbf16>, vector<8x32xbf16>, vector<16x8xf32> -> vector<16x8xf32>
    %419 = tpu.concatenate %55, %55 in 0 : vector<8x8xf32>, vector<8x8xf32> -> vector<16x8xf32>
    %420 = arith.addf %418, %419 : vector<16x8xf32>
    %cst_140 = arith.constant dense<0xFF800000> : vector<16xf32>
    %421 = vector.multi_reduction <maximumf>, %420, %cst_140 [1] : vector<16x8xf32> to vector<16xf32>
    %422 = vector.shape_cast %421 : vector<16xf32> to vector<16x1xf32>
    %423 = vector.broadcast %422 : vector<16x1xf32> to vector<16x8xf32>
    %424 = arith.subf %420, %423 : vector<16x8xf32>
    %425 = math.exp %424 : vector<16x8xf32>
    %cst_141 = arith.constant dense<0.000000e+00> : vector<16xf32>
    %426 = vector.multi_reduction <add>, %425, %cst_141 [1] : vector<16x8xf32> to vector<16xf32>
    %427 = vector.shape_cast %426 : vector<16xf32> to vector<16x1xf32>
    %428 = tpu.reciprocal %427 {approx = true} : vector<16x1xf32> -> vector<16x1xf32>
    %429 = vector.broadcast %428 : vector<16x1xf32> to vector<16x8xf32>
    %430 = arith.mulf %425, %429 : vector<16x8xf32>
    %431 = arith.truncf %430 : vector<16x8xf32> to vector<16x8xbf16>
    %432 = arith.truncf %413 : vector<8x32xf32> to vector<8x32xbf16>
    %cst_142 = arith.constant dense<0.000000e+00> : vector<16x32xf32>
    %433 = tpu.matmul %431, %432, %cst_142 {dimension_numbers = #tpu.dot_dimension_numbers<[1], [0], [0], [1], [0, 0, 1, 1], [], []>} : vector<16x8xbf16>, vector<8x32xbf16>, vector<16x32xf32> -> vector<16x32xf32>
    %434 = arith.mulf %433, %15 : vector<16x32xf32>
    %435 = vector.extract_strided_slice %434 {offsets = [0, 0], sizes = [8, 32], strides = [1, 1]} : vector<16x32xf32> to vector<8x32xf32>
    %436 = vector.extract_strided_slice %434 {offsets = [8, 0], sizes = [8, 32], strides = [1, 1]} : vector<16x32xf32> to vector<8x32xf32>
    %437 = arith.addf %435, %436 : vector<8x32xf32>
    %c1072 = arith.constant 1072 : index
    %c0_143 = arith.constant 0 : index
    %438 = vector.load %arg8[%c1072, %c0_143] : memref<1960x128xf32, #tpu.memory_space<vmem>>, vector<32x32xf32>
    %439 = arith.truncf %437 : vector<8x32xf32> to vector<8x32xbf16>
    %440 = arith.truncf %438 : vector<32x32xf32> to vector<32x32xbf16>
    %cst_144 = arith.constant dense<0.000000e+00> : vector<8x32xf32>
    %441 = tpu.matmul %439, %440, %cst_144 {dimension_numbers = #tpu.dot_dimension_numbers<[1], [0], [0], [1], [0, 0, 1, 1], [], []>} : vector<8x32xbf16>, vector<32x32xbf16>, vector<8x32xf32> -> vector<8x32xf32>
    %c1104 = arith.constant 1104 : index
    %c0_145 = arith.constant 0 : index
    %442 = vector.load %arg8[%c1104, %c0_145] : memref<1960x128xf32, #tpu.memory_space<vmem>>, vector<1x32xf32>
    %443 = vector.broadcast %442 : vector<1x32xf32> to vector<8x32xf32>
    %444 = arith.addf %441, %443 : vector<8x32xf32>
    %445 = arith.addf %392, %444 : vector<8x32xf32>
    %c1240 = arith.constant 1240 : index
    %c0_146 = arith.constant 0 : index
    %446 = vector.load %arg8[%c1240, %c0_146] : memref<1960x128xf32, #tpu.memory_space<vmem>>, vector<1x32xf32>
    %c1248 = arith.constant 1248 : index
    %c0_147 = arith.constant 0 : index
    %447 = vector.load %arg8[%c1248, %c0_147] : memref<1960x128xf32, #tpu.memory_space<vmem>>, vector<1x32xf32>
    %cst_148 = arith.constant dense<0.000000e+00> : vector<8xf32>
    %448 = vector.multi_reduction <add>, %445, %cst_148 [1] : vector<8x32xf32> to vector<8xf32>
    %449 = vector.shape_cast %448 : vector<8xf32> to vector<8x1xf32>
    %cst_149 = arith.constant 3.200000e+01 : f32
    %450 = vector.broadcast %cst_149 : f32 to vector<8x1xf32>
    %451 = arith.divf %449, %450 : vector<8x1xf32>
    %452 = vector.broadcast %451 : vector<8x1xf32> to vector<8x32xf32>
    %453 = arith.subf %445, %452 : vector<8x32xf32>
    %454 = arith.mulf %453, %453 : vector<8x32xf32>
    %cst_150 = arith.constant dense<0.000000e+00> : vector<8xf32>
    %455 = vector.multi_reduction <add>, %454, %cst_150 [1] : vector<8x32xf32> to vector<8xf32>
    %456 = vector.shape_cast %455 : vector<8xf32> to vector<8x1xf32>
    %cst_151 = arith.constant 3.200000e+01 : f32
    %457 = vector.broadcast %cst_151 : f32 to vector<8x1xf32>
    %458 = arith.divf %456, %457 : vector<8x1xf32>
    %459 = vector.broadcast %451 : vector<8x1xf32> to vector<8x32xf32>
    %460 = arith.subf %445, %459 : vector<8x32xf32>
    %cst_152 = arith.constant 9.99999974E-6 : f32
    %461 = vector.broadcast %cst_152 : f32 to vector<8x1xf32>
    %462 = arith.addf %458, %461 : vector<8x1xf32>
    %463 = math.rsqrt %462 : vector<8x1xf32>
    %464 = vector.broadcast %463 : vector<8x1xf32> to vector<8x32xf32>
    %465 = arith.mulf %460, %464 : vector<8x32xf32>
    %466 = vector.broadcast %446 : vector<1x32xf32> to vector<8x32xf32>
    %467 = arith.mulf %465, %466 : vector<8x32xf32>
    %468 = vector.broadcast %447 : vector<1x32xf32> to vector<8x32xf32>
    %469 = arith.addf %467, %468 : vector<8x32xf32>
    %c1112 = arith.constant 1112 : index
    %c0_153 = arith.constant 0 : index
    %470 = vector.load %arg8[%c1112, %c0_153] : memref<1960x128xf32, #tpu.memory_space<vmem>>, vector<32x64xf32>
    %471 = arith.truncf %469 : vector<8x32xf32> to vector<8x32xbf16>
    %472 = arith.truncf %470 : vector<32x64xf32> to vector<32x64xbf16>
    %cst_154 = arith.constant dense<0.000000e+00> : vector<8x64xf32>
    %473 = tpu.matmul %471, %472, %cst_154 {dimension_numbers = #tpu.dot_dimension_numbers<[1], [0], [0], [1], [0, 0, 1, 1], [], []>} : vector<8x32xbf16>, vector<32x64xbf16>, vector<8x64xf32> -> vector<8x64xf32>
    %c1144 = arith.constant 1144 : index
    %c0_155 = arith.constant 0 : index
    %474 = vector.load %arg8[%c1144, %c0_155] : memref<1960x128xf32, #tpu.memory_space<vmem>>, vector<1x64xf32>
    %475 = vector.broadcast %474 : vector<1x64xf32> to vector<8x64xf32>
    %476 = arith.addf %473, %475 : vector<8x64xf32>
    %cst_156 = arith.constant 0.000000e+00 : f32
    %477 = vector.broadcast %cst_156 : f32 to vector<8x64xf32>
    %478 = arith.maximumf %476, %477 : vector<8x64xf32>
    %c1152 = arith.constant 1152 : index
    %c0_157 = arith.constant 0 : index
    %479 = vector.load %arg8[%c1152, %c0_157] : memref<1960x128xf32, #tpu.memory_space<vmem>>, vector<64x32xf32>
    %480 = arith.truncf %478 : vector<8x64xf32> to vector<8x64xbf16>
    %481 = arith.truncf %479 : vector<64x32xf32> to vector<64x32xbf16>
    %cst_158 = arith.constant dense<0.000000e+00> : vector<8x32xf32>
    %482 = tpu.matmul %480, %481, %cst_158 {dimension_numbers = #tpu.dot_dimension_numbers<[1], [0], [0], [1], [0, 0, 1, 1], [], []>} : vector<8x64xbf16>, vector<64x32xbf16>, vector<8x32xf32> -> vector<8x32xf32>
    %c1216 = arith.constant 1216 : index
    %c0_159 = arith.constant 0 : index
    %483 = vector.load %arg8[%c1216, %c0_159] : memref<1960x128xf32, #tpu.memory_space<vmem>>, vector<1x32xf32>
    %484 = vector.broadcast %483 : vector<1x32xf32> to vector<8x32xf32>
    %485 = arith.addf %482, %484 : vector<8x32xf32>
    %486 = arith.addf %469, %485 : vector<8x32xf32>
    %c1256 = arith.constant 1256 : index
    %c0_160 = arith.constant 0 : index
    %487 = vector.load %arg8[%c1256, %c0_160] : memref<1960x128xf32, #tpu.memory_space<vmem>>, vector<1x32xf32>
    %c1264 = arith.constant 1264 : index
    %c0_161 = arith.constant 0 : index
    %488 = vector.load %arg8[%c1264, %c0_161] : memref<1960x128xf32, #tpu.memory_space<vmem>>, vector<1x32xf32>
    %cst_162 = arith.constant dense<0.000000e+00> : vector<8xf32>
    %489 = vector.multi_reduction <add>, %486, %cst_162 [1] : vector<8x32xf32> to vector<8xf32>
    %490 = vector.shape_cast %489 : vector<8xf32> to vector<8x1xf32>
    %cst_163 = arith.constant 3.200000e+01 : f32
    %491 = vector.broadcast %cst_163 : f32 to vector<8x1xf32>
    %492 = arith.divf %490, %491 : vector<8x1xf32>
    %493 = vector.broadcast %492 : vector<8x1xf32> to vector<8x32xf32>
    %494 = arith.subf %486, %493 : vector<8x32xf32>
    %495 = arith.mulf %494, %494 : vector<8x32xf32>
    %cst_164 = arith.constant dense<0.000000e+00> : vector<8xf32>
    %496 = vector.multi_reduction <add>, %495, %cst_164 [1] : vector<8x32xf32> to vector<8xf32>
    %497 = vector.shape_cast %496 : vector<8xf32> to vector<8x1xf32>
    %cst_165 = arith.constant 3.200000e+01 : f32
    %498 = vector.broadcast %cst_165 : f32 to vector<8x1xf32>
    %499 = arith.divf %497, %498 : vector<8x1xf32>
    %500 = vector.broadcast %492 : vector<8x1xf32> to vector<8x32xf32>
    %501 = arith.subf %486, %500 : vector<8x32xf32>
    %cst_166 = arith.constant 9.99999974E-6 : f32
    %502 = vector.broadcast %cst_166 : f32 to vector<8x1xf32>
    %503 = arith.addf %499, %502 : vector<8x1xf32>
    %504 = math.rsqrt %503 : vector<8x1xf32>
    %505 = vector.broadcast %504 : vector<8x1xf32> to vector<8x32xf32>
    %506 = arith.mulf %501, %505 : vector<8x32xf32>
    %507 = vector.broadcast %487 : vector<1x32xf32> to vector<8x32xf32>
    %508 = arith.mulf %506, %507 : vector<8x32xf32>
    %509 = vector.broadcast %488 : vector<1x32xf32> to vector<8x32xf32>
    %510 = arith.addf %508, %509 : vector<8x32xf32>
    %c1272 = arith.constant 1272 : index
    %c0_167 = arith.constant 0 : index
    %511 = vector.load %arg8[%c1272, %c0_167] : memref<1960x128xf32, #tpu.memory_space<vmem>>, vector<32x32xf32>
    %512 = arith.truncf %510 : vector<8x32xf32> to vector<8x32xbf16>
    %513 = arith.truncf %511 : vector<32x32xf32> to vector<32x32xbf16>
    %cst_168 = arith.constant dense<0.000000e+00> : vector<8x32xf32>
    %514 = tpu.matmul %512, %513, %cst_168 {dimension_numbers = #tpu.dot_dimension_numbers<[1], [0], [0], [1], [0, 0, 1, 1], [], []>} : vector<8x32xbf16>, vector<32x32xbf16>, vector<8x32xf32> -> vector<8x32xf32>
    %c1304 = arith.constant 1304 : index
    %c0_169 = arith.constant 0 : index
    %515 = vector.load %arg8[%c1304, %c0_169] : memref<1960x128xf32, #tpu.memory_space<vmem>>, vector<1x32xf32>
    %516 = vector.broadcast %515 : vector<1x32xf32> to vector<8x32xf32>
    %517 = arith.addf %514, %516 : vector<8x32xf32>
    %c1312 = arith.constant 1312 : index
    %c0_170 = arith.constant 0 : index
    %518 = vector.load %arg8[%c1312, %c0_170] : memref<1960x128xf32, #tpu.memory_space<vmem>>, vector<32x32xf32>
    %519 = arith.truncf %510 : vector<8x32xf32> to vector<8x32xbf16>
    %520 = arith.truncf %518 : vector<32x32xf32> to vector<32x32xbf16>
    %cst_171 = arith.constant dense<0.000000e+00> : vector<8x32xf32>
    %521 = tpu.matmul %519, %520, %cst_171 {dimension_numbers = #tpu.dot_dimension_numbers<[1], [0], [0], [1], [0, 0, 1, 1], [], []>} : vector<8x32xbf16>, vector<32x32xbf16>, vector<8x32xf32> -> vector<8x32xf32>
    %c1344 = arith.constant 1344 : index
    %c0_172 = arith.constant 0 : index
    %522 = vector.load %arg8[%c1344, %c0_172] : memref<1960x128xf32, #tpu.memory_space<vmem>>, vector<1x32xf32>
    %523 = vector.broadcast %522 : vector<1x32xf32> to vector<8x32xf32>
    %524 = arith.addf %521, %523 : vector<8x32xf32>
    %c1352 = arith.constant 1352 : index
    %c0_173 = arith.constant 0 : index
    %525 = vector.load %arg8[%c1352, %c0_173] : memref<1960x128xf32, #tpu.memory_space<vmem>>, vector<32x32xf32>
    %526 = arith.truncf %510 : vector<8x32xf32> to vector<8x32xbf16>
    %527 = arith.truncf %525 : vector<32x32xf32> to vector<32x32xbf16>
    %cst_174 = arith.constant dense<0.000000e+00> : vector<8x32xf32>
    %528 = tpu.matmul %526, %527, %cst_174 {dimension_numbers = #tpu.dot_dimension_numbers<[1], [0], [0], [1], [0, 0, 1, 1], [], []>} : vector<8x32xbf16>, vector<32x32xbf16>, vector<8x32xf32> -> vector<8x32xf32>
    %c1384 = arith.constant 1384 : index
    %c0_175 = arith.constant 0 : index
    %529 = vector.load %arg8[%c1384, %c0_175] : memref<1960x128xf32, #tpu.memory_space<vmem>>, vector<1x32xf32>
    %530 = vector.broadcast %529 : vector<1x32xf32> to vector<8x32xf32>
    %531 = arith.addf %528, %530 : vector<8x32xf32>
    %532 = tpu.concatenate %517, %517 in 0 : vector<8x32xf32>, vector<8x32xf32> -> vector<16x32xf32>
    %533 = arith.mulf %532, %15 : vector<16x32xf32>
    %534 = arith.truncf %533 : vector<16x32xf32> to vector<16x32xbf16>
    %535 = arith.truncf %524 : vector<8x32xf32> to vector<8x32xbf16>
    %cst_176 = arith.constant dense<0.000000e+00> : vector<16x8xf32>
    %536 = tpu.matmul %534, %535, %cst_176 {dimension_numbers = #tpu.dot_dimension_numbers<[1], [1], [0], [0], [0, 0, 1, 0], [], []>} : vector<16x32xbf16>, vector<8x32xbf16>, vector<16x8xf32> -> vector<16x8xf32>
    %537 = tpu.concatenate %51, %51 in 0 : vector<8x8xf32>, vector<8x8xf32> -> vector<16x8xf32>
    %538 = arith.addf %536, %537 : vector<16x8xf32>
    %cst_177 = arith.constant dense<0xFF800000> : vector<16xf32>
    %539 = vector.multi_reduction <maximumf>, %538, %cst_177 [1] : vector<16x8xf32> to vector<16xf32>
    %540 = vector.shape_cast %539 : vector<16xf32> to vector<16x1xf32>
    %541 = vector.broadcast %540 : vector<16x1xf32> to vector<16x8xf32>
    %542 = arith.subf %538, %541 : vector<16x8xf32>
    %543 = math.exp %542 : vector<16x8xf32>
    %cst_178 = arith.constant dense<0.000000e+00> : vector<16xf32>
    %544 = vector.multi_reduction <add>, %543, %cst_178 [1] : vector<16x8xf32> to vector<16xf32>
    %545 = vector.shape_cast %544 : vector<16xf32> to vector<16x1xf32>
    %546 = tpu.reciprocal %545 {approx = true} : vector<16x1xf32> -> vector<16x1xf32>
    %547 = vector.broadcast %546 : vector<16x1xf32> to vector<16x8xf32>
    %548 = arith.mulf %543, %547 : vector<16x8xf32>
    %549 = arith.truncf %548 : vector<16x8xf32> to vector<16x8xbf16>
    %550 = arith.truncf %531 : vector<8x32xf32> to vector<8x32xbf16>
    %cst_179 = arith.constant dense<0.000000e+00> : vector<16x32xf32>
    %551 = tpu.matmul %549, %550, %cst_179 {dimension_numbers = #tpu.dot_dimension_numbers<[1], [0], [0], [1], [0, 0, 1, 1], [], []>} : vector<16x8xbf16>, vector<8x32xbf16>, vector<16x32xf32> -> vector<16x32xf32>
    %552 = arith.mulf %551, %15 : vector<16x32xf32>
    %553 = vector.extract_strided_slice %552 {offsets = [0, 0], sizes = [8, 32], strides = [1, 1]} : vector<16x32xf32> to vector<8x32xf32>
    %554 = vector.extract_strided_slice %552 {offsets = [8, 0], sizes = [8, 32], strides = [1, 1]} : vector<16x32xf32> to vector<8x32xf32>
    %555 = arith.addf %553, %554 : vector<8x32xf32>
    %c1392 = arith.constant 1392 : index
    %c0_180 = arith.constant 0 : index
    %556 = vector.load %arg8[%c1392, %c0_180] : memref<1960x128xf32, #tpu.memory_space<vmem>>, vector<32x32xf32>
    %557 = arith.truncf %555 : vector<8x32xf32> to vector<8x32xbf16>
    %558 = arith.truncf %556 : vector<32x32xf32> to vector<32x32xbf16>
    %cst_181 = arith.constant dense<0.000000e+00> : vector<8x32xf32>
    %559 = tpu.matmul %557, %558, %cst_181 {dimension_numbers = #tpu.dot_dimension_numbers<[1], [0], [0], [1], [0, 0, 1, 1], [], []>} : vector<8x32xbf16>, vector<32x32xbf16>, vector<8x32xf32> -> vector<8x32xf32>
    %c1424 = arith.constant 1424 : index
    %c0_182 = arith.constant 0 : index
    %560 = vector.load %arg8[%c1424, %c0_182] : memref<1960x128xf32, #tpu.memory_space<vmem>>, vector<1x32xf32>
    %561 = vector.broadcast %560 : vector<1x32xf32> to vector<8x32xf32>
    %562 = arith.addf %559, %561 : vector<8x32xf32>
    %563 = arith.addf %510, %562 : vector<8x32xf32>
    %c1704 = arith.constant 1704 : index
    %c0_183 = arith.constant 0 : index
    %564 = vector.load %arg8[%c1704, %c0_183] : memref<1960x128xf32, #tpu.memory_space<vmem>>, vector<1x32xf32>
    %c1712 = arith.constant 1712 : index
    %c0_184 = arith.constant 0 : index
    %565 = vector.load %arg8[%c1712, %c0_184] : memref<1960x128xf32, #tpu.memory_space<vmem>>, vector<1x32xf32>
    %cst_185 = arith.constant dense<0.000000e+00> : vector<8xf32>
    %566 = vector.multi_reduction <add>, %563, %cst_185 [1] : vector<8x32xf32> to vector<8xf32>
    %567 = vector.shape_cast %566 : vector<8xf32> to vector<8x1xf32>
    %cst_186 = arith.constant 3.200000e+01 : f32
    %568 = vector.broadcast %cst_186 : f32 to vector<8x1xf32>
    %569 = arith.divf %567, %568 : vector<8x1xf32>
    %570 = vector.broadcast %569 : vector<8x1xf32> to vector<8x32xf32>
    %571 = arith.subf %563, %570 : vector<8x32xf32>
    %572 = arith.mulf %571, %571 : vector<8x32xf32>
    %cst_187 = arith.constant dense<0.000000e+00> : vector<8xf32>
    %573 = vector.multi_reduction <add>, %572, %cst_187 [1] : vector<8x32xf32> to vector<8xf32>
    %574 = vector.shape_cast %573 : vector<8xf32> to vector<8x1xf32>
    %cst_188 = arith.constant 3.200000e+01 : f32
    %575 = vector.broadcast %cst_188 : f32 to vector<8x1xf32>
    %576 = arith.divf %574, %575 : vector<8x1xf32>
    %577 = vector.broadcast %569 : vector<8x1xf32> to vector<8x32xf32>
    %578 = arith.subf %563, %577 : vector<8x32xf32>
    %cst_189 = arith.constant 9.99999974E-6 : f32
    %579 = vector.broadcast %cst_189 : f32 to vector<8x1xf32>
    %580 = arith.addf %576, %579 : vector<8x1xf32>
    %581 = math.rsqrt %580 : vector<8x1xf32>
    %582 = vector.broadcast %581 : vector<8x1xf32> to vector<8x32xf32>
    %583 = arith.mulf %578, %582 : vector<8x32xf32>
    %584 = vector.broadcast %564 : vector<1x32xf32> to vector<8x32xf32>
    %585 = arith.mulf %583, %584 : vector<8x32xf32>
    %586 = vector.broadcast %565 : vector<1x32xf32> to vector<8x32xf32>
    %587 = arith.addf %585, %586 : vector<8x32xf32>
    %c1432 = arith.constant 1432 : index
    %c0_190 = arith.constant 0 : index
    %588 = vector.load %arg8[%c1432, %c0_190] : memref<1960x128xf32, #tpu.memory_space<vmem>>, vector<32x32xf32>
    %589 = arith.truncf %587 : vector<8x32xf32> to vector<8x32xbf16>
    %590 = arith.truncf %588 : vector<32x32xf32> to vector<32x32xbf16>
    %cst_191 = arith.constant dense<0.000000e+00> : vector<8x32xf32>
    %591 = tpu.matmul %589, %590, %cst_191 {dimension_numbers = #tpu.dot_dimension_numbers<[1], [0], [0], [1], [0, 0, 1, 1], [], []>} : vector<8x32xbf16>, vector<32x32xbf16>, vector<8x32xf32> -> vector<8x32xf32>
    %c1464 = arith.constant 1464 : index
    %c0_192 = arith.constant 0 : index
    %592 = vector.load %arg8[%c1464, %c0_192] : memref<1960x128xf32, #tpu.memory_space<vmem>>, vector<1x32xf32>
    %593 = vector.broadcast %592 : vector<1x32xf32> to vector<8x32xf32>
    %594 = arith.addf %591, %593 : vector<8x32xf32>
    %c1472 = arith.constant 1472 : index
    %c0_193 = arith.constant 0 : index
    %595 = vector.load %arg8[%c1472, %c0_193] : memref<1960x128xf32, #tpu.memory_space<vmem>>, vector<32x32xf32>
    %596 = arith.truncf %315 : vector<8x32xf32> to vector<8x32xbf16>
    %597 = arith.truncf %595 : vector<32x32xf32> to vector<32x32xbf16>
    %cst_194 = arith.constant dense<0.000000e+00> : vector<8x32xf32>
    %598 = tpu.matmul %596, %597, %cst_194 {dimension_numbers = #tpu.dot_dimension_numbers<[1], [0], [0], [1], [0, 0, 1, 1], [], []>} : vector<8x32xbf16>, vector<32x32xbf16>, vector<8x32xf32> -> vector<8x32xf32>
    %c1504 = arith.constant 1504 : index
    %c0_195 = arith.constant 0 : index
    %599 = vector.load %arg8[%c1504, %c0_195] : memref<1960x128xf32, #tpu.memory_space<vmem>>, vector<1x32xf32>
    %600 = vector.broadcast %599 : vector<1x32xf32> to vector<8x32xf32>
    %601 = arith.addf %598, %600 : vector<8x32xf32>
    %c1512 = arith.constant 1512 : index
    %c0_196 = arith.constant 0 : index
    %602 = vector.load %arg8[%c1512, %c0_196] : memref<1960x128xf32, #tpu.memory_space<vmem>>, vector<32x32xf32>
    %603 = arith.truncf %315 : vector<8x32xf32> to vector<8x32xbf16>
    %604 = arith.truncf %602 : vector<32x32xf32> to vector<32x32xbf16>
    %cst_197 = arith.constant dense<0.000000e+00> : vector<8x32xf32>
    %605 = tpu.matmul %603, %604, %cst_197 {dimension_numbers = #tpu.dot_dimension_numbers<[1], [0], [0], [1], [0, 0, 1, 1], [], []>} : vector<8x32xbf16>, vector<32x32xbf16>, vector<8x32xf32> -> vector<8x32xf32>
    %c1544 = arith.constant 1544 : index
    %c0_198 = arith.constant 0 : index
    %606 = vector.load %arg8[%c1544, %c0_198] : memref<1960x128xf32, #tpu.memory_space<vmem>>, vector<1x32xf32>
    %607 = vector.broadcast %606 : vector<1x32xf32> to vector<8x32xf32>
    %608 = arith.addf %605, %607 : vector<8x32xf32>
    %609 = tpu.concatenate %594, %594 in 0 : vector<8x32xf32>, vector<8x32xf32> -> vector<16x32xf32>
    %610 = arith.mulf %609, %15 : vector<16x32xf32>
    %611 = arith.truncf %610 : vector<16x32xf32> to vector<16x32xbf16>
    %612 = arith.truncf %601 : vector<8x32xf32> to vector<8x32xbf16>
    %cst_199 = arith.constant dense<0.000000e+00> : vector<16x8xf32>
    %613 = tpu.matmul %611, %612, %cst_199 {dimension_numbers = #tpu.dot_dimension_numbers<[1], [1], [0], [0], [0, 0, 1, 0], [], []>} : vector<16x32xbf16>, vector<8x32xbf16>, vector<16x8xf32> -> vector<16x8xf32>
    %614 = tpu.concatenate %55, %55 in 0 : vector<8x8xf32>, vector<8x8xf32> -> vector<16x8xf32>
    %615 = arith.addf %613, %614 : vector<16x8xf32>
    %cst_200 = arith.constant dense<0xFF800000> : vector<16xf32>
    %616 = vector.multi_reduction <maximumf>, %615, %cst_200 [1] : vector<16x8xf32> to vector<16xf32>
    %617 = vector.shape_cast %616 : vector<16xf32> to vector<16x1xf32>
    %618 = vector.broadcast %617 : vector<16x1xf32> to vector<16x8xf32>
    %619 = arith.subf %615, %618 : vector<16x8xf32>
    %620 = math.exp %619 : vector<16x8xf32>
    %cst_201 = arith.constant dense<0.000000e+00> : vector<16xf32>
    %621 = vector.multi_reduction <add>, %620, %cst_201 [1] : vector<16x8xf32> to vector<16xf32>
    %622 = vector.shape_cast %621 : vector<16xf32> to vector<16x1xf32>
    %623 = tpu.reciprocal %622 {approx = true} : vector<16x1xf32> -> vector<16x1xf32>
    %624 = vector.broadcast %623 : vector<16x1xf32> to vector<16x8xf32>
    %625 = arith.mulf %620, %624 : vector<16x8xf32>
    %626 = arith.truncf %625 : vector<16x8xf32> to vector<16x8xbf16>
    %627 = arith.truncf %608 : vector<8x32xf32> to vector<8x32xbf16>
    %cst_202 = arith.constant dense<0.000000e+00> : vector<16x32xf32>
    %628 = tpu.matmul %626, %627, %cst_202 {dimension_numbers = #tpu.dot_dimension_numbers<[1], [0], [0], [1], [0, 0, 1, 1], [], []>} : vector<16x8xbf16>, vector<8x32xbf16>, vector<16x32xf32> -> vector<16x32xf32>
    %629 = arith.mulf %628, %15 : vector<16x32xf32>
    %630 = vector.extract_strided_slice %629 {offsets = [0, 0], sizes = [8, 32], strides = [1, 1]} : vector<16x32xf32> to vector<8x32xf32>
    %631 = vector.extract_strided_slice %629 {offsets = [8, 0], sizes = [8, 32], strides = [1, 1]} : vector<16x32xf32> to vector<8x32xf32>
    %632 = arith.addf %630, %631 : vector<8x32xf32>
    %c1552 = arith.constant 1552 : index
    %c0_203 = arith.constant 0 : index
    %633 = vector.load %arg8[%c1552, %c0_203] : memref<1960x128xf32, #tpu.memory_space<vmem>>, vector<32x32xf32>
    %634 = arith.truncf %632 : vector<8x32xf32> to vector<8x32xbf16>
    %635 = arith.truncf %633 : vector<32x32xf32> to vector<32x32xbf16>
    %cst_204 = arith.constant dense<0.000000e+00> : vector<8x32xf32>
    %636 = tpu.matmul %634, %635, %cst_204 {dimension_numbers = #tpu.dot_dimension_numbers<[1], [0], [0], [1], [0, 0, 1, 1], [], []>} : vector<8x32xbf16>, vector<32x32xbf16>, vector<8x32xf32> -> vector<8x32xf32>
    %c1584 = arith.constant 1584 : index
    %c0_205 = arith.constant 0 : index
    %637 = vector.load %arg8[%c1584, %c0_205] : memref<1960x128xf32, #tpu.memory_space<vmem>>, vector<1x32xf32>
    %638 = vector.broadcast %637 : vector<1x32xf32> to vector<8x32xf32>
    %639 = arith.addf %636, %638 : vector<8x32xf32>
    %640 = arith.addf %587, %639 : vector<8x32xf32>
    %c1720 = arith.constant 1720 : index
    %c0_206 = arith.constant 0 : index
    %641 = vector.load %arg8[%c1720, %c0_206] : memref<1960x128xf32, #tpu.memory_space<vmem>>, vector<1x32xf32>
    %c1728 = arith.constant 1728 : index
    %c0_207 = arith.constant 0 : index
    %642 = vector.load %arg8[%c1728, %c0_207] : memref<1960x128xf32, #tpu.memory_space<vmem>>, vector<1x32xf32>
    %cst_208 = arith.constant dense<0.000000e+00> : vector<8xf32>
    %643 = vector.multi_reduction <add>, %640, %cst_208 [1] : vector<8x32xf32> to vector<8xf32>
    %644 = vector.shape_cast %643 : vector<8xf32> to vector<8x1xf32>
    %cst_209 = arith.constant 3.200000e+01 : f32
    %645 = vector.broadcast %cst_209 : f32 to vector<8x1xf32>
    %646 = arith.divf %644, %645 : vector<8x1xf32>
    %647 = vector.broadcast %646 : vector<8x1xf32> to vector<8x32xf32>
    %648 = arith.subf %640, %647 : vector<8x32xf32>
    %649 = arith.mulf %648, %648 : vector<8x32xf32>
    %cst_210 = arith.constant dense<0.000000e+00> : vector<8xf32>
    %650 = vector.multi_reduction <add>, %649, %cst_210 [1] : vector<8x32xf32> to vector<8xf32>
    %651 = vector.shape_cast %650 : vector<8xf32> to vector<8x1xf32>
    %cst_211 = arith.constant 3.200000e+01 : f32
    %652 = vector.broadcast %cst_211 : f32 to vector<8x1xf32>
    %653 = arith.divf %651, %652 : vector<8x1xf32>
    %654 = vector.broadcast %646 : vector<8x1xf32> to vector<8x32xf32>
    %655 = arith.subf %640, %654 : vector<8x32xf32>
    %cst_212 = arith.constant 9.99999974E-6 : f32
    %656 = vector.broadcast %cst_212 : f32 to vector<8x1xf32>
    %657 = arith.addf %653, %656 : vector<8x1xf32>
    %658 = math.rsqrt %657 : vector<8x1xf32>
    %659 = vector.broadcast %658 : vector<8x1xf32> to vector<8x32xf32>
    %660 = arith.mulf %655, %659 : vector<8x32xf32>
    %661 = vector.broadcast %641 : vector<1x32xf32> to vector<8x32xf32>
    %662 = arith.mulf %660, %661 : vector<8x32xf32>
    %663 = vector.broadcast %642 : vector<1x32xf32> to vector<8x32xf32>
    %664 = arith.addf %662, %663 : vector<8x32xf32>
    %c1592 = arith.constant 1592 : index
    %c0_213 = arith.constant 0 : index
    %665 = vector.load %arg8[%c1592, %c0_213] : memref<1960x128xf32, #tpu.memory_space<vmem>>, vector<32x64xf32>
    %666 = arith.truncf %664 : vector<8x32xf32> to vector<8x32xbf16>
    %667 = arith.truncf %665 : vector<32x64xf32> to vector<32x64xbf16>
    %cst_214 = arith.constant dense<0.000000e+00> : vector<8x64xf32>
    %668 = tpu.matmul %666, %667, %cst_214 {dimension_numbers = #tpu.dot_dimension_numbers<[1], [0], [0], [1], [0, 0, 1, 1], [], []>} : vector<8x32xbf16>, vector<32x64xbf16>, vector<8x64xf32> -> vector<8x64xf32>
    %c1624 = arith.constant 1624 : index
    %c0_215 = arith.constant 0 : index
    %669 = vector.load %arg8[%c1624, %c0_215] : memref<1960x128xf32, #tpu.memory_space<vmem>>, vector<1x64xf32>
    %670 = vector.broadcast %669 : vector<1x64xf32> to vector<8x64xf32>
    %671 = arith.addf %668, %670 : vector<8x64xf32>
    %cst_216 = arith.constant 0.000000e+00 : f32
    %672 = vector.broadcast %cst_216 : f32 to vector<8x64xf32>
    %673 = arith.maximumf %671, %672 : vector<8x64xf32>
    %c1632 = arith.constant 1632 : index
    %c0_217 = arith.constant 0 : index
    %674 = vector.load %arg8[%c1632, %c0_217] : memref<1960x128xf32, #tpu.memory_space<vmem>>, vector<64x32xf32>
    %675 = arith.truncf %673 : vector<8x64xf32> to vector<8x64xbf16>
    %676 = arith.truncf %674 : vector<64x32xf32> to vector<64x32xbf16>
    %cst_218 = arith.constant dense<0.000000e+00> : vector<8x32xf32>
    %677 = tpu.matmul %675, %676, %cst_218 {dimension_numbers = #tpu.dot_dimension_numbers<[1], [0], [0], [1], [0, 0, 1, 1], [], []>} : vector<8x64xbf16>, vector<64x32xbf16>, vector<8x32xf32> -> vector<8x32xf32>
    %c1696 = arith.constant 1696 : index
    %c0_219 = arith.constant 0 : index
    %678 = vector.load %arg8[%c1696, %c0_219] : memref<1960x128xf32, #tpu.memory_space<vmem>>, vector<1x32xf32>
    %679 = vector.broadcast %678 : vector<1x32xf32> to vector<8x32xf32>
    %680 = arith.addf %677, %679 : vector<8x32xf32>
    %681 = arith.addf %664, %680 : vector<8x32xf32>
    %c1736 = arith.constant 1736 : index
    %c0_220 = arith.constant 0 : index
    %682 = vector.load %arg8[%c1736, %c0_220] : memref<1960x128xf32, #tpu.memory_space<vmem>>, vector<1x32xf32>
    %c1744 = arith.constant 1744 : index
    %c0_221 = arith.constant 0 : index
    %683 = vector.load %arg8[%c1744, %c0_221] : memref<1960x128xf32, #tpu.memory_space<vmem>>, vector<1x32xf32>
    %cst_222 = arith.constant dense<0.000000e+00> : vector<8xf32>
    %684 = vector.multi_reduction <add>, %681, %cst_222 [1] : vector<8x32xf32> to vector<8xf32>
    %685 = vector.shape_cast %684 : vector<8xf32> to vector<8x1xf32>
    %cst_223 = arith.constant 3.200000e+01 : f32
    %686 = vector.broadcast %cst_223 : f32 to vector<8x1xf32>
    %687 = arith.divf %685, %686 : vector<8x1xf32>
    %688 = vector.broadcast %687 : vector<8x1xf32> to vector<8x32xf32>
    %689 = arith.subf %681, %688 : vector<8x32xf32>
    %690 = arith.mulf %689, %689 : vector<8x32xf32>
    %cst_224 = arith.constant dense<0.000000e+00> : vector<8xf32>
    %691 = vector.multi_reduction <add>, %690, %cst_224 [1] : vector<8x32xf32> to vector<8xf32>
    %692 = vector.shape_cast %691 : vector<8xf32> to vector<8x1xf32>
    %cst_225 = arith.constant 3.200000e+01 : f32
    %693 = vector.broadcast %cst_225 : f32 to vector<8x1xf32>
    %694 = arith.divf %692, %693 : vector<8x1xf32>
    %695 = vector.broadcast %687 : vector<8x1xf32> to vector<8x32xf32>
    %696 = arith.subf %681, %695 : vector<8x32xf32>
    %cst_226 = arith.constant 9.99999974E-6 : f32
    %697 = vector.broadcast %cst_226 : f32 to vector<8x1xf32>
    %698 = arith.addf %694, %697 : vector<8x1xf32>
    %699 = math.rsqrt %698 : vector<8x1xf32>
    %700 = vector.broadcast %699 : vector<8x1xf32> to vector<8x32xf32>
    %701 = arith.mulf %696, %700 : vector<8x32xf32>
    %702 = vector.broadcast %682 : vector<1x32xf32> to vector<8x32xf32>
    %703 = arith.mulf %701, %702 : vector<8x32xf32>
    %704 = vector.broadcast %683 : vector<1x32xf32> to vector<8x32xf32>
    %705 = arith.addf %703, %704 : vector<8x32xf32>
    %c1768 = arith.constant 1768 : index
    %c0_227 = arith.constant 0 : index
    %706 = vector.load %arg8[%c1768, %c0_227] : memref<1960x128xf32, #tpu.memory_space<vmem>>, vector<1x32xf32>
    %c1776 = arith.constant 1776 : index
    %c0_228 = arith.constant 0 : index
    %707 = vector.load %arg8[%c1776, %c0_228] : memref<1960x128xf32, #tpu.memory_space<vmem>>, vector<1x32xf32>
    %cst_229 = arith.constant dense<0.000000e+00> : vector<8xf32>
    %708 = vector.multi_reduction <add>, %705, %cst_229 [1] : vector<8x32xf32> to vector<8xf32>
    %709 = vector.shape_cast %708 : vector<8xf32> to vector<8x1xf32>
    %cst_230 = arith.constant 3.200000e+01 : f32
    %710 = vector.broadcast %cst_230 : f32 to vector<8x1xf32>
    %711 = arith.divf %709, %710 : vector<8x1xf32>
    %712 = vector.broadcast %711 : vector<8x1xf32> to vector<8x32xf32>
    %713 = arith.subf %705, %712 : vector<8x32xf32>
    %714 = arith.mulf %713, %713 : vector<8x32xf32>
    %cst_231 = arith.constant dense<0.000000e+00> : vector<8xf32>
    %715 = vector.multi_reduction <add>, %714, %cst_231 [1] : vector<8x32xf32> to vector<8xf32>
    %716 = vector.shape_cast %715 : vector<8xf32> to vector<8x1xf32>
    %cst_232 = arith.constant 3.200000e+01 : f32
    %717 = vector.broadcast %cst_232 : f32 to vector<8x1xf32>
    %718 = arith.divf %716, %717 : vector<8x1xf32>
    %719 = vector.broadcast %711 : vector<8x1xf32> to vector<8x32xf32>
    %720 = arith.subf %705, %719 : vector<8x32xf32>
    %cst_233 = arith.constant 9.99999974E-6 : f32
    %721 = vector.broadcast %cst_233 : f32 to vector<8x1xf32>
    %722 = arith.addf %718, %721 : vector<8x1xf32>
    %723 = math.rsqrt %722 : vector<8x1xf32>
    %724 = vector.broadcast %723 : vector<8x1xf32> to vector<8x32xf32>
    %725 = arith.mulf %720, %724 : vector<8x32xf32>
    %726 = vector.broadcast %706 : vector<1x32xf32> to vector<8x32xf32>
    %727 = arith.mulf %725, %726 : vector<8x32xf32>
    %728 = vector.broadcast %707 : vector<1x32xf32> to vector<8x32xf32>
    %729 = arith.addf %727, %728 : vector<8x32xf32>
    %c1784 = arith.constant 1784 : index
    %c0_234 = arith.constant 0 : index
    %730 = vector.load %arg8[%c1784, %c0_234] : memref<1960x128xf32, #tpu.memory_space<vmem>>, vector<32x128xf32>
    %731 = arith.truncf %729 : vector<8x32xf32> to vector<8x32xbf16>
    %732 = arith.truncf %730 : vector<32x128xf32> to vector<32x128xbf16>
    %cst_235 = arith.constant dense<0.000000e+00> : vector<8x128xf32>
    %733 = tpu.matmul %731, %732, %cst_235 {dimension_numbers = #tpu.dot_dimension_numbers<[1], [0], [0], [1], [0, 0, 1, 1], [], []>} : vector<8x32xbf16>, vector<32x128xbf16>, vector<8x128xf32> -> vector<8x128xf32>
    %c1816 = arith.constant 1816 : index
    %c0_236 = arith.constant 0 : index
    %734 = vector.load %arg8[%c1816, %c0_236] : memref<1960x128xf32, #tpu.memory_space<vmem>>, vector<1x128xf32>
    %735 = vector.broadcast %734 : vector<1x128xf32> to vector<8x128xf32>
    %736 = arith.addf %733, %735 : vector<8x128xf32>
    %c1824 = arith.constant 1824 : index
    %c0_237 = arith.constant 0 : index
    %737 = vector.load %arg8[%c1824, %c0_237] : memref<1960x128xf32, #tpu.memory_space<vmem>>, vector<128x128xf32>
    %738 = arith.truncf %736 : vector<8x128xf32> to vector<8x128xbf16>
    %739 = arith.truncf %737 : vector<128x128xf32> to vector<128x128xbf16>
    %cst_238 = arith.constant dense<0.000000e+00> : vector<8x128xf32>
    %740 = tpu.matmul %738, %739, %cst_238 {dimension_numbers = #tpu.dot_dimension_numbers<[1], [0], [0], [1], [0, 0, 1, 1], [], []>} : vector<8x128xbf16>, vector<128x128xbf16>, vector<8x128xf32> -> vector<8x128xf32>
    %c1952 = arith.constant 1952 : index
    %c0_239 = arith.constant 0 : index
    %741 = vector.load %arg8[%c1952, %c0_239] : memref<1960x128xf32, #tpu.memory_space<vmem>>, vector<1x128xf32>
    %742 = vector.broadcast %741 : vector<1x128xf32> to vector<8x128xf32>
    %743 = arith.addf %740, %742 : vector<8x128xf32>
    %c0_240 = arith.constant 0 : index
    %c0_241 = arith.constant 0 : index
    %c0_242 = arith.constant 0 : index
    %744 = vector.load %arg9[%c0_240, %c0_241, %c0_242] : memref<1x8x128xf32, #tpu.memory_space<vmem>>, vector<1x8x128xf32>
    %745 = vector.shape_cast %744 : vector<1x8x128xf32> to vector<8x128xf32>
    %746 = vector.shape_cast %743 : vector<8x128xf32> to vector<1x8x128xf32>
    tpu.vector_store %arg9[%c0_240, %c0_241, %c0_242], %746 {strides = array<i32>} : memref<1x8x128xf32, #tpu.memory_space<vmem>>, vector<1x8x128xf32>,
    return
  }
  func.func @transform_0(%arg0: i32) -> (i32, i32, i32) {
    %c0_i32 = arith.constant 0 : i32
    %c0_i32_0 = arith.constant 0 : i32
    %c0_i32_1 = arith.constant 0 : i32
    return %arg0, %c0_i32, %c0_i32_0 : i32, i32, i32
  }
  func.func @transform_1(%arg0: i32) -> (i32, i32, i32) {
    %c0_i32 = arith.constant 0 : i32
    %c0_i32_0 = arith.constant 0 : i32
    %c0_i32_1 = arith.constant 0 : i32
    return %arg0, %c0_i32, %c0_i32_0 : i32, i32, i32
  }
  func.func @transform_2(%arg0: i32) -> (i32, i32) {
    %c0_i32 = arith.constant 0 : i32
    %c0_i32_0 = arith.constant 0 : i32
    %c0_i32_1 = arith.constant 0 : i32
    return %c0_i32, %c0_i32_0 : i32, i32
  }
  func.func @transform_3(%arg0: i32) -> (i32, i32) {
    %c0_i32 = arith.constant 0 : i32
    %c0_i32_0 = arith.constant 0 : i32
    %c0_i32_1 = arith.constant 0 : i32
    return %c0_i32, %c0_i32_0 : i32, i32
  }
  func.func @transform_4(%arg0: i32) -> (i32, i32, i32) {
    %c0_i32 = arith.constant 0 : i32
    %c0_i32_0 = arith.constant 0 : i32
    %c0_i32_1 = arith.constant 0 : i32
    return %arg0, %c0_i32, %c0_i32_0 : i32, i32, i32
  }
  func.func @transform_5(%arg0: i32) -> (i32, i32, i32) {
    %c0_i32 = arith.constant 0 : i32
    %c0_i32_0 = arith.constant 0 : i32
    %c0_i32_1 = arith.constant 0 : i32
    return %arg0, %c0_i32, %c0_i32_0 : i32, i32, i32
  }
  func.func @transform_6(%arg0: i32) -> (i32, i32, i32) {
    %c0_i32 = arith.constant 0 : i32
    %c0_i32_0 = arith.constant 0 : i32
    %c0_i32_1 = arith.constant 0 : i32
    return %arg0, %c0_i32, %c0_i32_0 : i32, i32, i32
  }
  func.func @transform_7(%arg0: i32) -> (i32, i32) {
    %c0_i32 = arith.constant 0 : i32
    %c0_i32_0 = arith.constant 0 : i32
    %c0_i32_1 = arith.constant 0 : i32
    return %c0_i32, %c0_i32_0 : i32, i32
  }
  func.func @transform_8(%arg0: i32) -> (i32, i32, i32) {
    %c0_i32 = arith.constant 0 : i32
    %c0_i32_0 = arith.constant 0 : i32
    %c0_i32_1 = arith.constant 0 : i32
    return %arg0, %c0_i32, %c0_i32_0 : i32, i32, i32
  }
}

</mosaic_0001>

<bundles_post_ra>
// kernel: forward.1
= control target key start
LH: loop header
LB: loop body
LE: loop exit
PB: predicated region body
PF: predicated region fallthrough
CT: control target
= control target key end

     0   :  { %13 = vsyncpa [#allocation3], 0  ;;  %s4446_s27 = smov 0   ;;  %s4932_s0 = inlined_call_operand.vmem [shape: s32[2,8,1], index: 0, kind: input, shape index: {}]   ;;  %s4933_s1 = inlined_call_operand.vmem [shape: s32[2,8,1], index: 1, kind: input, shape index: {}]   ;;  %s4934_s2 = inlined_call_operand.vmem [shape: f32[8,8], index: 2, kind: input, shape index: {}]   ;;  %s4935_s3 = inlined_call_operand.vmem [shape: f32[8,8], index: 3, kind: input, shape index: {}]   ;;  %s4936_s4 = inlined_call_operand.vmem [shape: f32[2,1,8], index: 4, kind: input, shape index: {}]   ;;  %s4937_s5 = inlined_call_operand.vmem [shape: f32[2,1,8], index: 5, kind: input, shape index: {}]   ;;  %s4938_s6 = inlined_call_operand.vmem [shape: f32[2,1,8], index: 6, kind: input, shape index: {}]   ;;  %s4939_s7 = inlined_call_operand.hbm [shape: f32[1960,128], index: 7, kind: input, shape index: {}]   ;;  %s4940_s8 = inlined_call_operand.vmem [shape: f32[2,8,128], index: 8, kind: output, shape index: {}]  }
   0x1 LB: > { %s4452_s28 = sadd.s32 4294967295, %s4393_s27   ;;  %p3590_p0 = scmp.ge.s32.totalorder %s4393_s27, 1  ;;  %s4393_s27 = sphi %s4446_s27, %s19_s27  }
   0x2   : > { %p243_p1 = scmp.lt.s32.totalorder %s4393_s27, 3  ;;  %s4395_s29 = smov [#allocation2]  }
   0x3   : > { %s261_s30 = sshll.u32 %s4395_s29, 4  ;;  %p4941_p3 = scmp.eq.s32.totalorder %s4452_s28, 0  ;;  %s262_s30 = int_to_ptr.vmem [resolvable:$true] %s261_s30 }
   0x4   : > { %p4456_p2 = pnand %p3590_p0, %p243_p1  ;;  %s4355_s13 = scalar_lea.hbm %s4939_s7, 31360 }
   0x5   : > { %p4356_p6 = scmp.ne.s32.totalorder %s4939_s7, %s4355_s13  ;;  %p4362_p10 = scmp.lt.u32.totalorder %s4355_s13, %s4939_s7 }
   0x6   : > { %s4943_s9 = scalar_select %p4456_p2, 1, 0 }
   0x7   : > { %p4262_p4 = pneg %p4456_p2 }
   0x9   : > { %p4465_p5 = pnand %p4941_p3, %p4262_p4 }
   0xb   : > { %p4357_p7 = pneg %p4465_p5 }
   0xd   : > { %p4358_p8 = pnand %p4357_p7, %p4356_p6 }
   0xf   : > { %p4359_p9 = pneg %p4358_p8 }
  0x11   : > { %p4364_p11 = pnand %p4362_p10, %p4359_p9 }
  0x13   : > { %4367 = shalt.err (!%p4364_p11)
}
  0x14   : > { %s4368_s18 = scalar_lea.vmem %s262_s30, 31360  ;;  %p4376_p1 = scmp.lt.s32.totalorder %s262_s30, %s262_s30 }
  0x15   : > { %p4369_p12 = scmp.ne.s32.totalorder %s262_s30, %s4368_s18  ;;  %p4377_p4 = scmp.lt.s32.totalorder %s4368_s18, %s4368_s18 }
  0x17   : > { %p4371_p13 = pnand %p4369_p12, %p4357_p7  ;;  %p4378_p3 = por %p4377_p4, %p4376_p1 }
  0x19   : > { %p4372_p0 = pneg %p4371_p13 }
  0x1b   : > { %p4379_p2 = pnand %p4378_p3, %p4372_p0 }
  0x1d   : > { %4382 = shalt.err (!%p4379_p2)
}
  0x1e   : > { %s4396_s19 = smov 128   ;;  %s4397_s20 = smov 8  }
  0x1f   : > { %4265 = dma.hbm_to_vmem [thread:$0]  (!%p4465_p5), %s4939_s7, 31360, %s262_s30, [#allocation3], %s4396_s19, %s4396_s19, %s4397_s20  }
  0x20   : > { %p4945_p6 = scmp.ne.s32.totalorder %s4943_s9, 0 }
  0x21   : > { %p4946_p8 = scmp.eq.s32.totalorder (!%p4945_p6), %s4452_s28, 0 }
  0x22   : > { %309 = sbr.rel (%p4945_p6) target bundleno = 12453 (0x30a5), region = 52 }
  0x29   : > { %4388 = dma.done.wait (%p4946_p8), [#allocation3], 31360   ;;  %p4947_p7 = pmov %p4946_p8 }
  0x2a   : > { %p354_p2 = scmp.lt.s32.totalorder %s4452_s28, 1  ;;  %v4398_v0 = vmov 0   ;;  %v4399_v1 = vmov 0.0   ;;  %v394_v3 = vld [vmem:[#allocation2] sm:$0xff]  ;;  %v395_v4 = vld [vmem:[#allocation2 + $0x8] sm:$0xff]  ;;  %v396_v5 = vld [vmem:[#allocation2 + $0x10] sm:$0xff]  ;;  %v376_v19 = vlaneseq }
  0x2b   : > { %4390 = vsyncadd (%p4947_p7), [#allocation3], 4294935936  ;;  %4282 = vset.pattern.permute.xlu0 %v4398_v0  ;;  %3862 = vmatprep.subr.bf16.mxu0 %v4399_v1  ;;  %v397_v6 = vld [vmem:[#allocation2 + $0x18] sm:$0xff]  ;;  %v404_v8 = vpack.c.bf16 %v395_v4, %v394_v3  ;;  %vm4400_vm0 = vmmov 0   ;;  %v398_v10 = vld [vmem:[#allocation2 + $0x20] sm:$0xff]  ;;  %vm413_vm1 = vcmask 1040384  }
  0x2c   : > { %s4949_s28 = smov (!%p354_p2, %s4452_s28), 1  ;;  %3894 = vmatprep.subr.bf16.mxu1 %v4399_v1  ;;  %v405_v9 = vpack.c.bf16 %v397_v6, %v396_v5  ;;  %3870 = vmatprep.mubr.msk.bf16.mxu0 %vm4400_vm0, %v4399_v1  ;;  %v399_v11 = vld [vmem:[#allocation2 + $0x28] sm:$0xff]  ;;  %v400_v12 = vld [vmem:[#allocation2 + $0x30] sm:$0x3]  ;;  %v605_v16 = vld [vmem:[#allocation2 + $0xe0] sm:$0xff]  ;;  %v4517_v20 = vand.u32 127, %v376_v19 }
  0x2d   : > { %s4498_s23 = sshll.u32 %s4949_s28, 3  ;;  %3863 = vmatpush3.bf16.msra.mxu0 %v404_v8  ;;  %3898 = vmatprep.mubr.msk.bf16.mxu1 %vm4400_vm0, %v4399_v1  ;;  %v406_v13 = vpack.c.bf16 %v399_v11, %v398_v10  ;;  %v407_v14 = vpack.c.bf16 %v400_v12, %v400_v12  ;;  %v606_v17 = vld [vmem:[#allocation2 + $0xe8] sm:$0xff]  ;;  %v461_v21 = vld [vmem:[#allocation2 + $0x38] sm:$0xff]  ;;  %v462_v22 = vld [vmem:[#allocation2 + $0x40] sm:$0xff]  ;;  %vm409_vm3 = vcmask 408576   ;;  %vm480_vm4 = vcmask 1045504   ;;  %s364_s12 = scalar_lea.vmem %s4936_s4, %s4949_s28 }
  0x2e   : > { %s357_s26 = scalar_lea.vmem %s4932_s0, %s4498_s23  ;;  %s361_s9 = scalar_lea.vmem %s4933_s1, %s4498_s23  ;;  %3864 = vmatprep.subr.bf16.mxu0 %v4399_v1  ;;  %v609_v18 = vpack.c.bf16 %v606_v17, %v605_v16  ;;  %v472_v25 = vpack.c.bf16 %v462_v22, %v461_v21  ;;  %v463_v27 = vld [vmem:[#allocation2 + $0x48] sm:$0xff]  ;;  %v464_v28 = vld [vmem:[#allocation2 + $0x50] sm:$0xff]  ;;  %v465_v30 = vld [vmem:[#allocation2 + $0x58] sm:$0xff]  ;;  %vm476_vm6 = vcmask 490496   ;;  %vm561_vm7 = vcmask 261120  }
  0x2f   : > { %v388_v2 = vld [vmem:[%s357_s26] sm:$0xff]  ;;  %v415_v15 = vsel %vm413_vm1, %v407_v14, 0  ;;  %v473_v29 = vpack.c.bf16 %v464_v28, %v463_v27  ;;  %v467_v32 = vld [vmem:[#allocation2 + $0x68] sm:$0xff]  ;;  %v468_v33 = vld [vmem:[#allocation2 + $0x70] sm:$0xf]  ;;  %vm383_vm8 = vcmp.ge.s32.totalorder %v4517_v20, 16  ;;  %s367_s17 = scalar_lea.vmem %s4937_s5, %s4949_s28  ;;  %s370_s22 = scalar_lea.vmem %s4938_s6, %s4949_s28 }
  0x30   : > { %391 = vperm.xlu0 %4282, %v388_v2   ;;  %v389_v7 = vld [vmem:[%s361_s9] sm:$0xff]  ;;  %3895 = vmatpush3.bf16.msra.mxu1 %v609_v18  ;;  %v475_v36 = vpack.c.bf16 %v468_v33, %v467_v32  ;;  %v549_v38 = vld [vmem:[#allocation2 + $0xb8] sm:$0xff]  ;;  %v551_v43 = vld [vmem:[#allocation2 + $0xc8] sm:$0xff]  ;;  %vm384_vm9 = vcmp.lt.s32.totalorder %v4517_v20, 32  ;;  %vm379_vm10 = vcmp.lt.s32.totalorder %v4517_v20, 16  ;;  %vm786_vm12 = vcmask 1043456   ;;  %s374_s25 = scalar_lea.vmem %s4940_s8, %s4498_s23 }
  0x31   : > { %3865 = vmatpush3.bf16.msra.mxu0 %v405_v9  ;;  %3896 = vmatprep.subr.bf16.mxu1 %v4399_v1  ;;  %v466_v31 = vld [vmem:[#allocation2 + $0x60] sm:$0xff]  ;;  %v552_v44 = vld [vmem:[#allocation2 + $0xd0] sm:$0xff]  ;;  %v608_v47 = vld [vmem:[#allocation2 + $0xf8] sm:$0xff]  ;;  %v4555_v17 = vsel %vm379_vm10, 1.0, %v4399_v1  ;;  %vm758_vm13 = vcmask 64512   ;;  %vm990_vm14 = vcmask 523264  }
  0x32   : > { %3866 = vmatprep.subr.bf16.mxu0 %v4399_v1  ;;  %v474_v35 = vpack.c.bf16 %v466_v31, %v465_v30  ;;  %v482_v37 = vsel %vm480_vm4, %v475_v36, 0  ;;  %v550_v39 = vld [vmem:[#allocation2 + $0xc0] sm:$0xff]  ;;  %v607_v45 = vld [vmem:[#allocation2 + $0xf0] sm:$0xff]  ;;  %v555_v46 = vpack.c.bf16 %v552_v44, %v551_v43  ;;  %v408_v49 = vld [vmem:[#allocation2 + $0x78] sm:$0xff] }
  0x33   : > { %v554_v41 = vpack.c.bf16 %v550_v39, %v549_v38  ;;  %v610_v48 = vpack.c.bf16 %v608_v47, %v607_v45  ;;  %v656_v50 = vld [vmem:[#allocation2 + $0x108] sm:$0xff]  ;;  %v657_v51 = vld [vmem:[#allocation2 + $0x110] sm:$0xff]  ;;  %v658_v59 = vld [vmem:[#allocation2 + $0x118] sm:$0xff] }
  0x34   : > { %458 = vperm.xlu0 %4282, %v389_v7   ;;  %v660_v56 = vpack.c.bf16 %v657_v51, %v656_v50  ;;  %v659_v60 = vld [vmem:[#allocation2 + $0x120] sm:$0xff]  ;;  %v3607_v5 = vld [vmem:[#allocation2 + $0xd8] ss:$0 sm:$0xff]  ;;  %vm385_vm11 = vmand %vm383_vm8, %vm384_vm9 }
  0x35   : > { %3867 = vmatpush3.bf16.msra.mxu0 %v406_v13  ;;  %3897 = vmatpush3.bf16.msra.mxu1 %v610_v48  ;;  %v661_v61 = vpack.c.bf16 %v659_v60, %v658_v59  ;;  %v3609_v4 = vld [vmem:[#allocation2 + $0x100] ss:$0 sm:$0xff]  ;;  %v4558_v18 = vsel %vm385_vm11, 1.0, %v4399_v1  ;;  %v834_v60 = vld [vmem:[#allocation2 + $0x130] sm:$0xff] }
  0x36   : > { %3868 = vmatprep.subr.bf16.mxu0 %v4399_v1  ;;  %3910 = vmatprep.subr.bf16.mxu1 %v4399_v1  ;;  %v524_v31 = vld [vmem:[%s4934_s2] sm:$0xff] }
  0x37   : > { %v3604_v32 = vld [vmem:[%s364_s12] ss:$0 sm:$0xff] }
  0x38   : > { %v4576_v33 = vadd.f32 %v3604_v32, %v524_v31  ;;  %v919_v31 = vld [vmem:[#allocation2 + $0x170] sm:$0xff] }
  0x39   : > { %3869 = vmatpush3.bf16.msra.mxu0 %v415_v15 }
  0x3a   : > { %3874 = vmatprep.subr.bf16.mxu0 %v4399_v1 }
  0xaf   : > { %v392_v23 = vpop.permute.xlu0 %391 }
  0xb0   : > { %vm393_vm2 = vcmp.eq.s32.totalorder %v4517_v20, %v392_v23 }
  0xb1   : > { %v3600_v24 = vsel %vm393_vm2, 1.0, %v4399_v1 }
  0xb2   : > { %v403_v26 = vpack.c.bf16 %v3600_v24, %v3600_v24 }
  0xb3   : > { %v459_v34 = vpop.permute.xlu0 %458 }
  0xb4   : > { %3871 = vmatmul.mubr.msk.bf16.vlgmr.msra.gmra.mrb[0].mxu0 %vm409_vm3, %v403_v26  ;;  %vm460_vm5 = vcmp.eq.s32.totalorder %v4517_v20, %v459_v34  ;;  %v3611_v20 = vld [vmem:[#allocation2 + $0x128] ss:$0 sm:$0xff] }
  0xb5   : > { %3875 = vmatpush3.bf16.msra.mxu0 %v472_v25  ;;  %3882 = vmatprep.mubr.msk.bf16.mxu0 %vm4400_vm0, %v4399_v1  ;;  %v3602_v40 = vsel %vm460_vm5, 1.0, %v4399_v1 }
  0xb6   : > { %3876 = vmatprep.subr.bf16.mxu0 %v4399_v1  ;;  %v471_v42 = vpack.c.bf16 %v3602_v40, %v3602_v40 }
  0xb9   : > { %3877 = vmatpush3.bf16.msra.mxu0 %v473_v29 }
  0xba   : > { %3878 = vmatprep.subr.bf16.mxu0 %v4399_v1 }
  0xbd   : > { %3879 = vmatpush3.bf16.msra.mxu0 %v474_v35 }
  0xbe   : > { %3880 = vmatprep.subr.bf16.mxu0 %v4399_v1 }
  0xc1   : > { %3881 = vmatpush3.bf16.msra.mxu0 %v482_v37 }
  0xc2   : > { %3886 = vmatprep.subr.bf16.mxu0 %v4399_v1 }
  0xc4   : > { %3883 = vmatmul.mubr.msk.bf16.vlgmr.msra.gmra.mrb[4].mxu0 %vm476_vm6, %v471_v42 }
  0xc5   : > { %3887 = vmatpush3.bf16.msra.mxu0 %v554_v41  ;;  %3890 = vmatprep.mubr.msk.bf16.mxu0 %vm4400_vm0, %v4399_v1 }
  0xc6   : > { %3888 = vmatprep.subr.bf16.mxu0 %v4399_v1 }
  0xc9   : > { %3889 = vmatpush3.bf16.msra.mxu0 %v555_v46 }
  0xca   : > { %3902 = vmatprep.subr.bf16.mxu0 %v4399_v1 }
 0x187   : > { %v451_v52 = vpop.f32.mrb[0].mxu0 }
 0x188   : > { %v4534_v53 = vadd.f32 %v451_v52, %v408_v49  ;;  %v3872_v54 = vpop.f32.mrb[1].mxu0 }
 0x189   : > { %v454_v55 = vpop.f32.mrb[2].mxu0 }
 0x18a   : > { %v553_v57 = vpack.c.bf16 %v4534_v53, %v4534_v53  ;;  %v3873_v58 = vpop.f32.mrb[3].mxu0 }
 0x18c   : > { %3891 = vmatmul.mubr.msk.bf16.vlgmr.msra.gmra.mrb[8].mxu0 %vm561_vm7, %v553_v57  ;;  %3899 = vmatmul.mubr.msk.bf16.vlgmr.msra.gmra.mrb[0].mxu1 %vm561_vm7, %v553_v57 }
 0x18d   : > { %3903 = vmatpush3.bf16.msra.mxu0 %v660_v56  ;;  %3906 = vmatprep.mubr.msk.bf16.mxu0 %vm4400_vm0, %v4399_v1 }
 0x18e   : > { %3904 = vmatprep.subr.bf16.mxu0 %v4399_v1  ;;  %3912 = vmatprep.mubr.msk.bf16.mxu1 %vm4400_vm0, %v4399_v1 }
 0x191   : > { %3905 = vmatpush3.bf16.msra.mxu0 %v661_v61  ;;  %v835_v61 = vld [vmem:[#allocation2 + $0x138] sm:$0xff] }
 0x192   : > { %3916 = vmatprep.subr.bf16.mxu0 %v4399_v1 }
 0x194   : > { %3907 = vmatmul.mubr.msk.bf16.vlgmr.msra.gmra.mrb[12].mxu0 %vm561_vm7, %v553_v57 }
 0x195   : > { %3918 = vmatprep.mubr.msk.bf16.mxu0 %vm4400_vm0, %v4399_v1 }
 0x197   : > { %v518_v62 = vpop.f32.mrb[4].mxu0 }
 0x198   : > { %v4549_v63 = vadd.f32 %v518_v62, %v408_v49  ;;  %v3884_v0 = vpop.f32.mrb[5].mxu0  ;;  %v839_v62 = vpack.c.bf16 %v835_v61, %v834_v60 }
 0x199   : > { %v521_v2 = vpop.f32.mrb[6].mxu0  ;;  %v836_v0 = vld [vmem:[#allocation2 + $0x140] sm:$0xff] }
 0x19a   : > { %v3885_v3 = vpop.f32.mrb[7].mxu0  ;;  %v837_v2 = vld [vmem:[#allocation2 + $0x148] sm:$0xff] }
 0x19b   : > { %v840_v3 = vpack.c.bf16 %v837_v2, %v836_v0  ;;  %v3621_v2 = vld [vmem:[#allocation2 + $0x1c0] ss:$0 sm:$0xff] }
 0x25f   : > { %v599_v6 = vpop.f32.mrb[8].mxu0  ;;  %v650_v7 = vpop.f32.mrb[0].mxu1 }
 0x260   : > { %v651_v8 = vadd.f32 %v3609_v4, %v650_v7  ;;  %v3892_v9 = vpop.f32.mrb[9].mxu0  ;;  %v3900_v10 = vpop.f32.mrb[1].mxu1  ;;  %v600_v13 = vadd.f32 %v3607_v5, %v599_v6 }
 0x261   : > { %v602_v11 = vpop.f32.mrb[10].mxu0  ;;  %v653_v12 = vpop.f32.mrb[2].mxu1 }
 0x262   : > { %v710_v14 = vpack.c.bf16 %v651_v8, %v651_v8  ;;  %v3893_v15 = vpop.f32.mrb[11].mxu0  ;;  %v3901_v16 = vpop.f32.mrb[3].mxu1  ;;  %v707_v21 = vmul.f32 %v4555_v17, %v600_v13  ;;  %v708_v22 = vmul.f32 %v4558_v18, %v600_v13  ;;  %v3615_v12 = vld [vmem:[#allocation2 + $0x150] ss:$0 sm:$0xff] }
 0x264   : > { %v715_v19 = vsel %vm561_vm7, %v710_v14, 0  ;;  %v709_v27 = vpack.c.bf16 %v708_v22, %v707_v21 }
 0x265   : > { %3911 = vmatpush3.bf16.xpose.msra.mxu1 %v715_v19 }
 0x266   : > { %3922 = vmatprep.subr.bf16.mxu1 %v4399_v1 }
 0x267   : > { %v701_v23 = vpop.f32.mrb[12].mxu0 }
 0x268   : > { %v702_v24 = vadd.f32 %v3611_v20, %v701_v23  ;;  %v3908_v25 = vpop.f32.mrb[13].mxu0 }
 0x269   : > { %v704_v26 = vpop.f32.mrb[14].mxu0 }
 0x26a   : > { %v782_v28 = vpack.c.bf16 %v702_v24, %v702_v24  ;;  %v3909_v29 = vpop.f32.mrb[15].mxu0 }
 0x26c   : > { %v788_v30 = vsel %vm786_vm12, %v782_v28, 0  ;;  %3913 = vmatmul.mubr.msk.bf16.vlgmr.msra.gmra.mrb[4].mxu1 %vm561_vm7, %v709_v27  ;;  %v916_v27 = vld [vmem:[#allocation2 + $0x158] sm:$0xff]  ;;  %v917_v28 = vld [vmem:[#allocation2 + $0x160] sm:$0xff] }
 0x26d   : > { %3917 = vmatpush3.bf16.msra.mxu0 %v788_v30  ;;  %3926 = vmatprep.mubr.msk.bf16.mxu1 %vm4400_vm0, %v4399_v1  ;;  %v921_v29 = vpack.c.bf16 %v917_v28, %v916_v27  ;;  %v918_v30 = vld [vmem:[#allocation2 + $0x168] sm:$0xff]  ;;  %v1169_v27 = vld [vmem:[#allocation2 + $0x250] sm:$0xff] }
 0x26e   : > { %3930 = vmatprep.subr.bf16.mxu0 %v4399_v1  ;;  %3923 = vmatpush3.bf16.msra.mxu1 %v839_v62  ;;  %v922_v32 = vpack.c.bf16 %v919_v31, %v918_v30 }
 0x26f   : > { %3924 = vmatprep.subr.bf16.mxu1 %v4399_v1 }
 0x272   : > { %3925 = vmatpush3.bf16.msra.mxu1 %v840_v3 }
 0x273   : > { %3938 = vmatprep.subr.bf16.mxu1 %v4399_v1 }
 0x33f   : > { %v751_v34 = vpop.f32.mrb[4].mxu1 }
 0x340   : > { %v752_v35 = vadd.f32 %v751_v34, %v4576_v33  ;;  %v3914_v36 = vpop.f32.mrb[5].mxu1  ;;  %v973_v34 = vld [vmem:[#allocation2 + $0x188] sm:$0xff] }
 0x341   : > { %v754_v37 = vpop.f32.mrb[6].mxu1 }
 0x342   : > { %v755_v38 = vadd.f32 %v754_v37, %v4576_v33  ;;  %v3915_v39 = vpop.f32.mrb[7].mxu1  ;;  %v759_v40 = vsel %vm758_vm13, %v752_v35, -inf  ;;  %v975_v37 = vld [vmem:[#allocation2 + $0x198] sm:$0xff] }
 0x343   : > { %760 = vmax.xlane.f32.xlu1 %v759_v40 }
 0x344   : > { %v762_v41 = vsel %vm758_vm13, %v755_v38, -inf }
 0x347   : > { %763 = vmax.xlane.f32.xlu1 %v762_v41 }
 0x3d0   : > { %v761_v42 = vpop.xlane.xlu1 %760 }
 0x3d1   : > { %v765_v43 = vsub.f32 %v752_v35, %v761_v42  ;;  %v974_v35 = vld [vmem:[#allocation2 + $0x190] sm:$0xff] }
 0x3d3   : > { %v767_v44 = vmul.f32 1.442695, %v765_v43  ;;  %v3617_v43 = vld [vmem:[#allocation2 + $0x1c8] ss:$0 sm:$0xff] }
 0x3d4   : > { %v764_v45 = vpop.xlane.xlu1 %763 }
 0x3d5   : > { %4283 = vpow2.f32 %v767_v44  ;;  %v766_v46 = vsub.f32 %v755_v38, %v764_v45  ;;  %v982_v38 = vpack.c.bf16 %v975_v37, %v974_v35  ;;  %v3618_v45 = vld [vmem:[#allocation2 + $0x1d0] ss:$0 sm:$0xff]  ;;  %v3624_v35 = vld [vmem:[#allocation2 + $0x1e0] ss:$0 sm:$0xff] }
 0x3d6   : > { %v1115_v37 = vld [vmem:[#allocation2 + $0x210] sm:$0xff] }
 0x3d7   : > { %v769_v47 = vmul.f32 1.442695, %v766_v46 }
 0x3d9   : > { %4285 = vpow2.f32 %v769_v47 }
 0x3df   : > { %v4284_v48 = vpop.eup %4283 }
 0x3e0   : > { %v771_v49 = vsel %vm758_vm13, %v4284_v48, 0.0 }
 0x3e1   : > { %772 = vadd.xlane.f32.xlu0 %v771_v49  ;;  %v976_v49 = vld [vmem:[#allocation2 + $0x1a0] sm:$0xff] }
 0x3e3   : > { %v4286_v50 = vpop.eup %4285 }
 0x3e4   : > { %v774_v51 = vsel %vm758_vm13, %v4286_v50, 0.0 }
 0x3e5   : > { %775 = vadd.xlane.f32.xlu1 %v774_v51 }
 0x46e   : > { %v773_v52 = vpop.xlane.xlu0 %772 }
 0x46f   : > { %4287 = vrcp.f32 %v773_v52  ;;  %v978_v52 = vld [vmem:[#allocation2 + $0x1b0] sm:$0xff] }
 0x472   : > { %v776_v54 = vpop.xlane.xlu1 %775 }
 0x473   : > { %4289 = vrcp.f32 %v776_v54  ;;  %v979_v54 = vld [vmem:[#allocation2 + $0x1b8] sm:$0xff] }
 0x479   : > { %v4288_v55 = vpop.eup %4287 }
 0x47a   : > { %v779_v57 = vmul.f32 %v4288_v55, %v4284_v48  ;;  %v984_v55 = vpack.c.bf16 %v979_v54, %v978_v52 }
 0x47d   : > { %v4290_v56 = vpop.eup %4289 }
 0x47e   : > { %v780_v58 = vmul.f32 %v4290_v56, %v4286_v50  ;;  %v977_v50 = vld [vmem:[#allocation2 + $0x1a8] sm:$0xff]  ;;  %v3619_v56 = vld [vmem:[#allocation2 + $0x178] ss:$0 sm:$0xff] }
 0x47f   : > { %v983_v51 = vpack.c.bf16 %v977_v50, %v976_v49 }
 0x480   : > { %v781_v59 = vpack.c.bf16 %v780_v58, %v779_v57 }
 0x482   : > { %3919 = vmatmul.mubr.msk.bf16.vlgmr.msra.gmra.mrb[16].mxu0 %vm758_vm13, %v781_v59 }
 0x483   : > { %3934 = vmatprep.mubr.msk.bf16.mxu0 %vm4400_vm0, %v4399_v1  ;;  %3931 = vmatpush3.bf16.msra.mxu0 %v921_v29 }
 0x484   : > { %3932 = vmatprep.subr.bf16.mxu0 %v4399_v1 }
 0x487   : > { %3933 = vmatpush3.bf16.msra.mxu0 %v922_v32 }
 0x488   : > { %3950 = vmatprep.subr.bf16.mxu0 %v4399_v1 }
 0x555   : > { %v824_v4 = vpop.f32.mrb[16].mxu0 }
 0x556   : > { %v3920_v5 = vpop.f32.mrb[17].mxu0  ;;  %v831_v7 = vmul.f32 %v4555_v17, %v824_v4 }
 0x557   : > { %v827_v6 = vpop.f32.mrb[18].mxu0 }
 0x558   : > { %v832_v8 = vmul.f32 %v4558_v18, %v827_v6  ;;  %v3921_v9 = vpop.f32.mrb[19].mxu0 }
 0x55a   : > { %v833_v10 = vadd.f32 %v832_v8, %v831_v7 }
 0x55c   : > { %v838_v11 = vpack.c.bf16 %v833_v10, %v833_v10 }
 0x55e   : > { %3927 = vmatmul.mubr.msk.bf16.vlgmr.msra.gmra.mrb[8].mxu1 %vm561_vm7, %v838_v11 }
 0x55f   : > { %3946 = vmatprep.mubr.msk.bf16.mxu1 %vm4400_vm0, %v4399_v1 }
 0x631   : > { %v883_v13 = vpop.f32.mrb[8].mxu1 }
 0x632   : > { %v884_v14 = vadd.f32 %v3615_v12, %v883_v13  ;;  %v3928_v15 = vpop.f32.mrb[9].mxu1 }
 0x633   : > { %v886_v16 = vpop.f32.mrb[10].mxu1  ;;  %v1060_v15 = vld [vmem:[#allocation2 + $0x1e8] sm:$0xff] }
 0x634   : > { %v3929_v19 = vpop.f32.mrb[11].mxu1  ;;  %v889_v20 = vadd.f32 %v884_v14, %v4534_v53  ;;  %v972_v53 = vld [vmem:[#allocation2 + $0x180] sm:$0xff]  ;;  %v1061_v16 = vld [vmem:[#allocation2 + $0x1f0] sm:$0xff] }
 0x635   : > { %v981_v36 = vpack.c.bf16 %v973_v34, %v972_v53  ;;  %v1166_v19 = vld [vmem:[#allocation2 + $0x238] sm:$0xff] }
 0x636   : > { %v892_v21 = vsel %vm561_vm7, %v889_v20, 0.0  ;;  %v3623_v53 = vld [vmem:[#allocation2 + $0x1d8] ss:$0 sm:$0xff] }
 0x637   : > { %893 = vadd.xlane.f32.xlu1 %v892_v21  ;;  %3939 = vmatpush3.bf16.msra.mxu1 %v981_v36  ;;  %v1167_v21 = vld [vmem:[#allocation2 + $0x240] sm:$0xff] }
 0x638   : > { %3940 = vmatprep.subr.bf16.mxu1 %v4399_v1 }
 0x63b   : > { %3941 = vmatpush3.bf16.msra.mxu1 %v982_v38  ;;  %v1116_v38 = vld [vmem:[#allocation2 + $0x218] sm:$0xff] }
 0x63c   : > { %3942 = vmatprep.subr.bf16.mxu1 %v4399_v1 }
 0x63f   : > { %3943 = vmatpush3.bf16.msra.mxu1 %v983_v51 }
 0x640   : > { %3944 = vmatprep.subr.bf16.mxu1 %v4399_v1 }
 0x643   : > { %3945 = vmatpush3.bf16.msra.mxu1 %v984_v55 }
 0x644   : > { %3966 = vmatprep.subr.bf16.mxu1 %v4399_v1 }
 0x6c4   : > { %v894_v22 = vpop.xlane.xlu1 %893 }
 0x6c5   : > { %v896_v23 = vmul.f32 0.03125, %v894_v22  ;;  %v1170_v22 = vpack.c.bf16 %v1167_v21, %v1166_v19 }
 0x6c7   : > { %v897_v24 = vsub.f32 %v889_v20, %v896_v23  ;;  %v1065_v20 = vpack.c.bf16 %v1061_v16, %v1060_v15  ;;  %v1062_v23 = vld [vmem:[#allocation2 + $0x1f8] sm:$0xff] }
 0x6c9   : > { %v898_v25 = vmul.f32 %v897_v24, %v897_v24 }
 0x6cb   : > { %v899_v26 = vsel %vm561_vm7, %v898_v25, 0.0  ;;  %v1168_v25 = vld [vmem:[#allocation2 + $0x248] sm:$0xff] }
 0x6cc   : > { %900 = vadd.xlane.f32.xlu1 %v899_v26  ;;  %v1171_v28 = vpack.c.bf16 %v1169_v27, %v1168_v25 }
 0x759   : > { %v901_v39 = vpop.xlane.xlu1 %900 }
 0x75a   : > { %v902_v40 = vmul.f32 0.03125, %v901_v39 }
 0x75c   : > { %v903_v41 = vadd.f32 1e-05, %v902_v40  ;;  %v1119_v40 = vpack.c.bf16 %v1116_v38, %v1115_v37  ;;  %v1344_v38 = vld [vmem:[#allocation2 + $0x270] sm:$0xff] }
 0x75e   : > { %4291 = vrsqrt.f32 %v903_v41 }
 0x768   : > { %v4292_v42 = vpop.eup %4291 }
 0x769   : > { %v905_v44 = vmul.f32 %v4292_v42, %v897_v24  ;;  %v1063_v24 = vld [vmem:[#allocation2 + $0x200] sm:$0xff] }
 0x76a   : > { %v1066_v26 = vpack.c.bf16 %v1063_v24, %v1062_v23  ;;  %v1117_v42 = vld [vmem:[#allocation2 + $0x220] sm:$0xff] }
 0x76b   : > { %v910_v46 = vmul.f32 %v3617_v43, %v905_v44  ;;  %v1118_v43 = vld [vmem:[#allocation2 + $0x228] sm:$0xff] }
 0x76c   : > { %v1120_v44 = vpack.c.bf16 %v1118_v43, %v1117_v42 }
 0x76d   : > { %v915_v47 = vadd.f32 %v3618_v45, %v910_v46  ;;  %v3629_v45 = vld [vmem:[#allocation2 + $0x258] ss:$0 sm:$0xff] }
 0x76f   : > { %v920_v48 = vpack.c.bf16 %v915_v47, %v915_v47 }
 0x771   : > { %3935 = vmatmul.mubr.msk.bf16.vlgmr.msra.gmra.mrb[20].mxu0 %vm561_vm7, %v920_v48 }
 0x772   : > { %3954 = vmatprep.mubr.msk.bf16.mxu0 %vm4400_vm0, %v4399_v1  ;;  %3951 = vmatpush3.bf16.msra.mxu0 %v1065_v20 }
 0x773   : > { %3952 = vmatprep.subr.bf16.mxu0 %v4399_v1 }
 0x776   : > { %3953 = vmatpush3.bf16.msra.mxu0 %v1066_v26 }
 0x777   : > { %3958 = vmatprep.subr.bf16.mxu0 %v4399_v1 }
 0x844   : > { %v965_v57 = vpop.f32.mrb[20].mxu0 }
 0x845   : > { %v966_v58 = vadd.f32 %v3619_v56, %v965_v57  ;;  %v3936_v59 = vpop.f32.mrb[21].mxu0 }
 0x846   : > { %v968_v60 = vpop.f32.mrb[22].mxu0  ;;  %v3625_v59 = vld [vmem:[#allocation2 + $0x208] ss:$0 sm:$0xff] }
 0x847   : > { %v971_v61 = vmax.f32 %v966_v58, 0.0  ;;  %v3937_v62 = vpop.f32.mrb[23].mxu0  ;;  %v3627_v58 = vld [vmem:[#allocation2 + $0x230] ss:$0 sm:$0xff] }
 0x849   : > { %v980_v0 = vpack.c.bf16 %v971_v61, %v971_v61 }
 0x84b   : > { %3947 = vmatmul.mubr.msk.bf16.vlgmr.msra.gmra.mrb[12].mxu1 %vm990_vm14, %v980_v0 }
 0x84c   : > { %3970 = vmatprep.mubr.msk.bf16.mxu1 %vm4400_vm0, %v4399_v1  ;;  %3967 = vmatpush3.bf16.msra.mxu1 %v1170_v22 }
 0x84d   : > { %3968 = vmatprep.subr.bf16.mxu1 %v4399_v1 }
 0x850   : > { %3969 = vmatpush3.bf16.msra.mxu1 %v1171_v28 }
 0x851   : > { %3980 = vmatprep.subr.bf16.mxu1 %v4399_v1 }
 0x91e   : > { %v1028_v3 = vpop.f32.mrb[12].mxu1 }
 0x91f   : > { %v1029_v4 = vadd.f32 %v3621_v2, %v1028_v3  ;;  %v3948_v5 = vpop.f32.mrb[13].mxu1 }
 0x920   : > { %v1031_v6 = vpop.f32.mrb[14].mxu1 }
 0x921   : > { %v3949_v7 = vpop.f32.mrb[15].mxu1  ;;  %v1034_v8 = vadd.f32 %v1029_v4, %v915_v47 }
 0x923   : > { %v1037_v9 = vsel %vm561_vm7, %v1034_v8, 0.0 }
 0x924   : > { %1038 = vadd.xlane.f32.xlu1 %v1037_v9 }
 0x9b1   : > { %v1039_v10 = vpop.xlane.xlu1 %1038 }
 0x9b2   : > { %v1040_v11 = vmul.f32 0.03125, %v1039_v10 }
 0x9b4   : > { %v1041_v12 = vsub.f32 %v1034_v8, %v1040_v11 }
 0x9b6   : > { %v1042_v13 = vmul.f32 %v1041_v12, %v1041_v12 }
 0x9b8   : > { %v1043_v14 = vsel %vm561_vm7, %v1042_v13, 0.0 }
 0x9b9   : > { %1044 = vadd.xlane.f32.xlu1 %v1043_v14 }
 0xa46   : > { %v1045_v29 = vpop.xlane.xlu1 %1044 }
 0xa47   : > { %v1046_v30 = vmul.f32 0.03125, %v1045_v29 }
 0xa49   : > { %v1047_v31 = vadd.f32 1e-05, %v1046_v30 }
 0xa4b   : > { %4293 = vrsqrt.f32 %v1047_v31 }
 0xa55   : > { %v4294_v32 = vpop.eup %4293 }
 0xa56   : > { %v1049_v34 = vmul.f32 %v4294_v32, %v1041_v12 }
 0xa58   : > { %v1054_v36 = vmul.f32 %v3623_v53, %v1049_v34 }
 0xa5a   : > { %v4615_v39 = vadd.f32 %v3624_v35, %v1054_v36  ;;  %v1342_v35 = vld [vmem:[#allocation2 + $0x260] sm:$0xff]  ;;  %v1343_v36 = vld [vmem:[#allocation2 + $0x268] sm:$0xff] }
 0xa5b   : > { %v1347_v37 = vpack.c.bf16 %v1343_v36, %v1342_v35  ;;  %v1649_v35 = vld [vmem:[#allocation2 + $0x358] sm:$0xff] }
 0xa5c   : > { %v1064_v41 = vpack.c.bf16 %v4615_v39, %v4615_v39 }
 0xa5e   : > { %3955 = vmatmul.mubr.msk.bf16.vlgmr.msra.gmra.mrb[24].mxu0 %vm561_vm7, %v1064_v41  ;;  %3971 = vmatmul.mubr.msk.bf16.vlgmr.msra.gmra.mrb[16].mxu1 %vm561_vm7, %v1064_v41 }
 0xa5f   : > { %3959 = vmatpush3.bf16.msra.mxu0 %v1119_v40  ;;  %3962 = vmatprep.mubr.msk.bf16.mxu0 %vm4400_vm0, %v4399_v1  ;;  %v1345_v40 = vld [vmem:[#allocation2 + $0x278] sm:$0xff] }
 0xa60   : > { %3960 = vmatprep.subr.bf16.mxu0 %v4399_v1  ;;  %3982 = vmatprep.mubr.msk.bf16.mxu1 %vm4400_vm0, %v4399_v1 }
 0xa63   : > { %3961 = vmatpush3.bf16.msra.mxu0 %v1120_v44 }
 0xa64   : > { %3974 = vmatprep.subr.bf16.mxu0 %v4399_v1 }
 0xa66   : > { %3963 = vmatmul.mubr.msk.bf16.vlgmr.msra.gmra.mrb[28].mxu0 %vm561_vm7, %v1064_v41  ;;  %v1348_v41 = vpack.c.bf16 %v1345_v40, %v1344_v38  ;;  %v1484_v38 = vld [vmem:[#allocation2 + $0x2d8] sm:$0xff] }
 0xa67   : > { %3976 = vmatprep.mubr.msk.bf16.mxu0 %vm4400_vm0, %v4399_v1 }
 0xb31   : > { %v1109_v46 = vpop.f32.mrb[24].mxu0  ;;  %v1211_v47 = vpop.f32.mrb[16].mxu1 }
 0xb32   : > { %v1212_v48 = vadd.f32 %v3629_v45, %v1211_v47  ;;  %v3956_v49 = vpop.f32.mrb[25].mxu0  ;;  %v3972_v50 = vpop.f32.mrb[17].mxu1  ;;  %v1110_v2 = vadd.f32 %v3625_v59, %v1109_v46 }
 0xb33   : > { %v1112_v51 = vpop.f32.mrb[26].mxu0  ;;  %v1214_v52 = vpop.f32.mrb[18].mxu1  ;;  %v3633_v50 = vld [vmem:[#allocation2 + $0x280] ss:$0 sm:$0xff] }
 0xb34   : > { %v1291_v54 = vpack.c.bf16 %v1212_v48, %v1212_v48  ;;  %v3957_v55 = vpop.f32.mrb[27].mxu0  ;;  %v3973_v56 = vpop.f32.mrb[19].mxu1  ;;  %v1217_v6 = vmul.f32 %v4555_v17, %v1110_v2  ;;  %v1218_v7 = vmul.f32 %v4558_v18, %v1110_v2  ;;  %v1423_v2 = vld [vmem:[#allocation2 + $0x288] sm:$0xff] }
 0xb36   : > { %v1296_v57 = vsel %vm786_vm12, %v1291_v54, 0  ;;  %v1219_v8 = vpack.c.bf16 %v1218_v7, %v1217_v6  ;;  %v1426_v6 = vld [vmem:[#allocation2 + $0x2a0] sm:$0xff] }
 0xb37   : > { %3981 = vmatpush3.bf16.msra.mxu1 %v1296_v57 }
 0xb38   : > { %3994 = vmatprep.subr.bf16.mxu1 %v4399_v1 }
 0xb39   : > { %v1160_v60 = vpop.f32.mrb[28].mxu0 }
 0xb3a   : > { %v1161_v61 = vadd.f32 %v3627_v58, %v1160_v60  ;;  %v3964_v62 = vpop.f32.mrb[29].mxu0 }
 0xb3b   : > { %v1163_v0 = vpop.f32.mrb[30].mxu0 }
 0xb3c   : > { %v1220_v3 = vpack.c.bf16 %v1161_v61, %v1161_v61  ;;  %v3965_v4 = vpop.f32.mrb[31].mxu0 }
 0xb3e   : > { %v1225_v5 = vsel %vm561_vm7, %v1220_v3, 0  ;;  %v1424_v3 = vld [vmem:[#allocation2 + $0x290] sm:$0xff] }
 0xb3f   : > { %3975 = vmatpush3.bf16.xpose.msra.mxu0 %v1225_v5  ;;  %v1428_v4 = vpack.c.bf16 %v1424_v3, %v1423_v2  ;;  %v1425_v5 = vld [vmem:[#allocation2 + $0x298] sm:$0xff] }
 0xb40   : > { %3986 = vmatprep.subr.bf16.mxu0 %v4399_v1  ;;  %v1429_v7 = vpack.c.bf16 %v1426_v6, %v1425_v5  ;;  %v3645_v2 = vld [vmem:[#allocation2 + $0x338] ss:$0 sm:$0xff] }
 0xb46   : > { %3977 = vmatmul.mubr.msk.bf16.vlgmr.msra.gmra.mrb[32].mxu0 %vm561_vm7, %v1219_v8  ;;  %v1480_v8 = vld [vmem:[#allocation2 + $0x2b8] sm:$0xff] }
 0xb47   : > { %3990 = vmatprep.mubr.msk.bf16.mxu0 %vm4400_vm0, %v4399_v1  ;;  %3987 = vmatpush3.bf16.msra.mxu0 %v1347_v37  ;;  %v1483_v37 = vld [vmem:[#allocation2 + $0x2d0] sm:$0xff] }
 0xb48   : > { %3988 = vmatprep.subr.bf16.mxu0 %v4399_v1  ;;  %v1490_v40 = vpack.c.bf16 %v1484_v38, %v1483_v37 }
 0xb4b   : > { %3989 = vmatpush3.bf16.msra.mxu0 %v1348_v41  ;;  %v1485_v41 = vld [vmem:[#allocation2 + $0x2e0] sm:$0xff] }
 0xb4c   : > { %4002 = vmatprep.subr.bf16.mxu0 %v4399_v1 }
 0xc19   : > { %v1261_v9 = vpop.f32.mrb[32].mxu0 }
 0xc1a   : > { %v1262_v10 = vadd.f32 %v1261_v9, %v4576_v33  ;;  %v3978_v11 = vpop.f32.mrb[33].mxu0  ;;  %v1481_v9 = vld [vmem:[#allocation2 + $0x2c0] sm:$0xff] }
 0xc1b   : > { %v1264_v12 = vpop.f32.mrb[34].mxu0  ;;  %v1482_v11 = vld [vmem:[#allocation2 + $0x2c8] sm:$0xff] }
 0xc1c   : > { %v1265_v13 = vadd.f32 %v1264_v12, %v4576_v33  ;;  %v3979_v14 = vpop.f32.mrb[35].mxu0  ;;  %v1268_v15 = vsel %vm758_vm13, %v1262_v10, -inf  ;;  %v1489_v12 = vpack.c.bf16 %v1482_v11, %v1481_v9 }
 0xc1d   : > { %1269 = vmax.xlane.f32.xlu1 %v1268_v15 }
 0xc1e   : > { %v1271_v16 = vsel %vm758_vm13, %v1265_v13, -inf }
 0xc21   : > { %1272 = vmax.xlane.f32.xlu1 %v1271_v16 }
 0xcaa   : > { %v1270_v19 = vpop.xlane.xlu1 %1269 }
 0xcab   : > { %v1274_v20 = vsub.f32 %v1262_v10, %v1270_v19  ;;  %v3635_v19 = vld [vmem:[#allocation2 + $0x2f8] ss:$0 sm:$0xff] }
 0xcad   : > { %v1276_v21 = vmul.f32 1.442695, %v1274_v20 }
 0xcae   : > { %v1273_v22 = vpop.xlane.xlu1 %1272 }
 0xcaf   : > { %4295 = vpow2.f32 %v1276_v21  ;;  %v1275_v23 = vsub.f32 %v1265_v13, %v1273_v22  ;;  %v3636_v21 = vld [vmem:[#allocation2 + $0x300] ss:$0 sm:$0xff] }
 0xcb1   : > { %v1278_v24 = vmul.f32 1.442695, %v1275_v23  ;;  %v1591_v23 = vld [vmem:[#allocation2 + $0x318] sm:$0xff] }
 0xcb3   : > { %4297 = vpow2.f32 %v1278_v24  ;;  %v1592_v24 = vld [vmem:[#allocation2 + $0x320] sm:$0xff] }
 0xcb9   : > { %v4296_v25 = vpop.eup %4295 }
 0xcba   : > { %v1280_v26 = vsel %vm758_vm13, %v4296_v25, 0.0 }
 0xcbb   : > { %1281 = vadd.xlane.f32.xlu1 %v1280_v26  ;;  %v1596_v26 = vpack.c.bf16 %v1592_v24, %v1591_v23 }
 0xcbd   : > { %v4298_v33 = vpop.eup %4297 }
 0xcbe   : > { %v1283_v27 = vsel %vm758_vm13, %v4298_v33, 0.0 }
 0xcbf   : > { %1284 = vadd.xlane.f32.xlu0 %v1283_v27  ;;  %v1593_v27 = vld [vmem:[#allocation2 + $0x328] sm:$0xff] }
 0xd48   : > { %v1282_v28 = vpop.xlane.xlu1 %1281 }
 0xd49   : > { %4299 = vrcp.f32 %v1282_v28  ;;  %v1594_v28 = vld [vmem:[#allocation2 + $0x330] sm:$0xff] }
 0xd4c   : > { %v1285_v29 = vpop.xlane.xlu0 %1284 }
 0xd4d   : > { %4301 = vrcp.f32 %v1285_v29  ;;  %v1597_v29 = vpack.c.bf16 %v1594_v28, %v1593_v27  ;;  %v533_v27 = vld [vmem:[%s4935_s3] sm:$0xff] }
 0xd4e   : > { %v3605_v28 = vld [vmem:[%s367_s17] ss:$0 sm:$0xff] }
 0xd53   : > { %v4300_v30 = vpop.eup %4299 }
 0xd54   : > { %v1288_v32 = vmul.f32 %v4300_v30, %v4296_v25  ;;  %v1646_v30 = vld [vmem:[#allocation2 + $0x340] sm:$0xff] }
 0xd57   : > { %v4302_v31 = vpop.eup %4301 }
 0xd58   : > { %v1289_v53 = vmul.f32 %v4302_v31, %v4298_v33  ;;  %v1647_v31 = vld [vmem:[#allocation2 + $0x348] sm:$0xff] }
 0xd5a   : > { %v1290_v34 = vpack.c.bf16 %v1289_v53, %v1288_v32  ;;  %v1650_v32 = vpack.c.bf16 %v1647_v31, %v1646_v30  ;;  %v1595_v53 = vpack.c.bf16 %v4549_v63, %v4549_v63 }
 0xd5c   : > { %3983 = vmatmul.mubr.msk.bf16.vlgmr.msra.gmra.mrb[20].mxu1 %vm758_vm13, %v1290_v34  ;;  %v1648_v34 = vld [vmem:[#allocation2 + $0x350] sm:$0xff] }
 0xd5d   : > { %3998 = vmatprep.mubr.msk.bf16.mxu1 %vm4400_vm0, %v4399_v1  ;;  %3995 = vmatpush3.bf16.msra.mxu1 %v1428_v4  ;;  %v1651_v36 = vpack.c.bf16 %v1649_v35, %v1648_v34 }
 0xd5e   : > { %3996 = vmatprep.subr.bf16.mxu1 %v4399_v1 }
 0xd61   : > { %3997 = vmatpush3.bf16.msra.mxu1 %v1429_v7 }
 0xd62   : > { %4014 = vmatprep.subr.bf16.mxu1 %v4399_v1 }
 0xe2f   : > { %v1332_v42 = vpop.f32.mrb[20].mxu1 }
 0xe30   : > { %v3984_v43 = vpop.f32.mrb[21].mxu1  ;;  %v1339_v45 = vmul.f32 %v4555_v17, %v1332_v42  ;;  %v1486_v42 = vld [vmem:[#allocation2 + $0x2e8] sm:$0xff] }
 0xe31   : > { %v1335_v44 = vpop.f32.mrb[22].mxu1  ;;  %v1491_v43 = vpack.c.bf16 %v1486_v42, %v1485_v41 }
 0xe32   : > { %v1340_v46 = vmul.f32 %v4558_v18, %v1335_v44  ;;  %v3985_v47 = vpop.f32.mrb[23].mxu1  ;;  %v3637_v44 = vld [vmem:[#allocation2 + $0x2a8] ss:$0 sm:$0xff] }
 0xe34   : > { %v1341_v48 = vadd.f32 %v1340_v46, %v1339_v45 }
 0xe36   : > { %v1346_v49 = vpack.c.bf16 %v1341_v48, %v1341_v48  ;;  %v1697_v48 = vld [vmem:[#allocation2 + $0x368] sm:$0xff] }
 0xe38   : > { %3991 = vmatmul.mubr.msk.bf16.vlgmr.msra.gmra.mrb[36].mxu0 %vm561_vm7, %v1346_v49  ;;  %v1698_v49 = vld [vmem:[#allocation2 + $0x370] sm:$0xff] }
 0xe39   : > { %4010 = vmatprep.mubr.msk.bf16.mxu0 %vm4400_vm0, %v4399_v1 }
 0xf0b   : > { %v1391_v51 = vpop.f32.mrb[36].mxu0 }
 0xf0c   : > { %v1392_v52 = vadd.f32 %v3633_v50, %v1391_v51  ;;  %v3992_v54 = vpop.f32.mrb[37].mxu0 }
 0xf0d   : > { %v1394_v55 = vpop.f32.mrb[38].mxu0  ;;  %v1701_v54 = vpack.c.bf16 %v1698_v49, %v1697_v48 }
 0xf0e   : > { %v3993_v56 = vpop.f32.mrb[39].mxu0  ;;  %v1397_v57 = vadd.f32 %v1392_v52, %v4615_v39  ;;  %v1479_v39 = vld [vmem:[#allocation2 + $0x2b0] sm:$0xff] }
 0xf0f   : > { %v1488_v10 = vpack.c.bf16 %v1480_v8, %v1479_v39  ;;  %v1699_v56 = vld [vmem:[#allocation2 + $0x378] sm:$0xff] }
 0xf10   : > { %v1400_v58 = vsel %vm561_vm7, %v1397_v57, 0.0 }
 0xf11   : > { %1401 = vadd.xlane.f32.xlu1 %v1400_v58  ;;  %4003 = vmatpush3.bf16.msra.mxu0 %v1488_v10 }
 0xf12   : > { %4004 = vmatprep.subr.bf16.mxu0 %v4399_v1 }
 0xf15   : > { %4005 = vmatpush3.bf16.msra.mxu0 %v1489_v12 }
 0xf16   : > { %4006 = vmatprep.subr.bf16.mxu0 %v4399_v1 }
 0xf19   : > { %4007 = vmatpush3.bf16.msra.mxu0 %v1490_v40 }
 0xf1a   : > { %4008 = vmatprep.subr.bf16.mxu0 %v4399_v1 }
 0xf1d   : > { %4009 = vmatpush3.bf16.msra.mxu0 %v1491_v43 }
 0xf1e   : > { %4030 = vmatprep.subr.bf16.mxu0 %v4399_v1 }
 0xf9e   : > { %v1402_v59 = vpop.xlane.xlu1 %1401 }
 0xf9f   : > { %v1403_v60 = vmul.f32 0.03125, %v1402_v59 }
 0xfa1   : > { %v1404_v61 = vsub.f32 %v1397_v57, %v1403_v60  ;;  %v1700_v57 = vld [vmem:[#allocation2 + $0x380] sm:$0xff] }
 0xfa2   : > { %v1702_v59 = vpack.c.bf16 %v1700_v57, %v1699_v56 }
 0xfa3   : > { %v1405_v62 = vmul.f32 %v1404_v61, %v1404_v61 }
 0xfa5   : > { %v1406_v0 = vsel %vm561_vm7, %v1405_v62, 0.0 }
 0xfa6   : > { %1407 = vadd.xlane.f32.xlu0 %v1406_v0  ;;  %v3647_v0 = vld [vmem:[#allocation2 + $0x360] ss:$0 sm:$0xff] }
0x1033   : > { %v1408_v13 = vpop.xlane.xlu0 %1407 }
0x1034   : > { %v1409_v14 = vmul.f32 0.03125, %v1408_v13 }
0x1036   : > { %v1410_v15 = vadd.f32 1e-05, %v1409_v14 }
0x1038   : > { %4303 = vrsqrt.f32 %v1410_v15 }
0x1042   : > { %v4304_v16 = vpop.eup %4303 }
0x1043   : > { %v1412_v20 = vmul.f32 %v4304_v16, %v1404_v61 }
0x1045   : > { %v1417_v22 = vmul.f32 %v3635_v19, %v1412_v20  ;;  %v3649_v19 = vld [vmem:[#allocation2 + $0x388] ss:$0 sm:$0xff] }
0x1047   : > { %v4662_v25 = vadd.f32 %v3636_v21, %v1417_v22 }
0x1049   : > { %v1427_v33 = vpack.c.bf16 %v4662_v25, %v4662_v25 }
0x104b   : > { %3999 = vmatmul.mubr.msk.bf16.vlgmr.msra.gmra.mrb[24].mxu1 %vm561_vm7, %v1427_v33 }
0x104c   : > { %4015 = vmatpush3.bf16.msra.mxu1 %v1596_v26  ;;  %4018 = vmatprep.mubr.msk.bf16.mxu1 %vm4400_vm0, %v4399_v1 }
0x104d   : > { %4016 = vmatprep.subr.bf16.mxu1 %v4399_v1 }
0x1050   : > { %4017 = vmatpush3.bf16.msra.mxu1 %v1597_v29  ;;  %v4707_v29 = vadd.f32 %v3605_v28, %v533_v27 }
0x1051   : > { %4022 = vmatprep.subr.bf16.mxu1 %v4399_v1 }
0x1053   : > { %4019 = vmatmul.mubr.msk.bf16.vlgmr.msra.gmra.mrb[28].mxu1 %vm561_vm7, %v1595_v53 }
0x1054   : > { %4023 = vmatpush3.bf16.msra.mxu1 %v1650_v32  ;;  %4026 = vmatprep.mubr.msk.bf16.mxu1 %vm4400_vm0, %v4399_v1 }
0x1055   : > { %4024 = vmatprep.subr.bf16.mxu1 %v4399_v1 }
0x1058   : > { %4025 = vmatpush3.bf16.msra.mxu1 %v1651_v36 }
0x1059   : > { %4038 = vmatprep.subr.bf16.mxu1 %v4399_v1 }
0x105b   : > { %4027 = vmatmul.mubr.msk.bf16.vlgmr.msra.gmra.mrb[32].mxu1 %vm561_vm7, %v1595_v53 }
0x105c   : > { %4040 = vmatprep.mubr.msk.bf16.mxu1 %vm4400_vm0, %v4399_v1 }
0x111e   : > { %v1472_v45 = vpop.f32.mrb[24].mxu1 }
0x111f   : > { %v1473_v46 = vadd.f32 %v3637_v44, %v1472_v45  ;;  %v4000_v47 = vpop.f32.mrb[25].mxu1  ;;  %v3639_v45 = vld [vmem:[#allocation2 + $0x2f0] ss:$0 sm:$0xff] }
0x1120   : > { %v1475_v50 = vpop.f32.mrb[26].mxu1 }
0x1121   : > { %v1478_v51 = vmax.f32 %v1473_v46, 0.0  ;;  %v4001_v52 = vpop.f32.mrb[27].mxu1 }
0x1123   : > { %v1487_v55 = vpack.c.bf16 %v1478_v51, %v1478_v51 }
0x1125   : > { %4011 = vmatmul.mubr.msk.bf16.vlgmr.msra.gmra.mrb[40].mxu0 %vm990_vm14, %v1487_v55 }
0x1126   : > { %v1640_v58 = vpop.f32.mrb[28].mxu1  ;;  %4031 = vmatpush3.bf16.msra.mxu0 %v1701_v54  ;;  %4034 = vmatprep.mubr.msk.bf16.mxu0 %vm4400_vm0, %v4399_v1 }
0x1127   : > { %v4020_v60 = vpop.f32.mrb[29].mxu1  ;;  %4032 = vmatprep.subr.bf16.mxu0 %v4399_v1  ;;  %v1641_v7 = vadd.f32 %v3645_v2, %v1640_v58 }
0x1128   : > { %v1643_v61 = vpop.f32.mrb[30].mxu1 }
0x1129   : > { %v4021_v62 = vpop.f32.mrb[31].mxu1  ;;  %v1748_v10 = vmul.f32 %v4555_v17, %v1641_v7  ;;  %v1749_v11 = vmul.f32 %v4558_v18, %v1641_v7  ;;  %v1876_v7 = vld [vmem:[#allocation2 + $0x3a8] sm:$0xff] }
0x112a   : > { %4033 = vmatpush3.bf16.msra.mxu0 %v1702_v59 }
0x112b   : > { %4044 = vmatprep.subr.bf16.mxu0 %v4399_v1  ;;  %v1750_v12 = vpack.c.bf16 %v1749_v11, %v1748_v10 }
0x112d   : > { %4035 = vmatmul.mubr.msk.bf16.vlgmr.msra.gmra.mrb[44].mxu0 %vm561_vm7, %v1595_v53 }
0x112e   : > { %v1691_v3 = vpop.f32.mrb[32].mxu1  ;;  %4046 = vmatprep.mubr.msk.bf16.mxu0 %vm4400_vm0, %v4399_v1 }
0x112f   : > { %v1692_v4 = vadd.f32 %v3647_v0, %v1691_v3  ;;  %v4028_v5 = vpop.f32.mrb[33].mxu1  ;;  %v1873_v3 = vld [vmem:[#allocation2 + $0x390] sm:$0xff] }
0x1130   : > { %v1694_v6 = vpop.f32.mrb[34].mxu1 }
0x1131   : > { %v1751_v39 = vpack.c.bf16 %v1692_v4, %v1692_v4  ;;  %v4029_v8 = vpop.f32.mrb[35].mxu1  ;;  %v1874_v4 = vld [vmem:[#allocation2 + $0x398] sm:$0xff]  ;;  %v1875_v6 = vld [vmem:[#allocation2 + $0x3a0] sm:$0xff] }
0x1132   : > { %v1878_v5 = vpack.c.bf16 %v1874_v4, %v1873_v3  ;;  %v1956_v4 = vld [vmem:[#allocation2 + $0x3c8] sm:$0xff] }
0x1133   : > { %v1756_v9 = vsel %vm561_vm7, %v1751_v39, 0  ;;  %v1879_v39 = vpack.c.bf16 %v1876_v7, %v1875_v6  ;;  %v3659_v7 = vld [vmem:[#allocation2 + $0x400] ss:$0 sm:$0xff] }
0x1134   : > { %4039 = vmatpush3.bf16.xpose.msra.mxu1 %v1756_v9 }
0x1135   : > { %4050 = vmatprep.subr.bf16.mxu1 %v4399_v1 }
0x113b   : > { %4041 = vmatmul.mubr.msk.bf16.vlgmr.msra.gmra.mrb[36].mxu1 %vm561_vm7, %v1750_v12  ;;  %v3641_v12 = vld [vmem:[#allocation2 + $0x308] ss:$0 sm:$0xff] }
0x113c   : > { %4054 = vmatprep.mubr.msk.bf16.mxu1 %vm4400_vm0, %v4399_v1  ;;  %4051 = vmatpush3.bf16.msra.mxu1 %v1878_v5  ;;  %v1957_v5 = vld [vmem:[#allocation2 + $0x3d0] sm:$0xff] }
0x113d   : > { %4052 = vmatprep.subr.bf16.mxu1 %v4399_v1  ;;  %v1960_v6 = vpack.c.bf16 %v1957_v5, %v1956_v4 }
0x1140   : > { %4053 = vmatpush3.bf16.msra.mxu1 %v1879_v39 }
0x1141   : > { %4066 = vmatprep.subr.bf16.mxu1 %v4399_v1 }
0x11f8   : > { %v1534_v13 = vpop.f32.mrb[40].mxu0 }
0x11f9   : > { %v4012_v14 = vpop.f32.mrb[41].mxu0  ;;  %v1535_v46 = vadd.f32 %v3639_v45, %v1534_v13 }
0x11fa   : > { %v1537_v15 = vpop.f32.mrb[42].mxu0  ;;  %v3642_v14 = vld [vmem:[#allocation2 + $0x310] ss:$0 sm:$0xff] }
0x11fb   : > { %v4013_v16 = vpop.f32.mrb[43].mxu0  ;;  %v1540_v49 = vadd.f32 %v1535_v46, %v4662_v25 }
0x11fd   : > { %v1543_v52 = vsel %vm561_vm7, %v1540_v49, 0.0 }
0x1200   : > { %v1742_v20 = vpop.f32.mrb[44].mxu0 }
0x1201   : > { %v1743_v21 = vadd.f32 %v3649_v19, %v1742_v20  ;;  %v4036_v22 = vpop.f32.mrb[45].mxu0 }
0x1202   : > { %v1745_v23 = vpop.f32.mrb[46].mxu0 }
0x1203   : > { %v1822_v24 = vpack.c.bf16 %v1743_v21, %v1743_v21  ;;  %v4037_v26 = vpop.f32.mrb[47].mxu0 }
0x1205   : > { %v1827_v33 = vsel %vm786_vm12, %v1822_v24, 0 }
0x1206   : > { %4045 = vmatpush3.bf16.msra.mxu0 %v1827_v33 }
0x1207   : > { %4058 = vmatprep.subr.bf16.mxu0 %v4399_v1 }
0x120e   : > { %v1792_v30 = vpop.f32.mrb[36].mxu1 }
0x120f   : > { %v1793_v31 = vadd.f32 %v1792_v30, %v4707_v29  ;;  %v4042_v32 = vpop.f32.mrb[37].mxu1 }
0x1210   : > { %v1795_v53 = vpop.f32.mrb[38].mxu1 }
0x1211   : > { %v1796_v34 = vadd.f32 %v1795_v53, %v4707_v29  ;;  %v4043_v35 = vpop.f32.mrb[39].mxu1  ;;  %v1799_v36 = vsel %vm758_vm13, %v1793_v31, -inf }
0x1212   : > { %1800 = vmax.xlane.f32.xlu1 %v1799_v36  ;;  %v2010_v35 = vld [vmem:[#allocation2 + $0x3e8] sm:$0xff] }
0x1213   : > { %v1802_v37 = vsel %vm758_vm13, %v1796_v34, -inf }
0x1214   : > { %1803 = vmax.xlane.f32.xlu0 %v1802_v37  ;;  %v2011_v37 = vld [vmem:[#allocation2 + $0x3f0] sm:$0xff] }
0x129f   : > { %v1801_v38 = vpop.xlane.xlu1 %1800 }
0x12a0   : > { %v1805_v40 = vsub.f32 %v1793_v31, %v1801_v38  ;;  %v2012_v38 = vld [vmem:[#allocation2 + $0x3f8] sm:$0xff] }
0x12a1   : > { %v1804_v41 = vpop.xlane.xlu0 %1803 }
0x12a2   : > { %v1807_v42 = vmul.f32 1.442695, %v1805_v40  ;;  %v1806_v43 = vsub.f32 %v1796_v34, %v1804_v41  ;;  %v2009_v34 = vld [vmem:[#allocation2 + $0x3e0] sm:$0xff]  ;;  %v2015_v40 = vpack.c.bf16 %v2012_v38, %v2011_v37  ;;  %v3653_v41 = vld [vmem:[#allocation2 + $0x3b0] ss:$0 sm:$0xff] }
0x12a3   : > { %v2014_v36 = vpack.c.bf16 %v2010_v35, %v2009_v34 }
0x12a4   : > { %4305 = vpow2.f32 %v1807_v42  ;;  %v1809_v44 = vmul.f32 1.442695, %v1806_v43 }
0x12a6   : > { %4307 = vpow2.f32 %v1809_v44 }
0x12ae   : > { %v4306_v47 = vpop.eup %4305 }
0x12af   : > { %v1811_v48 = vsel %vm758_vm13, %v4306_v47, 0.0 }
0x12b0   : > { %v4308_v50 = vpop.eup %4307  ;;  %1812 = vadd.xlane.f32.xlu1 %v1811_v48 }
0x12b1   : > { %v1814_v51 = vsel %vm758_vm13, %v4308_v50, 0.0 }
0x12b2   : > { %1815 = vadd.xlane.f32.xlu0 %v1814_v51 }
0x12b4   : > { %1544 = vadd.xlane.f32.xlu1 %v1543_v52 }
0x133d   : > { %v1813_v54 = vpop.xlane.xlu1 %1812 }
0x133e   : > { %4309 = vrcp.f32 %v1813_v54  ;;  %v3643_v54 = vld [vmem:[#allocation2 + $0x6d8] ss:$0 sm:$0xff] }
0x133f   : > { %v1816_v55 = vpop.xlane.xlu0 %1815 }
0x1340   : > { %4311 = vrcp.f32 %v1816_v55 }
0x1341   : > { %v1545_v56 = vpop.xlane.xlu1 %1544 }
0x1342   : > { %v1546_v57 = vmul.f32 0.03125, %v1545_v56  ;;  %v3644_v56 = vld [vmem:[#allocation2 + $0x6e0] ss:$0 sm:$0xff] }
0x1344   : > { %v1547_v58 = vsub.f32 %v1540_v49, %v1546_v57 }
0x1346   : > { %v1548_v59 = vmul.f32 %v1547_v58, %v1547_v58 }
0x1348   : > { %v4310_v60 = vpop.eup %4309  ;;  %v1549_v61 = vsel %vm561_vm7, %v1548_v59, 0.0 }
0x1349   : > { %1550 = vadd.xlane.f32.xlu0 %v1549_v61  ;;  %v1819_v62 = vmul.f32 %v4310_v60, %v4306_v47 }
0x134a   : > { %v4312_v25 = vpop.eup %4311 }
0x134b   : > { %v1820_v0 = vmul.f32 %v4312_v25, %v4308_v50 }
0x134d   : > { %v1821_v2 = vpack.c.bf16 %v1820_v0, %v1819_v62  ;;  %v1954_v0 = vld [vmem:[#allocation2 + $0x3b8] sm:$0xff] }
0x134f   : > { %4047 = vmatmul.mubr.msk.bf16.vlgmr.msra.gmra.mrb[48].mxu0 %vm758_vm13, %v1821_v2  ;;  %v1955_v2 = vld [vmem:[#allocation2 + $0x3c0] sm:$0xff] }
0x1350   : > { %4062 = vmatprep.mubr.msk.bf16.mxu0 %vm4400_vm0, %v4399_v1  ;;  %v1959_v3 = vpack.c.bf16 %v1955_v2, %v1954_v0 }
0x1352   : > { %4059 = vmatpush3.bf16.msra.mxu0 %v1959_v3 }
0x1353   : > { %4060 = vmatprep.subr.bf16.mxu0 %v4399_v1 }
0x1356   : > { %4061 = vmatpush3.bf16.msra.mxu0 %v1960_v6 }
0x1357   : > { %4074 = vmatprep.subr.bf16.mxu0 %v4399_v1 }
0x13d6   : > { %v1551_v8 = vpop.xlane.xlu0 %1550 }
0x13d7   : > { %v1552_v9 = vmul.f32 0.03125, %v1551_v8 }
0x13d9   : > { %v1553_v10 = vadd.f32 1e-05, %v1552_v9 }
0x13db   : > { %4313 = vrsqrt.f32 %v1553_v10 }
0x13e5   : > { %v4314_v11 = vpop.eup %4313 }
0x13e6   : > { %v1555_v13 = vmul.f32 %v4314_v11, %v1547_v58 }
0x13e8   : > { %v1560_v15 = vmul.f32 %v3641_v12, %v1555_v13 }
0x13ea   : > { %v1565_v16 = vadd.f32 %v3642_v14, %v1560_v15 }
0x13ec   : > { %v1568_v19 = vsel %vm561_vm7, %v1565_v16, 0.0 }
0x13ed   : > { %1569 = vadd.xlane.f32.xlu1 %v1568_v19 }
0x1422   : > { %v1863_v20 = vpop.f32.mrb[48].mxu0 }
0x1423   : > { %v4048_v21 = vpop.f32.mrb[49].mxu0  ;;  %v1870_v23 = vmul.f32 %v4555_v17, %v1863_v20  ;;  %v3655_v20 = vld [vmem:[#allocation2 + $0x4c8] ss:$0 sm:$0xff] }
0x1424   : > { %v1866_v22 = vpop.f32.mrb[50].mxu0 }
0x1425   : > { %v1871_v24 = vmul.f32 %v4558_v18, %v1866_v22  ;;  %v4049_v26 = vpop.f32.mrb[51].mxu0  ;;  %v3656_v22 = vld [vmem:[#allocation2 + $0x4d0] ss:$0 sm:$0xff] }
0x1426   : > { %v2065_v26 = vld [vmem:[#allocation2 + $0x410] sm:$0xff] }
0x1427   : > { %v1872_v33 = vadd.f32 %v1871_v24, %v1870_v23  ;;  %v2064_v24 = vld [vmem:[#allocation2 + $0x408] sm:$0xff] }
0x1429   : > { %v1877_v27 = vpack.c.bf16 %v1872_v33, %v1872_v33 }
0x142b   : > { %4055 = vmatmul.mubr.msk.bf16.vlgmr.msra.gmra.mrb[40].mxu1 %vm561_vm7, %v1877_v27  ;;  %v2068_v27 = vpack.c.bf16 %v2065_v26, %v2064_v24 }
0x142c   : > { %4070 = vmatprep.mubr.msk.bf16.mxu1 %vm4400_vm0, %v4399_v1  ;;  %4067 = vmatpush3.bf16.msra.mxu1 %v2014_v36 }
0x142d   : > { %4068 = vmatprep.subr.bf16.mxu1 %v4399_v1 }
0x1430   : > { %4069 = vmatpush3.bf16.msra.mxu1 %v2015_v40 }
0x1431   : > { %4082 = vmatprep.subr.bf16.mxu1 %v4399_v1 }
0x147a   : > { %v1570_v28 = vpop.xlane.xlu1 %1569 }
0x147b   : > { %v1571_v30 = vmul.f32 0.03125, %v1570_v28 }
0x147d   : > { %v1572_v31 = vsub.f32 %v1565_v16, %v1571_v30  ;;  %v2066_v30 = vld [vmem:[#allocation2 + $0x418] sm:$0xff] }
0x147f   : > { %v1573_v32 = vmul.f32 %v1572_v31, %v1572_v31 }
0x1481   : > { %v1574_v53 = vsel %vm561_vm7, %v1573_v32, 0.0 }
0x1482   : > { %1575 = vadd.xlane.f32.xlu1 %v1574_v53  ;;  %v3657_v53 = vld [vmem:[#allocation2 + $0x3d8] ss:$0 sm:$0xff] }
0x14fe   : > { %v1922_v42 = vpop.f32.mrb[40].mxu1 }
0x14ff   : > { %v1923_v43 = vadd.f32 %v3653_v41, %v1922_v42  ;;  %v4056_v44 = vpop.f32.mrb[41].mxu1 }
0x1500   : > { %v1925_v45 = vpop.f32.mrb[42].mxu1 }
0x1501   : > { %v4057_v46 = vpop.f32.mrb[43].mxu1  ;;  %v1928_v47 = vadd.f32 %v1923_v43, %v4549_v63  ;;  %v3661_v43 = vld [vmem:[#allocation2 + $0x428] ss:$0 sm:$0xff] }
0x1503   : > { %v1931_v48 = vsel %vm561_vm7, %v1928_v47, 0.0 }
0x1504   : > { %1932 = vadd.xlane.f32.xlu0 %v1931_v48 }
0x150f   : > { %v1576_v49 = vpop.xlane.xlu1 %1575 }
0x1510   : > { %v1577_v50 = vmul.f32 0.03125, %v1576_v49 }
0x1512   : > { %v1578_v51 = vadd.f32 1e-05, %v1577_v50 }
0x1514   : > { %4315 = vrsqrt.f32 %v1578_v51  ;;  %v4769_v51 = vld [vmem:[%s370_s22] ss:$0 sm:$0xff] }
0x151e   : > { %v4316_v52 = vpop.eup %4315 }
0x151f   : > { %v1580_v55 = vmul.f32 %v4316_v52, %v1572_v31  ;;  %v2067_v31 = vld [vmem:[#allocation2 + $0x420] sm:$0xff] }
0x1520   : > { %v2069_v32 = vpack.c.bf16 %v2067_v31, %v2066_v30 }
0x1521   : > { %v1585_v57 = vmul.f32 %v3643_v54, %v1580_v55 }
0x1523   : > { %v1590_v58 = vadd.f32 %v3644_v56, %v1585_v57 }
0x1525   : > { %v4734_v59 = vpack.c.bf16 %v1590_v58, %v1590_v58 }
0x1527   : > { %4071 = vmatmul.mubr.msk.bf16.vlgmr.msra.gmra.mrb[44].mxu1 %vm561_vm7, %v4734_v59 }
0x1528   : > { %4084 = vmatprep.mubr.msk.bf16.mxu1 %vm4400_vm0, %v4399_v1 }
0x1591   : > { %v1933_v63 = vpop.xlane.xlu0 %1932 }
0x1592   : > { %v1934_v60 = vmul.f32 0.03125, %v1933_v63 }
0x1594   : > { %v1935_v61 = vsub.f32 %v1928_v47, %v1934_v60 }
0x1596   : > { %v1936_v25 = vmul.f32 %v1935_v61, %v1935_v61 }
0x1598   : > { %v1937_v62 = vsel %vm561_vm7, %v1936_v25, 0.0 }
0x1599   : > { %1938 = vadd.xlane.f32.xlu0 %v1937_v62 }
0x15fa   : > { %v2058_v39 = vpop.f32.mrb[44].mxu1 }
0x15fb   : > { %v2059_v8 = vadd.f32 %v3659_v7, %v2058_v39  ;;  %v4072_v9 = vpop.f32.mrb[45].mxu1 }
0x15fc   : > { %v2061_v10 = vpop.f32.mrb[46].mxu1 }
0x15fd   : > { %v2118_v11 = vpack.c.bf16 %v2059_v8, %v2059_v8  ;;  %v4073_v12 = vpop.f32.mrb[47].mxu1 }
0x15ff   : > { %v2123_v13 = vsel %vm561_vm7, %v2118_v11, 0 }
0x1600   : > { %4083 = vmatpush3.bf16.xpose.msra.mxu1 %v2123_v13 }
0x1601   : > { %4094 = vmatprep.subr.bf16.mxu1 %v4399_v1 }
0x1626   : > { %v1939_v14 = vpop.xlane.xlu0 %1938 }
0x1627   : > { %v1940_v15 = vmul.f32 0.03125, %v1939_v14  ;;  %v2240_v14 = vld [vmem:[#allocation2 + $0x430] sm:$0xff] }
0x1629   : > { %v1941_v16 = vadd.f32 1e-05, %v1940_v15  ;;  %v2241_v15 = vld [vmem:[#allocation2 + $0x438] sm:$0xff] }
0x162b   : > { %4317 = vrsqrt.f32 %v1941_v16  ;;  %v2245_v16 = vpack.c.bf16 %v2241_v15, %v2240_v14 }
0x1635   : > { %v4318_v19 = vpop.eup %4317 }
0x1636   : > { %v1943_v21 = vmul.f32 %v4318_v19, %v1935_v61  ;;  %v2242_v19 = vld [vmem:[#allocation2 + $0x440] sm:$0xff] }
0x1638   : > { %v1948_v23 = vmul.f32 %v3655_v20, %v1943_v21  ;;  %v2243_v20 = vld [vmem:[#allocation2 + $0x448] sm:$0xff] }
0x1639   : > { %v2246_v21 = vpack.c.bf16 %v2243_v20, %v2242_v19 }
0x163a   : > { %v4745_v33 = vadd.f32 %v3656_v22, %v1948_v23 }
0x163c   : > { %v1958_v28 = vpack.c.bf16 %v4745_v33, %v4745_v33 }
0x163e   : > { %4063 = vmatmul.mubr.msk.bf16.vlgmr.msra.gmra.mrb[52].mxu0 %vm561_vm7, %v1958_v28 }
0x163f   : > { %4075 = vmatpush3.bf16.msra.mxu0 %v2068_v27  ;;  %4078 = vmatprep.mubr.msk.bf16.mxu0 %vm4400_vm0, %v4399_v1 }
0x1640   : > { %4076 = vmatprep.subr.bf16.mxu0 %v4399_v1 }
0x1643   : > { %4077 = vmatpush3.bf16.msra.mxu0 %v2069_v32  ;;  %v3665_v32 = vld [vmem:[#allocation2 + $0x450] ss:$0 sm:$0xff] }
0x1644   : > { %4088 = vmatprep.subr.bf16.mxu0 %v4399_v1 }
0x1646   : > { %4079 = vmatmul.mubr.msk.bf16.vlgmr.msra.gmra.mrb[56].mxu0 %vm561_vm7, %v4734_v59 }
0x1647   : > { %4090 = vmatprep.mubr.msk.bf16.mxu0 %vm4400_vm0, %v4399_v1 }
0x1711   : > { %v2003_v34 = vpop.f32.mrb[52].mxu0 }
0x1712   : > { %v2004_v35 = vadd.f32 %v3657_v53, %v2003_v34  ;;  %v4064_v36 = vpop.f32.mrb[53].mxu0 }
0x1713   : > { %v2006_v37 = vpop.f32.mrb[54].mxu0 }
0x1714   : > { %v2115_v38 = vmul.f32 %v4555_v17, %v2004_v35  ;;  %v2116_v40 = vmul.f32 %v4558_v18, %v2004_v35  ;;  %v4065_v41 = vpop.f32.mrb[55].mxu0 }
0x1716   : > { %v2117_v42 = vpack.c.bf16 %v2116_v40, %v2115_v38 }
0x1718   : > { %4085 = vmatmul.mubr.msk.bf16.vlgmr.msra.gmra.mrb[48].mxu1 %vm561_vm7, %v2117_v42 }
0x1719   : > { %v2109_v44 = vpop.f32.mrb[56].mxu0  ;;  %4098 = vmatprep.mubr.msk.bf16.mxu1 %vm4400_vm0, %v4399_v1  ;;  %4095 = vmatpush3.bf16.msra.mxu1 %v2245_v16 }
0x171a   : > { %v2110_v45 = vadd.f32 %v3661_v43, %v2109_v44  ;;  %v4080_v46 = vpop.f32.mrb[57].mxu0  ;;  %4096 = vmatprep.subr.bf16.mxu1 %v4399_v1 }
0x171b   : > { %v2112_v47 = vpop.f32.mrb[58].mxu0  ;;  %v2321_v46 = vld [vmem:[#allocation2 + $0x458] sm:$0xff] }
0x171c   : > { %v2189_v48 = vpack.c.bf16 %v2110_v45, %v2110_v45  ;;  %v4081_v49 = vpop.f32.mrb[59].mxu0  ;;  %v2322_v47 = vld [vmem:[#allocation2 + $0x460] sm:$0xff] }
0x171d   : > { %4097 = vmatpush3.bf16.msra.mxu1 %v2246_v21  ;;  %v2323_v49 = vld [vmem:[#allocation2 + $0x468] sm:$0xff]  ;;  %v3671_v21 = vld [vmem:[#allocation2 + $0x4c0] ss:$0 sm:$0xff] }
0x171e   : > { %v2194_v50 = vsel %vm786_vm12, %v2189_v48, 0  ;;  %4110 = vmatprep.subr.bf16.mxu1 %v4399_v1  ;;  %v2326_v48 = vpack.c.bf16 %v2322_v47, %v2321_v46  ;;  %v2573_v47 = vld [vmem:[#allocation2 + $0x560] sm:$0xff] }
0x171f   : > { %4089 = vmatpush3.bf16.msra.mxu0 %v2194_v50  ;;  %v2324_v50 = vld [vmem:[#allocation2 + $0x470] sm:$0xff] }
0x1720   : > { %4102 = vmatprep.subr.bf16.mxu0 %v4399_v1 }
0x17eb   : > { %v2159_v52 = vpop.f32.mrb[48].mxu1 }
0x17ec   : > { %v2160_v54 = vadd.f32 %v4769_v51, %v2159_v52  ;;  %v4086_v55 = vpop.f32.mrb[49].mxu1  ;;  %v2327_v52 = vpack.c.bf16 %v2324_v50, %v2323_v49 }
0x17ed   : > { %v2162_v56 = vpop.f32.mrb[50].mxu1  ;;  %v2379_v55 = vld [vmem:[#allocation2 + $0x490] sm:$0xff] }
0x17ee   : > { %v2163_v57 = vadd.f32 %v4769_v51, %v2162_v56  ;;  %v4087_v58 = vpop.f32.mrb[51].mxu1  ;;  %v2166_v63 = vsel %vm758_vm13, %v2160_v54, -inf }
0x17ef   : > { %2167 = vmax.xlane.f32.xlu1 %v2166_v63 }
0x17f0   : > { %v2169_v60 = vsel %vm758_vm13, %v2163_v57, -inf }
0x17f1   : > { %2170 = vmax.xlane.f32.xlu0 %v2169_v60 }
0x187c   : > { %v2168_v61 = vpop.xlane.xlu1 %2167 }
0x187d   : > { %v2172_v25 = vsub.f32 %v2160_v54, %v2168_v61  ;;  %v2378_v54 = vld [vmem:[#allocation2 + $0x488] sm:$0xff] }
0x187e   : > { %v2171_v62 = vpop.xlane.xlu0 %2170 }
0x187f   : > { %v2174_v0 = vmul.f32 1.442695, %v2172_v25  ;;  %v2173_v2 = vsub.f32 %v2163_v57, %v2171_v62  ;;  %v2380_v57 = vld [vmem:[#allocation2 + $0x498] sm:$0xff] }
0x1880   : > { %v2387_v58 = vpack.c.bf16 %v2380_v57, %v2379_v55  ;;  %v3667_v62 = vld [vmem:[#allocation2 + $0x4d8] ss:$0 sm:$0xff] }
0x1881   : > { %4319 = vpow2.f32 %v2174_v0  ;;  %v2176_v3 = vmul.f32 1.442695, %v2173_v2  ;;  %v3668_v2 = vld [vmem:[#allocation2 + $0x4e0] ss:$0 sm:$0xff] }
0x1883   : > { %4321 = vpow2.f32 %v2176_v3 }
0x188b   : > { %v4320_v4 = vpop.eup %4319 }
0x188c   : > { %v2178_v5 = vsel %vm758_vm13, %v4320_v4, 0.0 }
0x188d   : > { %v4322_v6 = vpop.eup %4321  ;;  %2179 = vadd.xlane.f32.xlu1 %v2178_v5 }
0x188e   : > { %v2181_v7 = vsel %vm758_vm13, %v4322_v6, 0.0 }
0x188f   : > { %2182 = vadd.xlane.f32.xlu0 %v2181_v7  ;;  %v2382_v7 = vld [vmem:[#allocation2 + $0x4a8] sm:$0xff] }
0x191a   : > { %v2180_v39 = vpop.xlane.xlu1 %2179 }
0x191b   : > { %4323 = vrcp.f32 %v2180_v39 }
0x191c   : > { %v2183_v8 = vpop.xlane.xlu0 %2182 }
0x191d   : > { %4325 = vrcp.f32 %v2183_v8  ;;  %v2383_v8 = vld [vmem:[#allocation2 + $0x4b0] sm:$0xff] }
0x1925   : > { %v4324_v9 = vpop.eup %4323 }
0x1926   : > { %v2186_v11 = vmul.f32 %v4324_v9, %v4320_v4  ;;  %v2384_v9 = vld [vmem:[#allocation2 + $0x4b8] sm:$0xff] }
0x1927   : > { %v4326_v10 = vpop.eup %4325 }
0x1928   : > { %v2187_v12 = vmul.f32 %v4326_v10, %v4322_v6  ;;  %v2381_v6 = vld [vmem:[#allocation2 + $0x4a0] sm:$0xff]  ;;  %v2389_v10 = vpack.c.bf16 %v2384_v9, %v2383_v8 }
0x1929   : > { %v2388_v39 = vpack.c.bf16 %v2382_v7, %v2381_v6 }
0x192a   : > { %v2188_v13 = vpack.c.bf16 %v2187_v12, %v2186_v11  ;;  %v3669_v11 = vld [vmem:[#allocation2 + $0x478] ss:$0 sm:$0xff] }
0x192c   : > { %4091 = vmatmul.mubr.msk.bf16.vlgmr.msra.gmra.mrb[60].mxu0 %vm758_vm13, %v2188_v13 }
0x192d   : > { %4106 = vmatprep.mubr.msk.bf16.mxu0 %vm4400_vm0, %v4399_v1  ;;  %4103 = vmatpush3.bf16.msra.mxu0 %v2326_v48 }
0x192e   : > { %4104 = vmatprep.subr.bf16.mxu0 %v4399_v1 }
0x1931   : > { %4105 = vmatpush3.bf16.msra.mxu0 %v2327_v52 }
0x1932   : > { %4122 = vmatprep.subr.bf16.mxu0 %v4399_v1 }
0x19ff   : > { %v2230_v22 = vpop.f32.mrb[60].mxu0 }
0x1a00   : > { %v4092_v23 = vpop.f32.mrb[61].mxu0  ;;  %v2237_v26 = vmul.f32 %v4555_v17, %v2230_v22 }
0x1a01   : > { %v2233_v24 = vpop.f32.mrb[62].mxu0 }
0x1a02   : > { %v2238_v27 = vmul.f32 %v4558_v18, %v2233_v24  ;;  %v4093_v28 = vpop.f32.mrb[63].mxu0 }
0x1a04   : > { %v2239_v30 = vadd.f32 %v2238_v27, %v2237_v26 }
0x1a06   : > { %v2244_v31 = vpack.c.bf16 %v2239_v30, %v2239_v30 }
0x1a08   : > { %4099 = vmatmul.mubr.msk.bf16.vlgmr.msra.gmra.mrb[52].mxu1 %vm561_vm7, %v2244_v31 }
0x1a09   : > { %4118 = vmatprep.mubr.msk.bf16.mxu1 %vm4400_vm0, %v4399_v1 }
0x1adb   : > { %v2289_v53 = vpop.f32.mrb[52].mxu1 }
0x1adc   : > { %v2290_v34 = vadd.f32 %v3665_v32, %v2289_v53  ;;  %v4100_v35 = vpop.f32.mrb[53].mxu1 }
0x1add   : > { %v2292_v36 = vpop.f32.mrb[54].mxu1 }
0x1ade   : > { %v4101_v37 = vpop.f32.mrb[55].mxu1  ;;  %v2295_v38 = vadd.f32 %v2290_v34, %v4745_v33  ;;  %v2377_v33 = vld [vmem:[#allocation2 + $0x480] sm:$0xff]  ;;  %v2464_v36 = vld [vmem:[#allocation2 + $0x4f8] sm:$0xff] }
0x1adf   : > { %v2386_v56 = vpack.c.bf16 %v2378_v54, %v2377_v33  ;;  %v2465_v37 = vld [vmem:[#allocation2 + $0x500] sm:$0xff]  ;;  %v3673_v54 = vld [vmem:[#allocation2 + $0x4e8] ss:$0 sm:$0xff] }
0x1ae0   : > { %v2298_v40 = vsel %vm561_vm7, %v2295_v38, 0.0 }
0x1ae1   : > { %2299 = vadd.xlane.f32.xlu1 %v2298_v40  ;;  %4111 = vmatpush3.bf16.msra.mxu1 %v2386_v56  ;;  %v2469_v40 = vpack.c.bf16 %v2465_v37, %v2464_v36  ;;  %v3674_v56 = vld [vmem:[#allocation2 + $0x4f0] ss:$0 sm:$0xff] }
0x1ae2   : > { %4112 = vmatprep.subr.bf16.mxu1 %v4399_v1 }
0x1ae5   : > { %4113 = vmatpush3.bf16.msra.mxu1 %v2387_v58  ;;  %v2519_v58 = vld [vmem:[#allocation2 + $0x520] sm:$0xff] }
0x1ae6   : > { %4114 = vmatprep.subr.bf16.mxu1 %v4399_v1 }
0x1ae9   : > { %4115 = vmatpush3.bf16.msra.mxu1 %v2388_v39 }
0x1aea   : > { %4116 = vmatprep.subr.bf16.mxu1 %v4399_v1 }
0x1aed   : > { %4117 = vmatpush3.bf16.msra.mxu1 %v2389_v10 }
0x1aee   : > { %4138 = vmatprep.subr.bf16.mxu1 %v4399_v1 }
0x1b6e   : > { %v2300_v41 = vpop.xlane.xlu1 %2299 }
0x1b6f   : > { %v2301_v42 = vmul.f32 0.03125, %v2300_v41  ;;  %v2571_v41 = vld [vmem:[#allocation2 + $0x550] sm:$0xff] }
0x1b71   : > { %v2302_v43 = vsub.f32 %v2295_v38, %v2301_v42  ;;  %v2570_v38 = vld [vmem:[#allocation2 + $0x548] sm:$0xff] }
0x1b72   : > { %v2574_v42 = vpack.c.bf16 %v2571_v41, %v2570_v38 }
0x1b73   : > { %v2303_v44 = vmul.f32 %v2302_v43, %v2302_v43 }
0x1b75   : > { %v2304_v45 = vsel %vm561_vm7, %v2303_v44, 0.0  ;;  %v2467_v44 = vld [vmem:[#allocation2 + $0x510] sm:$0xff] }
0x1b76   : > { %2305 = vadd.xlane.f32.xlu0 %v2304_v45  ;;  %v2572_v45 = vld [vmem:[#allocation2 + $0x558] sm:$0xff] }
0x1b77   : > { %v2575_v48 = vpack.c.bf16 %v2573_v47, %v2572_v45 }
0x1c03   : > { %v2306_v63 = vpop.xlane.xlu0 %2305 }
0x1c04   : > { %v2307_v60 = vmul.f32 0.03125, %v2306_v63  ;;  %v2520_v63 = vld [vmem:[#allocation2 + $0x528] sm:$0xff] }
0x1c06   : > { %v2308_v61 = vadd.f32 1e-05, %v2307_v60 }
0x1c08   : > { %4327 = vrsqrt.f32 %v2308_v61  ;;  %v2523_v61 = vpack.c.bf16 %v2520_v63, %v2519_v58  ;;  %v2747_v58 = vld [vmem:[#allocation2 + $0x578] sm:$0xff] }
0x1c12   : > { %v4328_v25 = vpop.eup %4327 }
0x1c13   : > { %v2310_v0 = vmul.f32 %v4328_v25, %v2302_v43  ;;  %v2466_v43 = vld [vmem:[#allocation2 + $0x508] sm:$0xff] }
0x1c14   : > { %v2470_v46 = vpack.c.bf16 %v2467_v44, %v2466_v43 }
0x1c15   : > { %v2315_v3 = vmul.f32 %v3667_v62, %v2310_v0  ;;  %v2521_v62 = vld [vmem:[#allocation2 + $0x530] sm:$0xff]  ;;  %v2522_v0 = vld [vmem:[#allocation2 + $0x538] sm:$0xff] }
0x1c17   : > { %v2320_v4 = vadd.f32 %v3668_v2, %v2315_v3  ;;  %v2524_v2 = vpack.c.bf16 %v2522_v0, %v2521_v62  ;;  %v3679_v3 = vld [vmem:[#allocation2 + $0x568] ss:$0 sm:$0xff] }
0x1c19   : > { %v2325_v5 = vpack.c.bf16 %v2320_v4, %v2320_v4 }
0x1c1b   : > { %4107 = vmatmul.mubr.msk.bf16.vlgmr.msra.gmra.mrb[64].mxu0 %vm561_vm7, %v2325_v5 }
0x1c1c   : > { %4126 = vmatprep.mubr.msk.bf16.mxu0 %vm4400_vm0, %v4399_v1  ;;  %4123 = vmatpush3.bf16.msra.mxu0 %v2469_v40 }
0x1c1d   : > { %4124 = vmatprep.subr.bf16.mxu0 %v4399_v1 }
0x1c20   : > { %4125 = vmatpush3.bf16.msra.mxu0 %v2470_v46 }
0x1c21   : > { %4130 = vmatprep.subr.bf16.mxu0 %v4399_v1 }
0x1cee   : > { %v2370_v12 = vpop.f32.mrb[64].mxu0 }
0x1cef   : > { %v2371_v13 = vadd.f32 %v3669_v11, %v2370_v12  ;;  %v4108_v14 = vpop.f32.mrb[65].mxu0 }
0x1cf0   : > { %v2373_v15 = vpop.f32.mrb[66].mxu0  ;;  %v3677_v14 = vld [vmem:[#allocation2 + $0x540] ss:$0 sm:$0xff] }
0x1cf1   : > { %v2376_v16 = vmax.f32 %v2371_v13, 0.0  ;;  %v4109_v19 = vpop.f32.mrb[67].mxu0  ;;  %v3675_v15 = vld [vmem:[#allocation2 + $0x518] ss:$0 sm:$0xff] }
0x1cf3   : > { %v2385_v20 = vpack.c.bf16 %v2376_v16, %v2376_v16 }
0x1cf5   : > { %4119 = vmatmul.mubr.msk.bf16.vlgmr.msra.gmra.mrb[56].mxu1 %vm990_vm14, %v2385_v20 }
0x1cf6   : > { %4142 = vmatprep.mubr.msk.bf16.mxu1 %vm4400_vm0, %v4399_v1  ;;  %4139 = vmatpush3.bf16.msra.mxu1 %v2574_v42 }
0x1cf7   : > { %4140 = vmatprep.subr.bf16.mxu1 %v4399_v1 }
0x1cfa   : > { %4141 = vmatpush3.bf16.msra.mxu1 %v2575_v48 }
0x1cfb   : > { %4152 = vmatprep.subr.bf16.mxu1 %v4399_v1 }
0x1dc8   : > { %v2432_v22 = vpop.f32.mrb[56].mxu1 }
0x1dc9   : > { %v2433_v23 = vadd.f32 %v3671_v21, %v2432_v22  ;;  %v4120_v24 = vpop.f32.mrb[57].mxu1 }
0x1dca   : > { %v2435_v26 = vpop.f32.mrb[58].mxu1 }
0x1dcb   : > { %v4121_v27 = vpop.f32.mrb[59].mxu1  ;;  %v2438_v28 = vadd.f32 %v2433_v23, %v2320_v4 }
0x1dcd   : > { %v2441_v30 = vsel %vm561_vm7, %v2438_v28, 0.0 }
0x1dce   : > { %2442 = vadd.xlane.f32.xlu1 %v2441_v30 }
0x1e5b   : > { %v2443_v31 = vpop.xlane.xlu1 %2442 }
0x1e5c   : > { %v2444_v32 = vmul.f32 0.03125, %v2443_v31 }
0x1e5e   : > { %v2445_v53 = vsub.f32 %v2438_v28, %v2444_v32 }
0x1e60   : > { %v2446_v34 = vmul.f32 %v2445_v53, %v2445_v53 }
0x1e62   : > { %v2447_v35 = vsel %vm561_vm7, %v2446_v34, 0.0 }
0x1e63   : > { %2448 = vadd.xlane.f32.xlu0 %v2447_v35 }
0x1ef0   : > { %v2449_v49 = vpop.xlane.xlu0 %2448 }
0x1ef1   : > { %v2450_v50 = vmul.f32 0.03125, %v2449_v49 }
0x1ef3   : > { %v2451_v52 = vadd.f32 1e-05, %v2450_v50 }
0x1ef5   : > { %4329 = vrsqrt.f32 %v2451_v52 }
0x1eff   : > { %v4330_v33 = vpop.eup %4329 }
0x1f00   : > { %v2453_v55 = vmul.f32 %v4330_v33, %v2445_v53 }
0x1f02   : > { %v2458_v57 = vmul.f32 %v3673_v54, %v2453_v55 }
0x1f04   : > { %v4808_v60 = vadd.f32 %v3674_v56, %v2458_v57  ;;  %v2746_v57 = vld [vmem:[#allocation2 + $0x570] sm:$0xff] }
0x1f05   : > { %v2751_v63 = vpack.c.bf16 %v2747_v58, %v2746_v57  ;;  %v2935_v58 = vld [vmem:[#allocation2 + $0x5f8] sm:$0xff] }
0x1f06   : > { %v2468_v25 = vpack.c.bf16 %v4808_v60, %v4808_v60 }
0x1f08   : > { %4127 = vmatmul.mubr.msk.bf16.vlgmr.msra.gmra.mrb[68].mxu0 %vm561_vm7, %v2468_v25  ;;  %4143 = vmatmul.mubr.msk.bf16.vlgmr.msra.gmra.mrb[60].mxu1 %vm561_vm7, %v2468_v25 }
0x1f09   : > { %4131 = vmatpush3.bf16.msra.mxu0 %v2523_v61  ;;  %4134 = vmatprep.mubr.msk.bf16.mxu0 %vm4400_vm0, %v4399_v1  ;;  %v2748_v61 = vld [vmem:[#allocation2 + $0x580] sm:$0xff] }
0x1f0a   : > { %4132 = vmatprep.subr.bf16.mxu0 %v4399_v1  ;;  %4154 = vmatprep.mubr.msk.bf16.mxu1 %vm4400_vm0, %v4399_v1 }
0x1f0d   : > { %4133 = vmatpush3.bf16.msra.mxu0 %v2524_v2 }
0x1f0e   : > { %4146 = vmatprep.subr.bf16.mxu0 %v4399_v1 }
0x1f10   : > { %4135 = vmatmul.mubr.msk.bf16.vlgmr.msra.gmra.mrb[72].mxu0 %vm561_vm7, %v2468_v25  ;;  %v2749_v25 = vld [vmem:[#allocation2 + $0x588] sm:$0xff] }
0x1f11   : > { %4148 = vmatprep.mubr.msk.bf16.mxu0 %vm4400_vm0, %v4399_v1  ;;  %v2752_v62 = vpack.c.bf16 %v2749_v25, %v2748_v61  ;;  %v3687_v25 = vld [vmem:[#allocation2 + $0x5b8] ss:$0 sm:$0xff] }
0x1fdb   : > { %v2513_v4 = vpop.f32.mrb[68].mxu0  ;;  %v2615_v5 = vpop.f32.mrb[60].mxu1 }
0x1fdc   : > { %v2616_v6 = vadd.f32 %v3679_v3, %v2615_v5  ;;  %v4128_v7 = vpop.f32.mrb[69].mxu0  ;;  %v4144_v39 = vpop.f32.mrb[61].mxu1  ;;  %v2514_v22 = vadd.f32 %v3675_v15, %v2513_v4 }
0x1fdd   : > { %v2516_v8 = vpop.f32.mrb[70].mxu0  ;;  %v2618_v9 = vpop.f32.mrb[62].mxu1  ;;  %v2882_v7 = vld [vmem:[#allocation2 + $0x5c0] sm:$0xff]  ;;  %v2883_v39 = vld [vmem:[#allocation2 + $0x5c8] sm:$0xff] }
0x1fde   : > { %v2695_v10 = vpack.c.bf16 %v2616_v6, %v2616_v6  ;;  %v4129_v11 = vpop.f32.mrb[71].mxu0  ;;  %v4145_v12 = vpop.f32.mrb[63].mxu1  ;;  %v2621_v27 = vmul.f32 %v4555_v17, %v2514_v22  ;;  %v2622_v28 = vmul.f32 %v4558_v18, %v2514_v22  ;;  %v2886_v9 = vpack.c.bf16 %v2883_v39, %v2882_v7  ;;  %v3691_v39 = vld [vmem:[#allocation2 + $0x608] ss:$0 sm:$0xff] }
0x1fdf   : > { %v2884_v11 = vld [vmem:[#allocation2 + $0x5d0] sm:$0xff]  ;;  %v2885_v12 = vld [vmem:[#allocation2 + $0x5d8] sm:$0xff] }
0x1fe0   : > { %v2700_v13 = vsel %vm786_vm12, %v2695_v10, 0  ;;  %v2623_v30 = vpack.c.bf16 %v2622_v28, %v2621_v27 }
0x1fe1   : > { %4153 = vmatpush3.bf16.msra.mxu1 %v2700_v13  ;;  %v2887_v13 = vpack.c.bf16 %v2885_v12, %v2884_v11 }
0x1fe2   : > { %4166 = vmatprep.subr.bf16.mxu1 %v4399_v1 }
0x1fe3   : > { %v2564_v16 = vpop.f32.mrb[72].mxu0 }
0x1fe4   : > { %v2565_v19 = vadd.f32 %v3677_v14, %v2564_v16  ;;  %v4136_v20 = vpop.f32.mrb[73].mxu0  ;;  %v3683_v14 = vld [vmem:[#allocation2 + $0x590] ss:$0 sm:$0xff] }
0x1fe5   : > { %v2567_v21 = vpop.f32.mrb[74].mxu0 }
0x1fe6   : > { %v2624_v23 = vpack.c.bf16 %v2565_v19, %v2565_v19  ;;  %v4137_v24 = vpop.f32.mrb[75].mxu0 }
0x1fe7   : > { %v3689_v24 = vld [vmem:[#allocation2 + $0x5e0] ss:$0 sm:$0xff] }
0x1fe8   : > { %v2629_v26 = vsel %vm561_vm7, %v2624_v23, 0 }
0x1fe9   : > { %4147 = vmatpush3.bf16.xpose.msra.mxu0 %v2629_v26 }
0x1fea   : > { %4158 = vmatprep.subr.bf16.mxu0 %v4399_v1 }
0x1ff0   : > { %4149 = vmatmul.mubr.msk.bf16.vlgmr.msra.gmra.mrb[76].mxu0 %vm561_vm7, %v2623_v30 }
0x1ff1   : > { %4162 = vmatprep.mubr.msk.bf16.mxu0 %vm4400_vm0, %v4399_v1  ;;  %4159 = vmatpush3.bf16.msra.mxu0 %v2751_v63  ;;  %v2936_v63 = vld [vmem:[#allocation2 + $0x600] sm:$0xff] }
0x1ff2   : > { %4160 = vmatprep.subr.bf16.mxu0 %v4399_v1  ;;  %v2938_v61 = vpack.c.bf16 %v2936_v63, %v2935_v58 }
0x1ff5   : > { %4161 = vmatpush3.bf16.msra.mxu0 %v2752_v62 }
0x1ff6   : > { %4174 = vmatprep.subr.bf16.mxu0 %v4399_v1 }
0x20c3   : > { %v2665_v31 = vpop.f32.mrb[76].mxu0 }
0x20c4   : > { %v2666_v32 = vadd.f32 %v2665_v31, %v4707_v29  ;;  %v4150_v53 = vpop.f32.mrb[77].mxu0 }
0x20c5   : > { %v2668_v34 = vpop.f32.mrb[78].mxu0 }
0x20c6   : > { %v2669_v35 = vadd.f32 %v2668_v34, %v4707_v29  ;;  %v4151_v36 = vpop.f32.mrb[79].mxu0  ;;  %v2672_v37 = vsel %vm758_vm13, %v2666_v32, -inf }
0x20c7   : > { %2673 = vmax.xlane.f32.xlu1 %v2672_v37 }
0x20c8   : > { %v2675_v38 = vsel %vm758_vm13, %v2669_v35, -inf }
0x20c9   : > { %2676 = vmax.xlane.f32.xlu0 %v2675_v38  ;;  %v2827_v38 = vld [vmem:[#allocation2 + $0x598] sm:$0xff] }
0x2154   : > { %v2674_v40 = vpop.xlane.xlu1 %2673 }
0x2155   : > { %v2678_v41 = vsub.f32 %v2666_v32, %v2674_v40  ;;  %v2828_v40 = vld [vmem:[#allocation2 + $0x5a0] sm:$0xff] }
0x2156   : > { %v2677_v42 = vpop.xlane.xlu0 %2676 }
0x2157   : > { %v2680_v43 = vmul.f32 1.442695, %v2678_v41  ;;  %v2679_v44 = vsub.f32 %v2669_v35, %v2677_v42  ;;  %v2832_v41 = vpack.c.bf16 %v2828_v40, %v2827_v38  ;;  %v2829_v42 = vld [vmem:[#allocation2 + $0x5a8] sm:$0xff] }
0x2159   : > { %4331 = vpow2.f32 %v2680_v43  ;;  %v2682_v45 = vmul.f32 1.442695, %v2679_v44  ;;  %v2830_v43 = vld [vmem:[#allocation2 + $0x5b0] sm:$0xff] }
0x215a   : > { %v2833_v44 = vpack.c.bf16 %v2830_v43, %v2829_v42  ;;  %v3109_v42 = vld [vmem:[#allocation2 + $0x610] sm:$0xff]  ;;  %v3110_v43 = vld [vmem:[#allocation2 + $0x618] sm:$0xff] }
0x215b   : > { %4333 = vpow2.f32 %v2682_v45 }
0x2163   : > { %v4332_v46 = vpop.eup %4331 }
0x2164   : > { %v2684_v47 = vsel %vm758_vm13, %v4332_v46, 0.0 }
0x2165   : > { %v4334_v48 = vpop.eup %4333  ;;  %2685 = vadd.xlane.f32.xlu1 %v2684_v47 }
0x2166   : > { %v2687_v29 = vsel %vm758_vm13, %v4334_v48, 0.0 }
0x2167   : > { %2688 = vadd.xlane.f32.xlu0 %v2687_v29  ;;  %v3685_v29 = vld [vmem:[#allocation2 + $0x6a8] ss:$0 sm:$0xff] }
0x21f2   : > { %v2686_v49 = vpop.xlane.xlu1 %2685 }
0x21f3   : > { %4335 = vrcp.f32 %v2686_v49 }
0x21f4   : > { %v2689_v50 = vpop.xlane.xlu0 %2688 }
0x21f5   : > { %4337 = vrcp.f32 %v2689_v50  ;;  %v3686_v50 = vld [vmem:[#allocation2 + $0x6b0] ss:$0 sm:$0xff] }
0x21fd   : > { %v4336_v52 = vpop.eup %4335 }
0x21fe   : > { %v2692_v54 = vmul.f32 %v4336_v52, %v4332_v46 }
0x21ff   : > { %v4338_v33 = vpop.eup %4337 }
0x2200   : > { %v2693_v55 = vmul.f32 %v4338_v33, %v4334_v48  ;;  %v2933_v33 = vld [vmem:[#allocation2 + $0x5e8] sm:$0xff] }
0x2202   : > { %v2694_v56 = vpack.c.bf16 %v2693_v55, %v2692_v54  ;;  %v2934_v54 = vld [vmem:[#allocation2 + $0x5f0] sm:$0xff] }
0x2204   : > { %4155 = vmatmul.mubr.msk.bf16.vlgmr.msra.gmra.mrb[64].mxu1 %vm758_vm13, %v2694_v56  ;;  %v2937_v56 = vpack.c.bf16 %v2934_v54, %v2933_v33 }
0x2205   : > { %4170 = vmatprep.mubr.msk.bf16.mxu1 %vm4400_vm0, %v4399_v1  ;;  %4167 = vmatpush3.bf16.msra.mxu1 %v2832_v41 }
0x2206   : > { %4168 = vmatprep.subr.bf16.mxu1 %v4399_v1 }
0x2209   : > { %4169 = vmatpush3.bf16.msra.mxu1 %v2833_v44  ;;  %v3114_v44 = vpack.c.bf16 %v3110_v43, %v3109_v42  ;;  %v3701_v42 = vld [vmem:[#allocation2 + $0x6a0] ss:$0 sm:$0xff] }
0x220a   : > { %4182 = vmatprep.subr.bf16.mxu1 %v4399_v1 }
0x22d7   : > { %v2736_v0 = vpop.f32.mrb[64].mxu1 }
0x22d8   : > { %v4156_v2 = vpop.f32.mrb[65].mxu1  ;;  %v2743_v4 = vmul.f32 %v4555_v17, %v2736_v0 }
0x22d9   : > { %v2739_v3 = vpop.f32.mrb[66].mxu1 }
0x22da   : > { %v2744_v5 = vmul.f32 %v4558_v18, %v2739_v3  ;;  %v4157_v6 = vpop.f32.mrb[67].mxu1 }
0x22dc   : > { %v2745_v8 = vadd.f32 %v2744_v5, %v2743_v4 }
0x22de   : > { %v2750_v10 = vpack.c.bf16 %v2745_v8, %v2745_v8 }
0x22e0   : > { %4163 = vmatmul.mubr.msk.bf16.vlgmr.msra.gmra.mrb[80].mxu0 %vm561_vm7, %v2750_v10 }
0x22e1   : > { %4175 = vmatpush3.bf16.msra.mxu0 %v2886_v9  ;;  %4178 = vmatprep.mubr.msk.bf16.mxu0 %vm4400_vm0, %v4399_v1 }
0x22e2   : > { %4176 = vmatprep.subr.bf16.mxu0 %v4399_v1 }
0x22e5   : > { %4177 = vmatpush3.bf16.msra.mxu0 %v2887_v13 }
0x22e6   : > { %4190 = vmatprep.subr.bf16.mxu0 %v4399_v1 }
0x22e8   : > { %4179 = vmatmul.mubr.msk.bf16.vlgmr.msra.gmra.mrb[84].mxu0 %vm561_vm7, %v4734_v59 }
0x22e9   : > { %4192 = vmatprep.mubr.msk.bf16.mxu0 %vm4400_vm0, %v4399_v1 }
0x23b3   : > { %v2795_v15 = vpop.f32.mrb[80].mxu0 }
0x23b4   : > { %v2796_v16 = vadd.f32 %v3683_v14, %v2795_v15  ;;  %v4164_v19 = vpop.f32.mrb[81].mxu0 }
0x23b5   : > { %v2798_v20 = vpop.f32.mrb[82].mxu0 }
0x23b6   : > { %v4165_v21 = vpop.f32.mrb[83].mxu0  ;;  %v2801_v22 = vadd.f32 %v2796_v16, %v4808_v60 }
0x23b8   : > { %v2804_v23 = vsel %vm561_vm7, %v2801_v22, 0.0 }
0x23b9   : > { %2805 = vadd.xlane.f32.xlu1 %v2804_v23 }
0x23bb   : > { %v2927_v26 = vpop.f32.mrb[84].mxu0 }
0x23bc   : > { %v2928_v27 = vadd.f32 %v3689_v24, %v2927_v26  ;;  %v4180_v28 = vpop.f32.mrb[85].mxu0 }
0x23bd   : > { %v2930_v30 = vpop.f32.mrb[86].mxu0 }
0x23be   : > { %v2987_v31 = vpack.c.bf16 %v2928_v27, %v2928_v27  ;;  %v4181_v32 = vpop.f32.mrb[87].mxu0 }
0x23c0   : > { %v2992_v53 = vsel %vm561_vm7, %v2987_v31, 0 }
0x23c1   : > { %4191 = vmatpush3.bf16.xpose.msra.mxu0 %v2992_v53 }
0x23c2   : > { %4202 = vmatprep.subr.bf16.mxu0 %v4399_v1 }
0x2446   : > { %v2806_v34 = vpop.xlane.xlu1 %2805 }
0x2447   : > { %v2807_v35 = vmul.f32 0.03125, %v2806_v34 }
0x2449   : > { %v2808_v36 = vsub.f32 %v2801_v22, %v2807_v35 }
0x244b   : > { %v2809_v37 = vmul.f32 %v2808_v36, %v2808_v36 }
0x244d   : > { %v2810_v60 = vsel %vm561_vm7, %v2809_v37, 0.0 }
0x244e   : > { %2811 = vadd.xlane.f32.xlu0 %v2810_v60 }
0x24db   : > { %v2812_v45 = vpop.xlane.xlu0 %2811 }
0x24dc   : > { %v2813_v46 = vmul.f32 0.03125, %v2812_v45  ;;  %v3111_v45 = vld [vmem:[#allocation2 + $0x620] sm:$0xff] }
0x24de   : > { %v2814_v47 = vadd.f32 1e-05, %v2813_v46  ;;  %v3112_v46 = vld [vmem:[#allocation2 + $0x628] sm:$0xff] }
0x24e0   : > { %4339 = vrsqrt.f32 %v2814_v47  ;;  %v3115_v47 = vpack.c.bf16 %v3112_v46, %v3111_v45 }
0x24ea   : > { %v4340_v48 = vpop.eup %4339 }
0x24eb   : > { %v2816_v49 = vmul.f32 %v4340_v48, %v2808_v36 }
0x24ed   : > { %v2821_v52 = vmul.f32 %v3685_v29, %v2816_v49 }
0x24ef   : > { %v4861_v55 = vadd.f32 %v3686_v50, %v2821_v52 }
0x24f1   : > { %v2831_v57 = vpack.c.bf16 %v4861_v55, %v4861_v55 }
0x24f3   : > { %4171 = vmatmul.mubr.msk.bf16.vlgmr.msra.gmra.mrb[68].mxu1 %vm561_vm7, %v2831_v57  ;;  %v3695_v57 = vld [vmem:[#allocation2 + $0x630] ss:$0 sm:$0xff] }
0x24f4   : > { %4183 = vmatpush3.bf16.msra.mxu1 %v2937_v56  ;;  %4186 = vmatprep.mubr.msk.bf16.mxu1 %vm4400_vm0, %v4399_v1 }
0x24f5   : > { %4184 = vmatprep.subr.bf16.mxu1 %v4399_v1 }
0x24f8   : > { %4185 = vmatpush3.bf16.msra.mxu1 %v2938_v61 }
0x24f9   : > { %4196 = vmatprep.subr.bf16.mxu1 %v4399_v1 }
0x24fb   : > { %4187 = vmatmul.mubr.msk.bf16.vlgmr.msra.gmra.mrb[72].mxu1 %vm561_vm7, %v4734_v59 }
0x24fc   : > { %4198 = vmatprep.mubr.msk.bf16.mxu1 %vm4400_vm0, %v4399_v1 }
0x25c6   : > { %v2876_v62 = vpop.f32.mrb[68].mxu1 }
0x25c7   : > { %v2877_v0 = vadd.f32 %v3687_v25, %v2876_v62  ;;  %v4172_v2 = vpop.f32.mrb[69].mxu1 }
0x25c8   : > { %v2879_v3 = vpop.f32.mrb[70].mxu1 }
0x25c9   : > { %v2984_v4 = vmul.f32 %v4555_v17, %v2877_v0  ;;  %v2985_v5 = vmul.f32 %v4558_v18, %v2877_v0  ;;  %v4173_v6 = vpop.f32.mrb[71].mxu1 }
0x25ca   : > { %v3190_v6 = vld [vmem:[#allocation2 + $0x638] sm:$0xff] }
0x25cb   : > { %v2986_v7 = vpack.c.bf16 %v2985_v5, %v2984_v4 }
0x25cd   : > { %4193 = vmatmul.mubr.msk.bf16.vlgmr.msra.gmra.mrb[88].mxu0 %vm561_vm7, %v2986_v7  ;;  %v3191_v7 = vld [vmem:[#allocation2 + $0x640] sm:$0xff] }
0x25ce   : > { %v2978_v8 = vpop.f32.mrb[72].mxu1  ;;  %4206 = vmatprep.mubr.msk.bf16.mxu0 %vm4400_vm0, %v4399_v1  ;;  %4203 = vmatpush3.bf16.msra.mxu0 %v3114_v44 }
0x25cf   : > { %v2979_v59 = vadd.f32 %v3691_v39, %v2978_v8  ;;  %v4188_v9 = vpop.f32.mrb[73].mxu1  ;;  %4204 = vmatprep.subr.bf16.mxu0 %v4399_v1  ;;  %v3195_v39 = vpack.c.bf16 %v3191_v7, %v3190_v6  ;;  %v3192_v8 = vld [vmem:[#allocation2 + $0x648] sm:$0xff]  ;;  %v3358_v7 = vld [vmem:[#allocation2 + $0x6f8] sm:$0xff] }
0x25d0   : > { %v2981_v10 = vpop.f32.mrb[74].mxu1 }
0x25d1   : > { %v3058_v11 = vpack.c.bf16 %v2979_v59, %v2979_v59  ;;  %v4189_v12 = vpop.f32.mrb[75].mxu1  ;;  %v3193_v59 = vld [vmem:[#allocation2 + $0x650] sm:$0xff]  ;;  %v3247_v10 = vld [vmem:[#allocation2 + $0x668] sm:$0xff] }
0x25d2   : > { %4205 = vmatpush3.bf16.msra.mxu0 %v3115_v47  ;;  %v3196_v9 = vpack.c.bf16 %v3193_v59, %v3192_v8  ;;  %v3360_v59 = vld [vmem:[#allocation2 + $0x708] sm:$0xff] }
0x25d3   : > { %v3063_v13 = vsel %vm786_vm12, %v3058_v11, 0  ;;  %4218 = vmatprep.subr.bf16.mxu0 %v4399_v1  ;;  %v3248_v11 = vld [vmem:[#allocation2 + $0x670] sm:$0xff] }
0x25d4   : > { %4197 = vmatpush3.bf16.msra.mxu1 %v3063_v13  ;;  %v3249_v13 = vld [vmem:[#allocation2 + $0x678] sm:$0xff] }
0x25d5   : > { %4210 = vmatprep.subr.bf16.mxu1 %v4399_v1 }
0x26a0   : > { %v3028_v14 = vpop.f32.mrb[88].mxu0 }
0x26a1   : > { %v3029_v15 = vadd.f32 %v4769_v51, %v3028_v14  ;;  %v4194_v16 = vpop.f32.mrb[89].mxu0  ;;  %v3256_v14 = vpack.c.bf16 %v3249_v13, %v3248_v11 }
0x26a2   : > { %v3031_v19 = vpop.f32.mrb[90].mxu0 }
0x26a3   : > { %v3032_v20 = vadd.f32 %v4769_v51, %v3031_v19  ;;  %v4195_v21 = vpop.f32.mrb[91].mxu0  ;;  %v3035_v22 = vsel %vm758_vm13, %v3029_v15, -inf }
0x26a4   : > { %3036 = vmax.xlane.f32.xlu1 %v3035_v22  ;;  %v3697_v21 = vld [vmem:[#allocation2 + $0x6b8] ss:$0 sm:$0xff] }
0x26a5   : > { %v3038_v23 = vsel %vm758_vm13, %v3032_v20, -inf }
0x26a6   : > { %3039 = vmax.xlane.f32.xlu0 %v3038_v23  ;;  %v3698_v23 = vld [vmem:[#allocation2 + $0x6c0] ss:$0 sm:$0xff] }
0x2731   : > { %v3037_v24 = vpop.xlane.xlu1 %3036 }
0x2732   : > { %v3041_v26 = vsub.f32 %v3029_v15, %v3037_v24 }
0x2733   : > { %v3040_v27 = vpop.xlane.xlu0 %3039 }
0x2734   : > { %v3043_v28 = vmul.f32 1.442695, %v3041_v26  ;;  %v3042_v30 = vsub.f32 %v3032_v20, %v3040_v27 }
0x2736   : > { %4341 = vpow2.f32 %v3043_v28  ;;  %v3045_v31 = vmul.f32 1.442695, %v3042_v30  ;;  %v3250_v28 = vld [vmem:[#allocation2 + $0x680] sm:$0xff]  ;;  %v3251_v30 = vld [vmem:[#allocation2 + $0x688] sm:$0xff] }
0x2738   : > { %4343 = vpow2.f32 %v3045_v31  ;;  %v3257_v31 = vpack.c.bf16 %v3251_v30, %v3250_v28  ;;  %v3417_v30 = vld [vmem:[#allocation2 + $0x740] sm:$0xff] }
0x2740   : > { %v4342_v32 = vpop.eup %4341 }
0x2741   : > { %v3047_v53 = vsel %vm758_vm13, %v4342_v32, 0.0 }
0x2742   : > { %v4344_v34 = vpop.eup %4343  ;;  %3048 = vadd.xlane.f32.xlu1 %v3047_v53  ;;  %v3253_v53 = vld [vmem:[#allocation2 + $0x698] sm:$0xff] }
0x2743   : > { %v3050_v51 = vsel %vm758_vm13, %v4344_v34, 0.0 }
0x2744   : > { %3051 = vadd.xlane.f32.xlu0 %v3050_v51  ;;  %v3699_v51 = vld [vmem:[#allocation2 + $0x658] ss:$0 sm:$0xff] }
0x27cf   : > { %v3049_v35 = vpop.xlane.xlu1 %3048 }
0x27d0   : > { %4345 = vrcp.f32 %v3049_v35 }
0x27d1   : > { %v3052_v36 = vpop.xlane.xlu0 %3051 }
0x27d2   : > { %4347 = vrcp.f32 %v3052_v36 }
0x27da   : > { %v4346_v37 = vpop.eup %4345 }
0x27db   : > { %v3055_v38 = vmul.f32 %v4346_v37, %v4342_v32  ;;  %v3252_v32 = vld [vmem:[#allocation2 + $0x690] sm:$0xff] }
0x27dc   : > { %v4348_v60 = vpop.eup %4347 }
0x27dd   : > { %v3056_v40 = vmul.f32 %v4348_v60, %v4344_v34  ;;  %v3258_v34 = vpack.c.bf16 %v3253_v53, %v3252_v32  ;;  %v3419_v53 = vld [vmem:[#allocation2 + $0x750] sm:$0xff] }
0x27df   : > { %v3057_v41 = vpack.c.bf16 %v3056_v40, %v3055_v38 }
0x27e1   : > { %4199 = vmatmul.mubr.msk.bf16.vlgmr.msra.gmra.mrb[76].mxu1 %vm758_vm13, %v3057_v41 }
0x27e2   : > { %4214 = vmatprep.mubr.msk.bf16.mxu1 %vm4400_vm0, %v4399_v1  ;;  %4211 = vmatpush3.bf16.msra.mxu1 %v3195_v39  ;;  %v3359_v39 = vld [vmem:[#allocation2 + $0x700] sm:$0xff] }
0x27e3   : > { %4212 = vmatprep.subr.bf16.mxu1 %v4399_v1  ;;  %v3363_v8 = vpack.c.bf16 %v3359_v39, %v3358_v7 }
0x27e6   : > { %4213 = vmatpush3.bf16.msra.mxu1 %v3196_v9  ;;  %v3361_v9 = vld [vmem:[#allocation2 + $0x710] sm:$0xff] }
0x27e7   : > { %4230 = vmatprep.subr.bf16.mxu1 %v4399_v1 }
0x28b4   : > { %v3099_v48 = vpop.f32.mrb[76].mxu1 }
0x28b5   : > { %v4200_v29 = vpop.f32.mrb[77].mxu1  ;;  %v3106_v50 = vmul.f32 %v4555_v17, %v3099_v48 }
0x28b6   : > { %v3102_v49 = vpop.f32.mrb[78].mxu1 }
0x28b7   : > { %v3107_v52 = vmul.f32 %v4558_v18, %v3102_v49  ;;  %v4201_v33 = vpop.f32.mrb[79].mxu1 }
0x28b9   : > { %v3108_v54 = vadd.f32 %v3107_v52, %v3106_v50 }
0x28bb   : > { %v3113_v56 = vpack.c.bf16 %v3108_v54, %v3108_v54 }
0x28bd   : > { %4207 = vmatmul.mubr.msk.bf16.vlgmr.msra.gmra.mrb[92].mxu0 %vm561_vm7, %v3113_v56 }
0x28be   : > { %4226 = vmatprep.mubr.msk.bf16.mxu0 %vm4400_vm0, %v4399_v1 }
0x2990   : > { %v3158_v58 = vpop.f32.mrb[92].mxu0 }
0x2991   : > { %v3159_v63 = vadd.f32 %v3695_v57, %v3158_v58  ;;  %v4208_v61 = vpop.f32.mrb[93].mxu0 }
0x2992   : > { %v3161_v25 = vpop.f32.mrb[94].mxu0  ;;  %v3703_v61 = vld [vmem:[#allocation2 + $0x6c8] ss:$0 sm:$0xff] }
0x2993   : > { %v4209_v62 = vpop.f32.mrb[95].mxu0  ;;  %v3164_v0 = vadd.f32 %v3159_v63, %v4861_v55  ;;  %v3246_v55 = vld [vmem:[#allocation2 + $0x660] sm:$0xff] }
0x2994   : > { %v3255_v12 = vpack.c.bf16 %v3247_v10, %v3246_v55  ;;  %v3704_v62 = vld [vmem:[#allocation2 + $0x6d0] ss:$0 sm:$0xff]  ;;  %v3364_v55 = vpack.c.bf16 %v3361_v9, %v3360_v59 }
0x2995   : > { %v3167_v17 = vsel %vm561_vm7, %v3164_v0, 0.0 }
0x2996   : > { %3168 = vadd.xlane.f32.xlu1 %v3167_v17  ;;  %4219 = vmatpush3.bf16.msra.mxu0 %v3255_v12 }
0x2997   : > { %4220 = vmatprep.subr.bf16.mxu0 %v4399_v1 }
0x299a   : > { %4221 = vmatpush3.bf16.msra.mxu0 %v3256_v14  ;;  %v3705_v14 = vld [vmem:[#allocation2 + $0x6e8] ss:$0 sm:$0xff] }
0x299b   : > { %4222 = vmatprep.subr.bf16.mxu0 %v4399_v1 }
0x299e   : > { %4223 = vmatpush3.bf16.msra.mxu0 %v3257_v31  ;;  %v3418_v31 = vld [vmem:[#allocation2 + $0x748] sm:$0xff] }
0x299f   : > { %4224 = vmatprep.subr.bf16.mxu0 %v4399_v1  ;;  %v3432_v32 = vpack.c.bf16 %v3418_v31, %v3417_v30 }
0x29a2   : > { %4225 = vmatpush3.bf16.msra.mxu0 %v3258_v34  ;;  %v3420_v34 = vld [vmem:[#allocation2 + $0x758] sm:$0xff] }
0x2a23   : > { %v3169_v18 = vpop.xlane.xlu1 %3168 }
0x2a24   : > { %v3170_v2 = vmul.f32 0.03125, %v3169_v18 }
0x2a26   : > { %v3171_v3 = vsub.f32 %v3164_v0, %v3170_v2 }
0x2a28   : > { %v3172_v4 = vmul.f32 %v3171_v3, %v3171_v3 }
0x2a2a   : > { %v3173_v5 = vsel %vm561_vm7, %v3172_v4, 0.0 }
0x2a2b   : > { %3174 = vadd.xlane.f32.xlu0 %v3173_v5 }
0x2ab8   : > { %v3175_v15 = vpop.xlane.xlu0 %3174 }
0x2ab9   : > { %v3176_v16 = vmul.f32 0.03125, %v3175_v15 }
0x2abb   : > { %v3177_v19 = vadd.f32 1e-05, %v3176_v16  ;;  %v3706_v16 = vld [vmem:[#allocation2 + $0x6f0] ss:$0 sm:$0xff] }
0x2abd   : > { %4349 = vrsqrt.f32 %v3177_v19 }
0x2ac7   : > { %v4350_v20 = vpop.eup %4349 }
0x2ac8   : > { %v3179_v22 = vmul.f32 %v4350_v20, %v3171_v3  ;;  %v3413_v20 = vld [vmem:[#allocation2 + $0x720] sm:$0xff] }
0x2aca   : > { %v3184_v24 = vmul.f32 %v3697_v21, %v3179_v22  ;;  %v3414_v21 = vld [vmem:[#allocation2 + $0x728] sm:$0xff] }
0x2acc   : > { %v3189_v26 = vadd.f32 %v3698_v23, %v3184_v24  ;;  %v3430_v23 = vpack.c.bf16 %v3414_v21, %v3413_v20 }
0x2ace   : > { %v3194_v27 = vpack.c.bf16 %v3189_v26, %v3189_v26 }
0x2ad0   : > { %4215 = vmatmul.mubr.msk.bf16.vlgmr.msra.gmra.mrb[80].mxu1 %vm561_vm7, %v3194_v27  ;;  %v3416_v27 = vld [vmem:[#allocation2 + $0x738] sm:$0xff] }
0x2ad1   : > { %4234 = vmatprep.mubr.msk.bf16.mxu1 %vm4400_vm0, %v4399_v1  ;;  %4231 = vmatpush3.bf16.msra.mxu1 %v3363_v8 }
0x2ad2   : > { %4232 = vmatprep.subr.bf16.mxu1 %v4399_v1 }
0x2ad5   : > { %4233 = vmatpush3.bf16.msra.mxu1 %v3364_v55 }
0x2ad6   : > { %4238 = vmatprep.subr.bf16.mxu1 %v4399_v1 }
0x2ba3   : > { %v3239_v35 = vpop.f32.mrb[80].mxu1 }
0x2ba4   : > { %v3240_v36 = vadd.f32 %v3699_v51, %v3239_v35  ;;  %v4216_v37 = vpop.f32.mrb[81].mxu1  ;;  %v3433_v51 = vpack.c.bf16 %v3420_v34, %v3419_v53  ;;  %v3421_v35 = vld [vmem:[#allocation2 + $0x760] sm:$0xff] }
0x2ba5   : > { %v3242_v60 = vpop.f32.mrb[82].mxu1 }
0x2ba6   : > { %v3245_v38 = vmax.f32 %v3240_v36, 0.0  ;;  %v4217_v40 = vpop.f32.mrb[83].mxu1  ;;  %v3422_v36 = vld [vmem:[#allocation2 + $0x768] sm:$0xff]  ;;  %v3423_v60 = vld [vmem:[#allocation2 + $0x770] sm:$0xff] }
0x2ba7   : > { %v3434_v37 = vpack.c.bf16 %v3422_v36, %v3421_v35 }
0x2ba8   : > { %v3254_v41 = vpack.c.bf16 %v3245_v38, %v3245_v38  ;;  %v3424_v38 = vld [vmem:[#allocation2 + $0x778] sm:$0xff] }
0x2ba9   : > { %v3435_v40 = vpack.c.bf16 %v3424_v38, %v3423_v60 }
0x2baa   : > { %4227 = vmatmul.mubr.msk.bf16.vlgmr.msra.gmra.mrb[96].mxu0 %vm990_vm14, %v3254_v41  ;;  %v3425_v41 = vld [vmem:[#allocation2 + $0x780] sm:$0xff] }
0x2c7d   : > { %v3301_v43 = vpop.f32.mrb[96].mxu0 }
0x2c7e   : > { %v3302_v44 = vadd.f32 %v3701_v42, %v3301_v43  ;;  %v4228_v45 = vpop.f32.mrb[97].mxu0  ;;  %v3426_v42 = vld [vmem:[#allocation2 + $0x788] sm:$0xff] }
0x2c7f   : > { %v3304_v46 = vpop.f32.mrb[98].mxu0  ;;  %v3436_v43 = vpack.c.bf16 %v3426_v42, %v3425_v41  ;;  %v3428_v45 = vld [vmem:[#allocation2 + $0x798] sm:$0xff] }
0x2c80   : > { %v4229_v47 = vpop.f32.mrb[99].mxu0  ;;  %v3307_v48 = vadd.f32 %v3302_v44, %v3189_v26  ;;  %v3415_v26 = vld [vmem:[#allocation2 + $0x730] sm:$0xff] }
0x2c81   : > { %v3431_v28 = vpack.c.bf16 %v3416_v27, %v3415_v26  ;;  %v3427_v44 = vld [vmem:[#allocation2 + $0x790] sm:$0xff]  ;;  %v3707_v47 = vld [vmem:[#allocation2 + $0x718] ss:$0 sm:$0xff] }
0x2c82   : > { %v3310_v29 = vsel %vm561_vm7, %v3307_v48, 0.0  ;;  %v3437_v46 = vpack.c.bf16 %v3428_v45, %v3427_v44 }
0x2c83   : > { %3311 = vadd.xlane.f32.xlu1 %v3310_v29 }
0x2d10   : > { %v3312_v49 = vpop.xlane.xlu1 %3311 }
0x2d11   : > { %v3313_v50 = vmul.f32 0.03125, %v3312_v49 }
0x2d13   : > { %v3314_v52 = vsub.f32 %v3307_v48, %v3313_v50 }
0x2d15   : > { %v3315_v33 = vmul.f32 %v3314_v52, %v3314_v52 }
0x2d17   : > { %v3316_v54 = vsel %vm561_vm7, %v3315_v33, 0.0 }
0x2d18   : > { %3317 = vadd.xlane.f32.xlu0 %v3316_v54  ;;  %v3709_v54 = vld [vmem:[#allocation2 + $0x7a0] ss:$0 sm:$0xff] }
0x2da5   : > { %v3318_v56 = vpop.xlane.xlu0 %3317 }
0x2da6   : > { %v3319_v57 = vmul.f32 0.03125, %v3318_v56 }
0x2da8   : > { %v3320_v58 = vadd.f32 1e-05, %v3319_v57 }
0x2daa   : > { %4351 = vrsqrt.f32 %v3320_v58 }
0x2db4   : > { %v4352_v63 = vpop.eup %4351 }
0x2db5   : > { %v3322_v25 = vmul.f32 %v4352_v63, %v3314_v52 }
0x2db7   : > { %v3327_v0 = vmul.f32 %v3703_v61, %v3322_v25 }
0x2db9   : > { %v3332_v17 = vadd.f32 %v3704_v62, %v3327_v0 }
0x2dbb   : > { %v3335_v18 = vsel %vm561_vm7, %v3332_v17, 0.0 }
0x2dbc   : > { %3336 = vadd.xlane.f32.xlu1 %v3335_v18 }
0x2e49   : > { %v3337_v2 = vpop.xlane.xlu1 %3336 }
0x2e4a   : > { %v3338_v3 = vmul.f32 0.03125, %v3337_v2 }
0x2e4c   : > { %v3339_v4 = vsub.f32 %v3332_v17, %v3338_v3 }
0x2e4e   : > { %v3340_v5 = vmul.f32 %v3339_v4, %v3339_v4 }
0x2e50   : > { %v3341_v6 = vsel %vm561_vm7, %v3340_v5, 0.0 }
0x2e51   : > { %3342 = vadd.xlane.f32.xlu0 %v3341_v6 }
0x2ede   : > { %v3343_v10 = vpop.xlane.xlu0 %3342 }
0x2edf   : > { %v3344_v11 = vmul.f32 0.03125, %v3343_v10 }
0x2ee1   : > { %v3345_v12 = vadd.f32 1e-05, %v3344_v11 }
0x2ee3   : > { %4353 = vrsqrt.f32 %v3345_v12 }
0x2eed   : > { %v4354_v13 = vpop.eup %4353 }
0x2eee   : > { %v3347_v15 = vmul.f32 %v4354_v13, %v3339_v4 }
0x2ef0   : > { %v3352_v19 = vmul.f32 %v3705_v14, %v3347_v15 }
0x2ef2   : > { %v3357_v22 = vadd.f32 %v3706_v16, %v3352_v19 }
0x2ef4   : > { %v3362_v24 = vpack.c.bf16 %v3357_v22, %v3357_v22 }
0x2ef6   : > { %4235 = vmatmul.mubr.msk.bf16.vlgmr.msra.gmra.mrb[84].mxu1 %vm561_vm7, %v3362_v24 }
0x2ef7   : > { %4239 = vmatpush3.bf16.msra.mxu1 %v3430_v23  ;;  %4254 = vmatprep.mubr.msk.bf16.mxu1 %vm4400_vm0, %v4399_v1 }
0x2ef8   : > { %4240 = vmatprep.subr.bf16.mxu1 %v4399_v1 }
0x2efb   : > { %4241 = vmatpush3.bf16.msra.mxu1 %v3431_v28 }
0x2efc   : > { %4242 = vmatprep.subr.bf16.mxu1 %v4399_v1 }
0x2eff   : > { %4243 = vmatpush3.bf16.msra.mxu1 %v3432_v32 }
0x2f00   : > { %4244 = vmatprep.subr.bf16.mxu1 %v4399_v1 }
0x2f03   : > { %4245 = vmatpush3.bf16.msra.mxu1 %v3433_v51 }
0x2f04   : > { %4246 = vmatprep.subr.bf16.mxu1 %v4399_v1 }
0x2f07   : > { %4247 = vmatpush3.bf16.msra.mxu1 %v3434_v37 }
0x2f08   : > { %4248 = vmatprep.subr.bf16.mxu1 %v4399_v1 }
0x2f0b   : > { %4249 = vmatpush3.bf16.msra.mxu1 %v3435_v40 }
0x2f0c   : > { %4250 = vmatprep.subr.bf16.mxu1 %v4399_v1 }
0x2f0f   : > { %4251 = vmatpush3.bf16.msra.mxu1 %v3436_v43 }
0x2f10   : > { %4252 = vmatprep.subr.bf16.mxu1 %v4399_v1 }
0x2f13   : > { %4253 = vmatpush3.bf16.msra.mxu1 %v3437_v46 }
0x2fc9   : > { %v3407_v48 = vpop.f32.mrb[84].mxu1 }
0x2fca   : > { %v3408_v29 = vadd.f32 %v3707_v47, %v3407_v48  ;;  %v4236_v49 = vpop.f32.mrb[85].mxu1 }
0x2fcb   : > { %v3410_v50 = vpop.f32.mrb[86].mxu1 }
0x2fcc   : > { %v3429_v52 = vpack.c.bf16 %v3408_v29, %v3408_v29  ;;  %v4237_v33 = vpop.f32.mrb[87].mxu1 }
0x2fce   : > { %4255 = vmatmul.mubr.bf16.vlgmr.msra.gmra.mrb[88].mxu1 %v3429_v52 }
0x30a1   : > { %v3477_v56 = vpop.f32.mrb[88].mxu1 }
0x30a2   : > { %v3478_v57 = vadd.f32 %v3709_v54, %v3477_v56  ;;  %v4256_v1 = vpop.f32.mrb[89].mxu1 }
0x30a3   : > { %v3480_v58 = vpop.f32.mrb[90].mxu1 }
0x30a4   : > { %3483 = vst [vmem:[%s374_s25] sm:$0xff] %v3478_v57  ;;  %v4257_v63 = vpop.f32.mrb[91].mxu1 }
0x30a5 PF: > { %s19_s27 = sadd.s32 1, %s4393_s27  }
0x30a6   : > { %p16_p3 = scmp.ge.s32.totalorder %s19_s27, 4  }
0x30a8   :  { %18 = sbr.rel (!%p16_p3) target bundleno = 1 (0x1), region = 99 }
0x30af   :  { %3503 = vsyncpa [#allocation3], 1 }
0x30b0   :  { %3505 = vsyncpa [#allocation3 + $0x1], 1 }

</bundles_post_ra>
